<compile_context>
chip_gen: v6e
topology: v6e:2x2x1
jax: 0.10.0
libtpu: 0.0.40
codegen_flags: <defaults>
</compile_context>

<pallas_src>
import functools
import math

import jax
import jax.numpy as jnp
from jax.experimental import pallas as pl
from jax.experimental.pallas import tpu as pltpu

HIDDEN_SIZE = 1024
DROPOUT = 0.3            # identity at inference (model.eval())
_MAX_BATCH_TILE = 512    # largest default tile; sweepable up to ~1024


def _round_up(x, m):
    return ((x + m - 1) // m) * m


def _layer_dims(input_size, layers):
    """Per-linear (in, out) dims, matching the PyTorch module."""
    h = HIDDEN_SIZE
    if layers == 2:
        return [(input_size, h), (h, 1)]
    elif layers == 3:
        return [(input_size, h), (h, h // 2), (h // 2, 1)]
    else:  # 4 (and anything else, per the PyTorch `else` branch)
        return [(input_size, h), (h, h // 2), (h // 2, h // 4), (h // 4, 1)]


def init_discriminator_params(key, input_size, layers):
    """PyTorch-like U(-1/sqrt(fan_in), 1/sqrt(fan_in)) init.

    Returns (hidden_weights, hidden_biases, w_last, b_last):
      hidden_weights[i]: (in, out)   bfloat16  (MXU operand)
      hidden_biases[i] : (1, out)    float32
      w_last           : (1, fan_in) float32   (VPU/XLU final layer)
      b_last           : (1, 1)      float32
    """
    dims = _layer_dims(input_size, layers)
    hw, hb = [], []
    w_last = b_last = None
    for li, (fan_in, fan_out) in enumerate(dims):
        key, kw, kb = jax.random.split(key, 3)
        bound = 1.0 / math.sqrt(fan_in)
        w = jax.random.uniform(kw, (fan_in, fan_out), jnp.float32, -bound, bound)
        b = jax.random.uniform(kb, (1, fan_out), jnp.float32, -bound, bound)
        if li == len(dims) - 1:
            w_last, b_last = w.T, b                 # (1, fan_in), (1, 1) f32
        else:
            hw.append(w.astype(jnp.bfloat16))       # (in, out) bf16
            hb.append(b)                            # (1, out)  f32
    return tuple(hw), tuple(hb), w_last, b_last


# ----------------------------- kernel bodies ------------------------------


def _hidden_layer(h_bf16, w_bf16, b_f32):
    """Linear + bias + LeakyReLU(0.2); Dropout is identity at inference."""
    z = jnp.dot(h_bf16, w_bf16, preferred_element_type=jnp.float32) + b_f32
    return jnp.where(z > 0.0, z, 0.2 * z).astype(jnp.bfloat16)


def _final_layer(h_bf16, w_last_f32, b_last_f32, o_ref):
    """Linear(fan_in -> 1) + Sigmoid as a VPU multiply + cross-lane reduce.

    Avoids an N=1 MXU pass; rides slots idle during the big matmuls.
    """
    logit = jnp.sum(h_bf16.astype(jnp.float32) * w_last_f32,
                    axis=-1, keepdims=True) + b_last_f32
    o_ref[...] = jax.nn.sigmoid(logit).astype(o_ref.dtype)


def _make_kernel_manual_weights(nw):
    """Small-batch path: hidden weights arrive as HBM (pl.ANY) refs, DMA'd into
    persistent VMEM scratch on grid step 0 and waited per-layer so the later
    layers' weight loads hide under the earlier layers' matmuls."""

    def kernel(*refs):
        x_ref = refs[0]
        w_hbm = refs[1:1 + nw]
        b_refs = refs[1 + nw:1 + 2 * nw]
        w_last = refs[1 + 2 * nw][...]
        b_last = refs[2 + 2 * nw][...]
        o_ref = refs[3 + 2 * nw]
        w_vmem = refs[4 + 2 * nw:4 + 3 * nw]
        sem = refs[4 + 3 * nw]

        step = pl.program_id(0)
        copies = [pltpu.make_async_copy(w_hbm[i], w_vmem[i], sem.at[i])
                  for i in range(nw)]

        @pl.when(step == 0)
        def _():
            for c in copies:
                c.start()

        h = x_ref[...]                       # bf16 (batch_tile, D)
        for i in range(nw):
            @pl.when(step == 0)
            def _():
                copies[i].wait()
            h = _hidden_layer(h, w_vmem[i][...], b_refs[i][...])

        _final_layer(h, w_last, b_last, o_ref)

    return kernel


def _make_kernel_blockspec_weights(nw):
    """Large-batch path: weights are single-buffered BlockSpec residents."""

    def kernel(*refs):
        x_ref = refs[0]
        w_refs = refs[1:1 + nw]
        b_refs = refs[1 + nw:1 + 2 * nw]
        w_last = refs[1 + 2 * nw][...]
        b_last = refs[2 + 2 * nw][...]
        o_ref = refs[3 + 2 * nw]

        h = x_ref[...]
        for i in range(nw):
            h = _hidden_layer(h, w_refs[i][...], b_refs[i][...])
        _final_layer(h, w_last, b_last, o_ref)

    return kernel


# ------------------------------- wrapper ----------------------------------


@functools.partial(jax.jit, static_argnames=("batch_tile",))
def discriminator_forward(x, params, *, batch_tile=None):
    """Discriminator forward pass.

    x: [B, input_size] float32
    params: (hidden_weights, hidden_biases, w_last, b_last) from
            init_discriminator_params.
    returns: [B, 1] float32 probabilities in [0, 1].
    """
    weights, biases, w_last, b_last = params
    nw = len(weights)
    B, D = x.shape

    # x travels as bf16: halves its HBM traffic and the x VMEM double buffer.
    x = x.astype(jnp.bfloat16)

    if batch_tile is None:
        batch_tile = min(_MAX_BATCH_TILE, max(16, _round_up(B, 16)))
    assert batch_tile % 8 == 0, "batch_tile must be a multiple of 8"

    B_pad = _round_up(B, batch_tile)
    if B_pad != B:
        # Padded rows compute garbage and are sliced off below; there are no
        # cross-batch reductions in the kernel, so this is safe.
        x = jnp.pad(x, ((0, B_pad - B), (0, 0)))
    num_tiles = B_pad // batch_tile

    # Megacore ("parallel") only when each core would get several steps;
    # otherwise a single sequential core avoids duplicating the weight fetch
    # (v7x) and lets the manual step-0 weight DMAs hide under compute.
    use_parallel = num_tiles >= 8

    x_spec = pl.BlockSpec((batch_tile, D), lambda i: (i, 0))

    def resident_spec(p):
        # Constant block index -> fetched once; single-buffered (no 2x VMEM).
        return pl.BlockSpec(p.shape, lambda i: (0, 0),
                            pipeline_mode=pl.Buffered(1))

    small_specs = [resident_spec(b) for b in biases]
    small_specs += [resident_spec(w_last), resident_spec(b_last)]

    if use_parallel:
        kernel = _make_kernel_blockspec_weights(nw)
        in_specs = [x_spec] + [resident_spec(w) for w in weights] + small_specs
        scratch_shapes = []
        semantics = ("parallel",)
    else:
        kernel = _make_kernel_manual_weights(nw)
        in_specs = ([x_spec]
                    + [pl.BlockSpec(memory_space=pl.ANY) for _ in weights]
                    + small_specs)
        scratch_shapes = ([pltpu.VMEM(w.shape, w.dtype) for w in weights]
                          + [pltpu.SemaphoreType.DMA((nw,))])
        semantics = ("arbitrary",)

    out_spec = pl.BlockSpec((batch_tile, 1), lambda i: (i, 0))

    weight_macs = sum(int(w.size) for w in weights) + int(w_last.size)
    param_bytes = sum(int(p.size) * p.dtype.itemsize
                      for p in (*weights, *biases, w_last, b_last))
    cost = pl.CostEstimate(
        flops=2 * B_pad * weight_macs,
        transcendentals=B_pad,  # one sigmoid per row
        bytes_accessed=int(x.size) * x.dtype.itemsize + param_bytes + B_pad * 4,
    )

    out = pl.pallas_call(
        kernel,
        out_shape=jax.ShapeDtypeStruct((B_pad, 1), jnp.float32),
        grid_spec=pltpu.PrefetchScalarGridSpec(
            num_scalar_prefetch=0,
            grid=(num_tiles,),
            in_specs=in_specs,
            out_specs=out_spec,
            scratch_shapes=scratch_shapes,
        ),
        compiler_params=pltpu.CompilerParams(
            dimension_semantics=semantics,
            vmem_limit_bytes=48 * 1024 * 1024,
        ),
        cost_estimate=cost,
    )(x, *weights, *biases, w_last, b_last)

    return out[:B]


def ref_forward(x, params):
    """Plain-JAX reference with the same bf16-operand / f32-accumulate math."""
    weights, biases, w_last, b_last = params
    h = x.astype(jnp.bfloat16)
    for w, b in zip(weights, biases):
        z = jnp.dot(h, w, preferred_element_type=jnp.float32) + b
        h = jnp.where(z > 0.0, z, 0.2 * z).astype(jnp.bfloat16)
    logit = jnp.sum(h.astype(jnp.float32) * w_last, axis=-1, keepdims=True) + b_last
    return jax.nn.sigmoid(logit)


if __name__ == "__main__":
    input_size = 784   # MNIST 28*28 (hidden_size=1024 is fixed by the module)
    layers = 3

    key = jax.random.PRNGKey(0)
    key_x, key_p = jax.random.split(key)
    params = init_discriminator_params(key_p, input_size, layers)

    # Small batch -> single-tile "arbitrary" path with manual weight-DMA overlap.
    x = jax.random.normal(key_x, (64, input_size), dtype=jnp.float32)
    out = jax.block_until_ready(discriminator_forward(x, params))
    assert out.shape == (64, 1), out.shape
    assert bool(jnp.all((out >= 0.0) & (out <= 1.0)))
    ref = ref_forward(x, params)
    assert bool(jnp.allclose(out, ref, atol=1e-2, rtol=1e-2)), (
        float(jnp.max(jnp.abs(out - ref))))

    # Force the multi-step "parallel" path (8 grid steps, with batch padding).
    x2 = jax.random.normal(key_x, (120, input_size), dtype=jnp.float32)
    out2 = jax.block_until_ready(discriminator_forward(x2, params, batch_tile=16))
    assert out2.shape == (120, 1), out2.shape
    ref2 = ref_forward(x2, params)
    assert bool(jnp.allclose(out2, ref2, atol=1e-2, rtol=1e-2)), (
        float(jnp.max(jnp.abs(out2 - ref2))))

    print("KERNEL_OK")
</pallas_src>

<mosaic_0001>
module attributes {stable_mosaic.version = 11 : i64} {
  func.func @kernel(%arg0: i32, %arg1: memref<64x784xbf16, #tpu.memory_space<vmem>>, %arg2: memref<784x1024xbf16, #tpu.memory_space<any>>, %arg3: memref<1024x512xbf16, #tpu.memory_space<any>>, %arg4: memref<1x1024xf32, #tpu.memory_space<vmem>>, %arg5: memref<1x512xf32, #tpu.memory_space<vmem>>, %arg6: memref<1x512xf32, #tpu.memory_space<vmem>>, %arg7: memref<1x1xf32, #tpu.memory_space<vmem>>, %arg8: memref<64x1xf32, #tpu.memory_space<vmem>>, %arg9: memref<784x1024xbf16, #tpu.memory_space<vmem>>, %arg10: memref<1024x512xbf16, #tpu.memory_space<vmem>>, %arg11: memref<2x!tpu.dma_semaphore, #tpu.memory_space<semaphore_mem>>) attributes {dimension_semantics = [#tpu.dimension_semantics<arbitrary>], iteration_bounds = array<i64: 1>, scalar_prefetch = 0 : i64, scratch_operands = 3 : i64, tpu.core_type = #tpu.core_type<tc>, window_params = [{transform_indices = @transform_0, window_bounds = array<i64: 64, 784>}, {}, {}, {pipeline_mode = #tpu.pipeline_mode<synchronous>, transform_indices = @transform_3, window_bounds = array<i64: 1, 1024>}, {pipeline_mode = #tpu.pipeline_mode<synchronous>, transform_indices = @transform_4, window_bounds = array<i64: 1, 512>}, {pipeline_mode = #tpu.pipeline_mode<synchronous>, transform_indices = @transform_5, window_bounds = array<i64: 1, 512>}, {pipeline_mode = #tpu.pipeline_mode<synchronous>, transform_indices = @transform_6, window_bounds = array<i64: 1, 1>}, {transform_indices = @transform_7, window_bounds = array<i64: 64, 1>}]} {
    %c0 = arith.constant 0 : index
    %c0_0 = arith.constant 0 : index
    %0 = vector.load %arg6[%c0, %c0_0] : memref<1x512xf32, #tpu.memory_space<vmem>>, vector<1x512xf32>
    %c0_1 = arith.constant 0 : index
    %c0_2 = arith.constant 0 : index
    %1 = vector.load %arg7[%c0_1, %c0_2] : memref<1x1xf32, #tpu.memory_space<vmem>>, vector<1x1xf32>
    %c0_i32 = arith.constant 0 : i32
    %2 = arith.cmpi eq, %arg0, %c0_i32 : i32
    %3 = arith.extui %2 : i1 to i32
    %c0_i32_3 = arith.constant 0 : i32
    %c1_i32 = arith.constant 1 : i32
    %c0_i32_4 = arith.constant 0 : i32
    %4 = arith.cmpi ne, %3, %c0_i32_4 : i32
    scf.if %4 {
      %47 = tpu.memref_slice %arg11[%c0_i32_3] : memref<2x!tpu.dma_semaphore, #tpu.memory_space<semaphore_mem>> -> memref<1x!tpu.dma_semaphore, #tpu.memory_space<semaphore_mem>>
      %48 = tpu.memref_squeeze %47 : memref<1x!tpu.dma_semaphore, #tpu.memory_space<semaphore_mem>> -> memref<!tpu.dma_semaphore, #tpu.memory_space<semaphore_mem>>
      tpu.enqueue_dma source(%arg2 : memref<784x1024xbf16, #tpu.memory_space<any>>) target(%arg9 : memref<784x1024xbf16, #tpu.memory_space<vmem>>) target_semaphore(%48 : memref<!tpu.dma_semaphore, #tpu.memory_space<semaphore_mem>>)
      %49 = tpu.memref_slice %arg11[%c1_i32] : memref<2x!tpu.dma_semaphore, #tpu.memory_space<semaphore_mem>> -> memref<1x!tpu.dma_semaphore, #tpu.memory_space<semaphore_mem>>
      %50 = tpu.memref_squeeze %49 : memref<1x!tpu.dma_semaphore, #tpu.memory_space<semaphore_mem>> -> memref<!tpu.dma_semaphore, #tpu.memory_space<semaphore_mem>>
      tpu.enqueue_dma source(%arg3 : memref<1024x512xbf16, #tpu.memory_space<any>>) target(%arg10 : memref<1024x512xbf16, #tpu.memory_space<vmem>>) target_semaphore(%50 : memref<!tpu.dma_semaphore, #tpu.memory_space<semaphore_mem>>)
    } else {
    }
    %c0_5 = arith.constant 0 : index
    %c0_6 = arith.constant 0 : index
    %5 = vector.load %arg1[%c0_5, %c0_6] : memref<64x784xbf16, #tpu.memory_space<vmem>>, vector<64x784xbf16>
    %c0_i32_7 = arith.constant 0 : i32
    %6 = arith.cmpi eq, %arg0, %c0_i32_7 : i32
    %7 = arith.extui %6 : i1 to i32
    %c0_i32_8 = arith.constant 0 : i32
    %c0_i32_9 = arith.constant 0 : i32
    %8 = arith.cmpi ne, %7, %c0_i32_9 : i32
    scf.if %8 {
      %47 = tpu.memref_slice %arg11[%c0_i32_8] : memref<2x!tpu.dma_semaphore, #tpu.memory_space<semaphore_mem>> -> memref<1x!tpu.dma_semaphore, #tpu.memory_space<semaphore_mem>>
      %48 = tpu.memref_squeeze %47 : memref<1x!tpu.dma_semaphore, #tpu.memory_space<semaphore_mem>> -> memref<!tpu.dma_semaphore, #tpu.memory_space<semaphore_mem>>
      tpu.wait_dma2 semaphore(%48 : memref<!tpu.dma_semaphore, #tpu.memory_space<semaphore_mem>>) src(%arg2 : memref<784x1024xbf16, #tpu.memory_space<any>>) dst(%arg9 : memref<784x1024xbf16, #tpu.memory_space<vmem>>)
    } else {
    }
    %c0_10 = arith.constant 0 : index
    %c0_11 = arith.constant 0 : index
    %9 = vector.load %arg9[%c0_10, %c0_11] : memref<784x1024xbf16, #tpu.memory_space<vmem>>, vector<784x1024xbf16>
    %c0_12 = arith.constant 0 : index
    %c0_13 = arith.constant 0 : index
    %10 = vector.load %arg4[%c0_12, %c0_13] : memref<1x1024xf32, #tpu.memory_space<vmem>>, vector<1x1024xf32>
    %cst = arith.constant dense<0.000000e+00> : vector<64x1024xf32>
    %11 = tpu.matmul %5, %9, %cst {dimension_numbers = #tpu.dot_dimension_numbers<[1], [0], [0], [1], [0, 0, 1, 1], [], []>} : vector<64x784xbf16>, vector<784x1024xbf16>, vector<64x1024xf32> -> vector<64x1024xf32>
    %12 = vector.broadcast %10 : vector<1x1024xf32> to vector<64x1024xf32>
    %13 = arith.addf %11, %12 : vector<64x1024xf32>
    %cst_14 = arith.constant 0.000000e+00 : f32
    %14 = vector.broadcast %cst_14 : f32 to vector<64x1024xf32>
    %15 = arith.cmpf ogt, %13, %14 : vector<64x1024xf32>
    %cst_15 = arith.constant 2.000000e-01 : f32
    %16 = vector.broadcast %cst_15 : f32 to vector<64x1024xf32>
    %17 = arith.mulf %16, %13 : vector<64x1024xf32>
    %18 = arith.select %15, %13, %17 : vector<64x1024xi1>, vector<64x1024xf32>
    %19 = arith.truncf %18 : vector<64x1024xf32> to vector<64x1024xbf16>
    %c0_i32_16 = arith.constant 0 : i32
    %20 = arith.cmpi eq, %arg0, %c0_i32_16 : i32
    %21 = arith.extui %20 : i1 to i32
    %c1_i32_17 = arith.constant 1 : i32
    %c0_i32_18 = arith.constant 0 : i32
    %22 = arith.cmpi ne, %21, %c0_i32_18 : i32
    scf.if %22 {
      %47 = tpu.memref_slice %arg11[%c1_i32_17] : memref<2x!tpu.dma_semaphore, #tpu.memory_space<semaphore_mem>> -> memref<1x!tpu.dma_semaphore, #tpu.memory_space<semaphore_mem>>
      %48 = tpu.memref_squeeze %47 : memref<1x!tpu.dma_semaphore, #tpu.memory_space<semaphore_mem>> -> memref<!tpu.dma_semaphore, #tpu.memory_space<semaphore_mem>>
      tpu.wait_dma2 semaphore(%48 : memref<!tpu.dma_semaphore, #tpu.memory_space<semaphore_mem>>) src(%arg3 : memref<1024x512xbf16, #tpu.memory_space<any>>) dst(%arg10 : memref<1024x512xbf16, #tpu.memory_space<vmem>>)
    } else {
    }
    %c0_19 = arith.constant 0 : index
    %c0_20 = arith.constant 0 : index
    %23 = vector.load %arg10[%c0_19, %c0_20] : memref<1024x512xbf16, #tpu.memory_space<vmem>>, vector<1024x512xbf16>
    %c0_21 = arith.constant 0 : index
    %c0_22 = arith.constant 0 : index
    %24 = vector.load %arg5[%c0_21, %c0_22] : memref<1x512xf32, #tpu.memory_space<vmem>>, vector<1x512xf32>
    %cst_23 = arith.constant dense<0.000000e+00> : vector<64x512xf32>
    %25 = tpu.matmul %19, %23, %cst_23 {dimension_numbers = #tpu.dot_dimension_numbers<[1], [0], [0], [1], [0, 0, 1, 1], [], []>} : vector<64x1024xbf16>, vector<1024x512xbf16>, vector<64x512xf32> -> vector<64x512xf32>
    %26 = vector.broadcast %24 : vector<1x512xf32> to vector<64x512xf32>
    %27 = arith.addf %25, %26 : vector<64x512xf32>
    %cst_24 = arith.constant 0.000000e+00 : f32
    %28 = vector.broadcast %cst_24 : f32 to vector<64x512xf32>
    %29 = arith.cmpf ogt, %27, %28 : vector<64x512xf32>
    %cst_25 = arith.constant 2.000000e-01 : f32
    %30 = vector.broadcast %cst_25 : f32 to vector<64x512xf32>
    %31 = arith.mulf %30, %27 : vector<64x512xf32>
    %32 = arith.select %29, %27, %31 : vector<64x512xi1>, vector<64x512xf32>
    %33 = arith.truncf %32 : vector<64x512xf32> to vector<64x512xbf16>
    %34 = arith.extf %33 : vector<64x512xbf16> to vector<64x512xf32>
    %35 = vector.broadcast %0 : vector<1x512xf32> to vector<64x512xf32>
    %36 = arith.mulf %34, %35 : vector<64x512xf32>
    %cst_26 = arith.constant dense<0.000000e+00> : vector<64xf32>
    %37 = vector.multi_reduction <add>, %36, %cst_26 [1] : vector<64x512xf32> to vector<64xf32>
    %38 = vector.shape_cast %37 : vector<64xf32> to vector<64x1xf32>
    %39 = vector.broadcast %1 : vector<1x1xf32> to vector<64x1xf32>
    %40 = arith.addf %38, %39 : vector<64x1xf32>
    %41 = arith.negf %40 : vector<64x1xf32>
    %42 = math.exp %41 : vector<64x1xf32>
    %cst_27 = arith.constant 1.000000e+00 : f32
    %43 = vector.broadcast %cst_27 : f32 to vector<64x1xf32>
    %44 = arith.addf %43, %42 : vector<64x1xf32>
    %45 = arith.divf %43, %44 : vector<64x1xf32>
    %c0_28 = arith.constant 0 : index
    %c0_29 = arith.constant 0 : index
    %46 = vector.load %arg8[%c0_28, %c0_29] : memref<64x1xf32, #tpu.memory_space<vmem>>, vector<64x1xf32>
    tpu.vector_store %arg8[%c0_28, %c0_29], %45 {strides = array<i32>} : memref<64x1xf32, #tpu.memory_space<vmem>>, vector<64x1xf32>,
    return
  }
  func.func @transform_0(%arg0: i32) -> (i32, i32) {
    %c0_i32 = arith.constant 0 : i32
    %c0_i32_0 = arith.constant 0 : i32
    return %arg0, %c0_i32 : i32, i32
  }
  func.func @transform_3(%arg0: i32) -> (i32, i32) {
    %c0_i32 = arith.constant 0 : i32
    %c0_i32_0 = arith.constant 0 : i32
    %c0_i32_1 = arith.constant 0 : i32
    return %c0_i32, %c0_i32_0 : i32, i32
  }
  func.func @transform_4(%arg0: i32) -> (i32, i32) {
    %c0_i32 = arith.constant 0 : i32
    %c0_i32_0 = arith.constant 0 : i32
    %c0_i32_1 = arith.constant 0 : i32
    return %c0_i32, %c0_i32_0 : i32, i32
  }
  func.func @transform_5(%arg0: i32) -> (i32, i32) {
    %c0_i32 = arith.constant 0 : i32
    %c0_i32_0 = arith.constant 0 : i32
    %c0_i32_1 = arith.constant 0 : i32
    return %c0_i32, %c0_i32_0 : i32, i32
  }
  func.func @transform_6(%arg0: i32) -> (i32, i32) {
    %c0_i32 = arith.constant 0 : i32
    %c0_i32_0 = arith.constant 0 : i32
    %c0_i32_1 = arith.constant 0 : i32
    return %c0_i32, %c0_i32_0 : i32, i32
  }
  func.func @transform_7(%arg0: i32) -> (i32, i32) {
    %c0_i32 = arith.constant 0 : i32
    %c0_i32_0 = arith.constant 0 : i32
    return %arg0, %c0_i32 : i32, i32
  }
}

</mosaic_0001>

<bundles_post_ra>
// kernel: discriminator_forward.1
= control target key start
LH: loop header
LB: loop body
LE: loop exit
PB: predicated region body
PF: predicated region fallthrough
CT: control target
= control target key end

     0   :  { %s9126_s0 = inlined_call_operand.vmem [shape: bf16[64,784], index: 0, kind: input, shape index: {}]   ;;  %s9127_s1 = inlined_call_operand.hbm [shape: bf16[784,1024], index: 1, kind: input, shape index: {}]   ;;  %s9128_s2 = inlined_call_operand.hbm [shape: bf16[1024,512], index: 2, kind: input, shape index: {}]   ;;  %s9129_s3 = inlined_call_operand.hbm [shape: f32[1,1024], index: 3, kind: input, shape index: {}]   ;;  %s9130_s4 = inlined_call_operand.hbm [shape: f32[1,512], index: 4, kind: input, shape index: {}]   ;;  %s9131_s5 = inlined_call_operand.hbm [shape: f32[1,512], index: 5, kind: input, shape index: {}]   ;;  %s9132_s6 = inlined_call_operand.<no memory space> [shape: f32[1,1], index: 6, kind: input, shape index: {}]   ;;  %s9133_s7 = inlined_call_operand.vmem [shape: f32[64,1], index: 7, kind: output, shape index: {}]  }
   0x1   :  { %v12_v0 = vstv %s9132_s6 }
   0x2   :  { %13 = vst [vmem:[#allocation5] sm:$0x1] %v12_v0 }
   0x3   :  { %14 = vsyncpa [#allocation7], 0 }
   0x4   :  { %15 = vsyncpa [#allocation9], 0  ;;  %s7779_s26 = smov [#allocation8]   ;;  %s7780_s28 = smov [#allocation6]  }
   0x5   :  { %s34_s27 = sshll.u32 %s7779_s26, 4  ;;  %s24_s29 = sshll.u32 %s7780_s28, 4  ;;  %s35_s27 = int_to_ptr.vmem [resolvable:$true] %s34_s27  ;;  %s25_s29 = int_to_ptr.vmem [resolvable:$true] %s24_s29 }
   0x6   :  { %s7679_s30 = scalar_lea.vmem %s35_s27, 64  ;;  %p7684_p1 = scmp.lt.s32.totalorder %s35_s27, %s35_s27 }
   0x7   :  { %p7680_p0 = scmp.ne.s32.totalorder %s35_s27, %s7679_s30  ;;  %p7685_p2 = scmp.lt.s32.totalorder %s7679_s30, %s7679_s30 }
   0x9   :  { %p7686_p3 = por %p7685_p2, %p7684_p1 }
   0xb   :  { %p7687_p4 = pnand %p7686_p3, %p7680_p0 }
   0xd   :  { %7690 = shalt.err (!%p7687_p4)
}
   0xe   :  { %37 = dma.hbm_to_vmem [thread:$0]  %s9130_s4, 64, %s35_s27, [#allocation9]  }
   0xf   :  { %s7699_s6 = scalar_lea.vmem %s25_s29, 128  ;;  %p7704_p6 = scmp.lt.s32.totalorder %s25_s29, %s25_s29 }
  0x10   :  { %p7700_p5 = scmp.ne.s32.totalorder %s25_s29, %s7699_s6  ;;  %p7705_p7 = scmp.lt.s32.totalorder %s7699_s6, %s7699_s6 }
  0x12   :  { %p7706_p8 = por %p7705_p7, %p7704_p6 }
  0x14   :  { %p7707_p9 = pnand %p7706_p8, %p7700_p5 }
  0x16   :  { %7710 = shalt.err (!%p7707_p9)
}
  0x17   :  { %27 = dma.hbm_to_vmem [thread:$0]  %s9129_s3, 128, %s25_s29, [#allocation7]  }
  0x18   :  { %s7781_s12 = smov [#allocation10]  }
  0x19   :  { %s44_s13 = sshll.u32 %s7781_s12, 4  ;;  %s45_s13 = int_to_ptr.vmem [resolvable:$true] %s44_s13 }
  0x1a   :  { %s7719_s14 = scalar_lea.vmem %s45_s13, 64  ;;  %p7724_p11 = scmp.lt.s32.totalorder %s45_s13, %s45_s13 }
  0x1b   :  { %p7720_p10 = scmp.ne.s32.totalorder %s45_s13, %s7719_s14  ;;  %p7725_p12 = scmp.lt.s32.totalorder %s7719_s14, %s7719_s14 }
  0x1d   :  { %p7726_p13 = por %p7725_p12, %p7724_p11 }
  0x1f   :  { %p7727_p0 = pnand %p7726_p13, %p7720_p10 }
  0x21   :  { %7730 = shalt.err (!%p7727_p0)
}
  0x22   :  { %47 = dma.hbm_to_vmem [thread:$0]  %s9131_s5, 64, %s45_s13, [#allocation9]  }
  0x23   :  { %7771 = dma.done.wait [#allocation7], 128  }
  0x24   :  { %7772 = vsyncadd [#allocation7], 4294967168 }
  0x25   :  { %7773 = dma.done.wait [#allocation9], 128  }
  0x26   :  { %7774 = vsyncadd [#allocation9], 4294967168  ;;  %s7782_s16 = smov [#allocation2]   ;;  %s7783_s17 = smov [#allocation3]  }
  0x27   :  { %s73_s3 = sshll.u32 %s7782_s16, 4  ;;  %s85_s18 = sshll.u32 %s7783_s17, 4  ;;  %s74_s3 = int_to_ptr.vmem [resolvable:$true] %s73_s3  ;;  %s86_s18 = int_to_ptr.vmem [resolvable:$true] %s85_s18 }
  0x28   :  { %s7739_s19 = scalar_lea.vmem %s74_s3, 50176  ;;  %p7744_p2 = scmp.lt.s32.totalorder %s74_s3, %s74_s3 }
  0x29   :  { %p7740_p1 = scmp.ne.s32.totalorder %s74_s3, %s7739_s19  ;;  %p7745_p3 = scmp.lt.s32.totalorder %s7739_s19, %s7739_s19 }
  0x2b   :  { %p7746_p4 = por %p7745_p3, %p7744_p2 }
  0x2d   :  { %p7747_p5 = pnand %p7746_p4, %p7740_p1 }
  0x2f   :  { %7750 = shalt.err (!%p7747_p5)  }
  0x30   :  { %76 = dma.hbm_to_vmem [thread:$0]  %s9127_s1, 50176, %s74_s3, [#allocation4] }
  0x31   :  { %s7759_s5 = scalar_lea.vmem %s86_s18, 32768  ;;  %p7764_p7 = scmp.lt.s32.totalorder %s86_s18, %s86_s18 }
  0x32   :  { %p7760_p6 = scmp.ne.s32.totalorder %s86_s18, %s7759_s5  ;;  %p7765_p8 = scmp.lt.s32.totalorder %s7759_s5, %s7759_s5 }
  0x34   :  { %p7766_p9 = por %p7765_p8, %p7764_p7 }
  0x36   :  { %p7767_p10 = pnand %p7766_p9, %p7760_p6 }
  0x38   :  { %7770 = shalt.err (!%p7767_p10)  }
  0x39   :  { %88 = dma.hbm_to_vmem [thread:$0]  %s9128_s2, 32768, %s86_s18, [#allocation4 + $0x1]  ;;  %v7843_v1 = vld [vmem:[#allocation10] sm:$0xf]  ;;  %v7845_v2 = vld [vmem:[#allocation5] ss:$0 sm:$0xff] }
  0x3a   :  { %9185 = vst [vmem:[#allocation21_spill] sm:$0xff] %v7843_v1  ;;  %9186 = vst [vmem:[#allocation22_spill] sm:$0xff] %v7845_v2  ;;  %v7850_v3 = vld [vmem:[%s9126_s0] sm:$0xff]  ;;  %v7855_v4 = vld [vmem:[%s9126_s0 + $0x8] sm:$0xff] }
  0x3b   :  { %v7860_v5 = vld [vmem:[%s9126_s0 + $0x10] sm:$0xff]  ;;  %v7865_v6 = vld [vmem:[%s9126_s0 + $0x18] sm:$0xf]  ;;  %v7870_v7 = vld [vmem:[%s9126_s0 + $0x1c] sm:$0xff] }
  0x3c   :  { %v7875_v8 = vld [vmem:[%s9126_s0 + $0x24] sm:$0xff]  ;;  %v7880_v9 = vld [vmem:[%s9126_s0 + $0x2c] sm:$0xff]  ;;  %v7885_v10 = vld [vmem:[%s9126_s0 + $0x34] sm:$0xf] }
  0x3d   :  { %v7890_v11 = vld [vmem:[%s9126_s0 + $0x38] sm:$0xff]  ;;  %v7895_v12 = vld [vmem:[%s9126_s0 + $0x40] sm:$0xff]  ;;  %v7900_v13 = vld [vmem:[%s9126_s0 + $0x48] sm:$0xff] }
  0x3e   :  { %v7905_v14 = vld [vmem:[%s9126_s0 + $0x50] sm:$0xf]  ;;  %v7910_v15 = vld [vmem:[%s9126_s0 + $0x54] sm:$0xff]  ;;  %v7915_v16 = vld [vmem:[%s9126_s0 + $0x5c] sm:$0xff] }
  0x3f   :  { %v7920_v17 = vld [vmem:[%s9126_s0 + $0x64] sm:$0xff]  ;;  %v7925_v18 = vld [vmem:[%s9126_s0 + $0x6c] sm:$0xf]  ;;  %v7930_v19 = vld [vmem:[%s9126_s0 + $0x70] sm:$0xff] }
  0x40   :  { %v7935_v20 = vld [vmem:[%s9126_s0 + $0x78] sm:$0xff]  ;;  %v7940_v21 = vld [vmem:[%s9126_s0 + $0x80] sm:$0xff]  ;;  %v7945_v22 = vld [vmem:[%s9126_s0 + $0x88] sm:$0xf] }
  0x41   :  { %v7950_v23 = vld [vmem:[%s9126_s0 + $0x8c] sm:$0xff]  ;;  %v7955_v24 = vld [vmem:[%s9126_s0 + $0x94] sm:$0xff]  ;;  %v7960_v25 = vld [vmem:[%s9126_s0 + $0x9c] sm:$0xff] }
  0x42   :  { %v7965_v26 = vld [vmem:[%s9126_s0 + $0xa4] sm:$0xf]  ;;  %v7970_v27 = vld [vmem:[%s9126_s0 + $0xa8] sm:$0xff]  ;;  %v7975_v28 = vld [vmem:[%s9126_s0 + $0xb0] sm:$0xff] }
  0x43   :  { %v7980_v29 = vld [vmem:[%s9126_s0 + $0xb8] sm:$0xff]  ;;  %v7985_v30 = vld [vmem:[%s9126_s0 + $0xc0] sm:$0xf]  ;;  %v7990_v31 = vld [vmem:[%s9126_s0 + $0xc4] sm:$0xff] }
  0x44   :  { %v7995_v32 = vld [vmem:[%s9126_s0 + $0xcc] sm:$0xff]  ;;  %v8000_v33 = vld [vmem:[%s9126_s0 + $0xd4] sm:$0xff]  ;;  %v8005_v34 = vld [vmem:[%s9126_s0 + $0xdc] sm:$0xf] }
  0x45   :  { %7775 = dma.done.wait [#allocation4], 50176 }
  0x46   :  { %7776 = vsyncadd [#allocation4], 4294917120  ;;  %v8009_v35 = vcombine.high %v7850_v3, %v7870_v7  ;;  %v8013_v36 = vcombine.high %v7855_v4, %v7875_v8  ;;  %v184_v37 = vld [vmem:[#allocation2 + $0x1c0] sm:$0xff]  ;;  %vm2662_vm0 = vcmask 130048   ;;  %v214_v2 = vld [vmem:[#allocation2 + $0x2b0] sm:$0xff] }
  0x47   :  { %v188_v38 = vld [vmem:[#allocation2 + $0x1e0] sm:$0xff] }
  0x48   :  { %9187 = vst [vmem:[#allocation23_spill] sm:$0xff] %v8013_v36  ;;  %2707 = vmatprep.mubr.bf16.mxu0 %v8009_v35  ;;  %2780 = vmatprep.mubr.bf16.mxu1 %v8013_v36  ;;  %v312_v39 = vld [vmem:[#allocation2 + $0x5c0] sm:$0xff]  ;;  %v6629_v40 = vcombine.high %v184_v37, %v188_v38  ;;  %v6628_v42 = vcombine.low %v184_v37, %v188_v38 }
  0x49   :  { %v316_v41 = vld [vmem:[#allocation2 + $0x5e0] sm:$0xff] }
  0x4a   :  { %v176_v43 = vld [vmem:[#allocation2 + $0x180] sm:$0xff]  ;;  %v6757_v45 = vcombine.high %v312_v39, %v316_v41  ;;  %v6756_v46 = vcombine.low %v312_v39, %v316_v41  ;;  %2675 = vmatprep.subr.bf16.mxu0 %v6629_v40 }
  0x4b   :  { %v180_v44 = vld [vmem:[#allocation2 + $0x1a0] sm:$0xff]  ;;  %2676 = vmatpush1.bf16.msra.mxu0 %v6628_v42 }
  0x4c   :  { %v6621_v47 = vcombine.high %v176_v43, %v180_v44  ;;  %v304_v48 = vld [vmem:[#allocation2 + $0x580] sm:$0xff]  ;;  %2748 = vmatprep.subr.bf16.mxu1 %v6757_v45  ;;  %v6620_v55 = vcombine.low %v176_v43, %v180_v44 }
  0x4d   :  { %v308_v49 = vld [vmem:[#allocation2 + $0x5a0] sm:$0xff]  ;;  %2749 = vmatpush1.bf16.msra.mxu1 %v6756_v46 }
  0x4e   :  { %v168_v50 = vld [vmem:[#allocation2 + $0x140] sm:$0xff]  ;;  %v6749_v51 = vcombine.high %v304_v48, %v308_v49  ;;  %2677 = vmatprep.subr.bf16.mxu0 %v6621_v47  ;;  %v6748_v56 = vcombine.low %v304_v48, %v308_v49 }
  0x4f   :  { %v172_v52 = vld [vmem:[#allocation2 + $0x160] sm:$0xff]  ;;  %2678 = vmatpush1.bf16.msra.mxu0 %v6620_v55 }
  0x50   :  { %v296_v53 = vld [vmem:[#allocation2 + $0x540] sm:$0xff]  ;;  %v6613_v57 = vcombine.high %v168_v50, %v172_v52  ;;  %2750 = vmatprep.subr.bf16.mxu1 %v6749_v51  ;;  %v6612_v63 = vcombine.low %v168_v50, %v172_v52 }
  0x51   :  { %v300_v54 = vld [vmem:[#allocation2 + $0x560] sm:$0xff]  ;;  %2751 = vmatpush1.bf16.msra.mxu1 %v6748_v56 }
  0x52   :  { %v6741_v58 = vcombine.high %v296_v53, %v300_v54  ;;  %v160_v59 = vld [vmem:[#allocation2 + $0x100] sm:$0xff]  ;;  %2679 = vmatprep.subr.bf16.mxu0 %v6613_v57  ;;  %v6740_v0 = vcombine.low %v296_v53, %v300_v54 }
  0x53   :  { %v164_v60 = vld [vmem:[#allocation2 + $0x120] sm:$0xff]  ;;  %2680 = vmatpush1.bf16.msra.mxu0 %v6612_v63 }
  0x54   :  { %v288_v61 = vld [vmem:[#allocation2 + $0x500] sm:$0xff]  ;;  %v6605_v37 = vcombine.high %v160_v59, %v164_v60  ;;  %2752 = vmatprep.subr.bf16.mxu1 %v6741_v58  ;;  %v6604_v43 = vcombine.low %v160_v59, %v164_v60 }
  0x55   :  { %v292_v62 = vld [vmem:[#allocation2 + $0x520] sm:$0xff]  ;;  %2753 = vmatpush1.bf16.msra.mxu1 %v6740_v0 }
  0x56   :  { %v6733_v38 = vcombine.high %v288_v61, %v292_v62  ;;  %v152_v39 = vld [vmem:[#allocation2 + $0xc0] sm:$0xff]  ;;  %2681 = vmatprep.subr.bf16.mxu0 %v6605_v37  ;;  %v6732_v44 = vcombine.low %v288_v61, %v292_v62 }
  0x57   :  { %v156_v40 = vld [vmem:[#allocation2 + $0xe0] sm:$0xff]  ;;  %2682 = vmatpush1.bf16.msra.mxu0 %v6604_v43 }
  0x58   :  { %v280_v41 = vld [vmem:[#allocation2 + $0x4c0] sm:$0xff]  ;;  %v6597_v45 = vcombine.high %v152_v39, %v156_v40  ;;  %2754 = vmatprep.subr.bf16.mxu1 %v6733_v38  ;;  %v6596_v51 = vcombine.low %v152_v39, %v156_v40 }
  0x59   :  { %v284_v42 = vld [vmem:[#allocation2 + $0x4e0] sm:$0xff]  ;;  %2755 = vmatpush1.bf16.msra.mxu1 %v6732_v44 }
  0x5a   :  { %v6725_v46 = vcombine.high %v280_v41, %v284_v42  ;;  %v144_v47 = vld [vmem:[#allocation2 + $0x80] sm:$0xff]  ;;  %2683 = vmatprep.subr.bf16.mxu0 %v6597_v45  ;;  %v6724_v52 = vcombine.low %v280_v41, %v284_v42 }
  0x5b   :  { %v148_v48 = vld [vmem:[#allocation2 + $0xa0] sm:$0xff]  ;;  %2684 = vmatpush1.bf16.msra.mxu0 %v6596_v51 }
  0x5c   :  { %v272_v49 = vld [vmem:[#allocation2 + $0x480] sm:$0xff]  ;;  %v6589_v53 = vcombine.high %v144_v47, %v148_v48  ;;  %2756 = vmatprep.subr.bf16.mxu1 %v6725_v46  ;;  %v6588_v59 = vcombine.low %v144_v47, %v148_v48 }
  0x5d   :  { %v276_v50 = vld [vmem:[#allocation2 + $0x4a0] sm:$0xff]  ;;  %2757 = vmatpush1.bf16.msra.mxu1 %v6724_v52 }
  0x5e   :  { %v6717_v54 = vcombine.high %v272_v49, %v276_v50  ;;  %v136_v55 = vld [vmem:[#allocation2 + $0x40] sm:$0xff]  ;;  %2685 = vmatprep.subr.bf16.mxu0 %v6589_v53  ;;  %v6716_v60 = vcombine.low %v272_v49, %v276_v50 }
  0x5f   :  { %v140_v56 = vld [vmem:[#allocation2 + $0x60] sm:$0xff]  ;;  %2686 = vmatpush1.bf16.msra.mxu0 %v6588_v59 }
  0x60   :  { %v264_v57 = vld [vmem:[#allocation2 + $0x440] sm:$0xff]  ;;  %v6581_v61 = vcombine.high %v136_v55, %v140_v56  ;;  %2758 = vmatprep.subr.bf16.mxu1 %v6717_v54  ;;  %v6580_v39 = vcombine.low %v136_v55, %v140_v56 }
  0x61   :  { %v268_v58 = vld [vmem:[#allocation2 + $0x460] sm:$0xff]  ;;  %2759 = vmatpush1.bf16.msra.mxu1 %v6716_v60 }
  0x62   :  { %v6709_v62 = vcombine.high %v264_v57, %v268_v58  ;;  %v128_v63 = vld [vmem:[#allocation2] sm:$0xff]  ;;  %2687 = vmatprep.subr.bf16.mxu0 %v6581_v61  ;;  %v6708_v40 = vcombine.low %v264_v57, %v268_v58 }
  0x63   :  { %v132_v0 = vld [vmem:[#allocation2 + $0x20] sm:$0xff]  ;;  %2688 = vmatpush1.bf16.msra.mxu0 %v6580_v39 }
  0x64   :  { %v256_v37 = vld [vmem:[#allocation2 + $0x400] sm:$0xff]  ;;  %v6573_v41 = vcombine.high %v128_v63, %v132_v0  ;;  %2760 = vmatprep.subr.bf16.mxu1 %v6709_v62  ;;  %v6572_v47 = vcombine.low %v128_v63, %v132_v0 }
  0x65   :  { %v260_v38 = vld [vmem:[#allocation2 + $0x420] sm:$0xff]  ;;  %2761 = vmatpush1.bf16.msra.mxu1 %v6708_v40 }
  0x66   :  { %v6701_v42 = vcombine.high %v256_v37, %v260_v38  ;;  %v248_v43 = vld [vmem:[#allocation2 + $0x3c0] sm:$0xff]  ;;  %2689 = vmatprep.subr.bf16.mxu0 %v6573_v41  ;;  %v6700_v48 = vcombine.low %v256_v37, %v260_v38 }
  0x67   :  { %v252_v44 = vld [vmem:[#allocation2 + $0x3e0] sm:$0xff]  ;;  %2690 = vmatpush1.bf16.msra.mxu0 %v6572_v47 }
  0x68   :  { %v376_v45 = vld [vmem:[#allocation2 + $0x7c0] sm:$0xff]  ;;  %v6693_v49 = vcombine.high %v248_v43, %v252_v44  ;;  %2762 = vmatprep.subr.bf16.mxu1 %v6701_v42  ;;  %v6692_v55 = vcombine.low %v248_v43, %v252_v44 }
  0x69   :  { %v380_v46 = vld [vmem:[#allocation2 + $0x7e0] sm:$0xff]  ;;  %2763 = vmatpush1.bf16.msra.mxu1 %v6700_v48 }
  0x6a   :  { %v6821_v50 = vcombine.high %v376_v45, %v380_v46  ;;  %v240_v51 = vld [vmem:[#allocation2 + $0x380] sm:$0xff]  ;;  %2691 = vmatprep.subr.bf16.mxu0 %v6693_v49  ;;  %v6820_v56 = vcombine.low %v376_v45, %v380_v46 }
  0x6b   :  { %v244_v52 = vld [vmem:[#allocation2 + $0x3a0] sm:$0xff]  ;;  %2692 = vmatpush2.bf16.msra.mxu0 %v6692_v55 }
  0x6c   :  { %v368_v53 = vld [vmem:[#allocation2 + $0x780] sm:$0xff]  ;;  %v6685_v57 = vcombine.high %v240_v51, %v244_v52  ;;  %2764 = vmatprep.subr.bf16.mxu1 %v6821_v50  ;;  %v6684_v63 = vcombine.low %v240_v51, %v244_v52 }
  0x6d   :  { %v372_v54 = vld [vmem:[#allocation2 + $0x7a0] sm:$0xff]  ;;  %2765 = vmatpush2.bf16.msra.mxu1 %v6820_v56 }
  0x6e   :  { %v6813_v58 = vcombine.high %v368_v53, %v372_v54  ;;  %v232_v59 = vld [vmem:[#allocation2 + $0x340] sm:$0xff]  ;;  %2693 = vmatprep.subr.bf16.mxu0 %v6685_v57  ;;  %v6812_v0 = vcombine.low %v368_v53, %v372_v54 }
  0x6f   :  { %v236_v60 = vld [vmem:[#allocation2 + $0x360] sm:$0xff]  ;;  %2694 = vmatpush2.bf16.msra.mxu0 %v6684_v63 }
  0x70   :  { %v360_v61 = vld [vmem:[#allocation2 + $0x740] sm:$0xff]  ;;  %v6677_v37 = vcombine.high %v232_v59, %v236_v60  ;;  %2766 = vmatprep.subr.bf16.mxu1 %v6813_v58  ;;  %v6676_v43 = vcombine.low %v232_v59, %v236_v60 }
  0x71   :  { %v364_v62 = vld [vmem:[#allocation2 + $0x760] sm:$0xff]  ;;  %2767 = vmatpush2.bf16.msra.mxu1 %v6812_v0 }
  0x72   :  { %v6805_v38 = vcombine.high %v360_v61, %v364_v62  ;;  %v224_v39 = vld [vmem:[#allocation2 + $0x300] sm:$0xff]  ;;  %2695 = vmatprep.subr.bf16.mxu0 %v6677_v37  ;;  %v6804_v44 = vcombine.low %v360_v61, %v364_v62 }
  0x73   :  { %v228_v40 = vld [vmem:[#allocation2 + $0x320] sm:$0xff]  ;;  %2696 = vmatpush2.bf16.msra.mxu0 %v6676_v43 }
  0x74   :  { %v352_v41 = vld [vmem:[#allocation2 + $0x700] sm:$0xff]  ;;  %v6669_v45 = vcombine.high %v224_v39, %v228_v40  ;;  %2768 = vmatprep.subr.bf16.mxu1 %v6805_v38  ;;  %v6668_v51 = vcombine.low %v224_v39, %v228_v40 }
  0x75   :  { %v356_v42 = vld [vmem:[#allocation2 + $0x720] sm:$0xff]  ;;  %2769 = vmatpush2.bf16.msra.mxu1 %v6804_v44 }
  0x76   :  { %v6797_v46 = vcombine.high %v352_v41, %v356_v42  ;;  %v216_v47 = vld [vmem:[#allocation2 + $0x2c0] sm:$0xff]  ;;  %2697 = vmatprep.subr.bf16.mxu0 %v6669_v45  ;;  %v6796_v52 = vcombine.low %v352_v41, %v356_v42 }
  0x77   :  { %v220_v48 = vld [vmem:[#allocation2 + $0x2e0] sm:$0xff]  ;;  %2698 = vmatpush2.bf16.msra.mxu0 %v6668_v51 }
  0x78   :  { %v344_v49 = vld [vmem:[#allocation2 + $0x6c0] sm:$0xff]  ;;  %v6661_v53 = vcombine.high %v216_v47, %v220_v48  ;;  %2770 = vmatprep.subr.bf16.mxu1 %v6797_v46  ;;  %v6660_v59 = vcombine.low %v216_v47, %v220_v48 }
  0x79   :  { %v348_v50 = vld [vmem:[#allocation2 + $0x6e0] sm:$0xff]  ;;  %2771 = vmatpush2.bf16.msra.mxu1 %v6796_v52 }
  0x7a   :  { %v6789_v54 = vcombine.high %v344_v49, %v348_v50  ;;  %v208_v55 = vld [vmem:[#allocation2 + $0x280] sm:$0xff]  ;;  %2699 = vmatprep.subr.bf16.mxu0 %v6661_v53  ;;  %v6788_v60 = vcombine.low %v344_v49, %v348_v50 }
  0x7b   :  { %v212_v56 = vld [vmem:[#allocation2 + $0x2a0] sm:$0xff]  ;;  %2700 = vmatpush2.bf16.msra.mxu0 %v6660_v59 }
  0x7c   :  { %v336_v57 = vld [vmem:[#allocation2 + $0x680] sm:$0xff]  ;;  %v6653_v61 = vcombine.high %v208_v55, %v212_v56  ;;  %2772 = vmatprep.subr.bf16.mxu1 %v6789_v54  ;;  %v6652_v39 = vcombine.low %v208_v55, %v212_v56 }
  0x7d   :  { %v340_v58 = vld [vmem:[#allocation2 + $0x6a0] sm:$0xff]  ;;  %2773 = vmatpush2.bf16.msra.mxu1 %v6788_v60 }
  0x7e   :  { %v6781_v62 = vcombine.high %v336_v57, %v340_v58  ;;  %v200_v63 = vld [vmem:[#allocation2 + $0x240] sm:$0xff]  ;;  %2701 = vmatprep.subr.bf16.mxu0 %v6653_v61  ;;  %v6780_v40 = vcombine.low %v336_v57, %v340_v58  ;;  %v8019_v61 = vcombine.low %v7850_v3, %v7870_v7  ;;  %v8035_v3 = vcombine.high %v7895_v12, %v7915_v16 }
  0x7f   :  { %v204_v0 = vld [vmem:[#allocation2 + $0x260] sm:$0xff]  ;;  %2702 = vmatpush2.bf16.msra.mxu0 %v6652_v39 }
  0x80   :  { %v328_v37 = vld [vmem:[#allocation2 + $0x640] sm:$0xff]  ;;  %v6645_v41 = vcombine.high %v200_v63, %v204_v0  ;;  %2774 = vmatprep.subr.bf16.mxu1 %v6781_v62  ;;  %v6644_v47 = vcombine.low %v200_v63, %v204_v0  ;;  %v8023_v62 = vcombine.low %v7855_v4, %v7875_v8  ;;  %v8025_v0 = vld [vmem:[#allocation2 + $0x1c8] sm:$0xff]  ;;  %9189 = vst [vmem:[#allocation25_spill] sm:$0xff] %v8035_v3 }
  0x81   :  { %v332_v38 = vld [vmem:[#allocation2 + $0x660] sm:$0xff]  ;;  %2775 = vmatpush2.bf16.msra.mxu1 %v6780_v40  ;;  %v8031_v40 = vcombine.high %v7890_v11, %v7910_v15 }
  0x82   :  { %v6773_v42 = vcombine.high %v328_v37, %v332_v38  ;;  %v192_v43 = vld [vmem:[#allocation2 + $0x200] sm:$0xff]  ;;  %2703 = vmatprep.subr.bf16.mxu0 %v6645_v41  ;;  %v6772_v48 = vcombine.low %v328_v37, %v332_v38  ;;  %9188 = vst [vmem:[#allocation24_spill] sm:$0xff] %v8023_v62  ;;  %v8027_v37 = vld [vmem:[#allocation2 + $0x1e8] sm:$0xff] }
  0x83   :  { %v196_v44 = vld [vmem:[#allocation2 + $0x220] sm:$0xff]  ;;  %2704 = vmatpush2.bf16.msra.mxu0 %v6644_v47  ;;  %v6631_v8 = vcombine.high %v8025_v0, %v8027_v37 }
  0x84   :  { %v320_v45 = vld [vmem:[#allocation2 + $0x600] sm:$0xff]  ;;  %v6637_v49 = vcombine.high %v192_v43, %v196_v44  ;;  %2776 = vmatprep.subr.bf16.mxu1 %v6773_v42  ;;  %v6636_v55 = vcombine.low %v192_v43, %v196_v44 }
  0x85   :  { %v324_v46 = vld [vmem:[#allocation2 + $0x620] sm:$0xff]  ;;  %2777 = vmatpush2.bf16.msra.mxu1 %v6772_v48 }
  0x86   :  { %v6765_v50 = vcombine.high %v320_v45, %v324_v46  ;;  %v440_v51 = vld [vmem:[#allocation2 + $0x9c0] sm:$0xff]  ;;  %2705 = vmatprep.subr.bf16.mxu0 %v6637_v49  ;;  %v6764_v56 = vcombine.low %v320_v45, %v324_v46  ;;  %v8045_v45 = vcombine.low %v7890_v11, %v7910_v15  ;;  %v8049_v46 = vcombine.low %v7895_v12, %v7915_v16 }
  0x87   :  { %v444_v52 = vld [vmem:[#allocation2 + $0x9e0] sm:$0xff]  ;;  %2706 = vmatpush2.bf16.msra.mxu0 %v6636_v55  ;;  %v8053_v49 = vcombine.high %v7930_v19, %v7950_v23 }
  0x88   :  { %v512_v53 = vld [vmem:[#allocation2 + $0xc00] sm:$0xff]  ;;  %v6885_v57 = vcombine.high %v440_v51, %v444_v52  ;;  %2778 = vmatprep.subr.bf16.mxu1 %v6765_v50  ;;  %v6884_v63 = vcombine.low %v440_v51, %v444_v52  ;;  %9190 = vst [vmem:[#allocation26_spill] sm:$0xff] %v8049_v46  ;;  %v8057_v50 = vcombine.high %v7935_v20, %v7955_v24 }
  0x89   :  { %v516_v54 = vld [vmem:[#allocation2 + $0xc20] sm:$0xff]  ;;  %2779 = vmatpush2.bf16.msra.mxu1 %v6764_v56 }
  0x8a   :  { %v6957_v58 = vcombine.high %v512_v53, %v516_v54  ;;  %v432_v59 = vld [vmem:[#allocation2 + $0x980] sm:$0xff]  ;;  %2821 = vmatprep.subr.bf16.mxu0 %v6885_v57  ;;  %v6956_v38 = vcombine.low %v512_v53, %v516_v54  ;;  %2708 = vmatmul.mubr.bf16.vlgmr.msra.gmra.mxu0 %v8019_v61  ;;  %9191 = vst [vmem:[#allocation27_spill] sm:$0xff] %v8057_v50 }
  0x8b   :  { %v436_v60 = vld [vmem:[#allocation2 + $0x9a0] sm:$0xff]  ;;  %2822 = vmatpush1.bf16.msra.mxu0 %v6884_v63  ;;  %2717 = vmatprep.mubr.bf16.mxu0 %v8031_v40  ;;  %v8065_v53 = vcombine.low %v7930_v19, %v7950_v23  ;;  %v8069_v54 = vcombine.low %v7935_v20, %v7955_v24  ;;  %v8073_v57 = vcombine.high %v7970_v27, %v7990_v31 }
  0x8c   :  { %v6877_v39 = vcombine.high %v432_v59, %v436_v60  ;;  %2908 = vmatprep.subr.bf16.mxu1 %v6957_v58  ;;  %v424_v4 = vld [vmem:[#allocation2 + $0x940] sm:$0xff]  ;;  %2781 = vmatmul.mubr.bf16.vlgmr.msra.gmra.mxu1 %v8023_v62  ;;  %v6876_v41 = vcombine.low %v432_v59, %v436_v60  ;;  %v8077_v58 = vcombine.high %v7975_v28, %v7995_v32 }
  0x8d   :  { %v428_v7 = vld [vmem:[#allocation2 + $0x960] sm:$0xff]  ;;  %2909 = vmatpush1.bf16.msra.mxu1 %v6956_v38  ;;  %2790 = vmatprep.mubr.bf16.mxu1 %v8035_v3  ;;  %9192 = vst [vmem:[#allocation28_spill] sm:$0xff] %v8069_v54  ;;  %v8085_v63 = vcombine.low %v7970_v27, %v7990_v31  ;;  %v8089_v38 = vcombine.low %v7975_v28, %v7995_v32  ;;  %v9134_v31 = vmov 0  }
  0x8e   :  { %2823 = vmatprep.subr.bf16.mxu0 %v6877_v39  ;;  %v6869_v42 = vcombine.high %v424_v4, %v428_v7  ;;  %v416_v43 = vld [vmem:[#allocation2 + $0x900] sm:$0xff]  ;;  %2967 = vmatprep.subr.bf16.mxu1 %v6631_v8  ;;  %v6868_v47 = vcombine.low %v424_v4, %v428_v7  ;;  %9193 = vst [vmem:[#allocation29_spill] sm:$0xff] %v8077_v58 }
  0x8f   :  { %v420_v44 = vld [vmem:[#allocation2 + $0x920] sm:$0xff]  ;;  %2824 = vmatpush1.bf16.msra.mxu0 %v6876_v41  ;;  %9194 = vst [vmem:[#allocation30_spill] sm:$0xff] %v8085_v63  ;;  %9195 = vst [vmem:[#allocation31_spill] sm:$0xff] %v8089_v38  ;;  %v8093_v41 = vcombine.high %v7860_v5, %v7880_v9 }
  0x90   :  { %2825 = vmatprep.subr.bf16.mxu0 %v6869_v42  ;;  %v6861_v48 = vcombine.high %v416_v43, %v420_v44  ;;  %v408_v51 = vld [vmem:[#allocation2 + $0x8c0] sm:$0xff]  ;;  %v6860_v12 = vcombine.low %v416_v43, %v420_v44  ;;  %v177_v43 = vld [vmem:[#allocation2 + $0x188] sm:$0xff] }
  0x91   :  { %v412_v11 = vld [vmem:[#allocation2 + $0x8e0] sm:$0xff]  ;;  %9196 = vst [vmem:[#allocation32_spill] sm:$0xff] %v8093_v41  ;;  %v181_v44 = vld [vmem:[#allocation2 + $0x1a8] sm:$0xff] }
  0x92   :  { %2718 = vmatmul.mubr.bf16.gmra.mxu0 %v8045_v45  ;;  %v6853_v15 = vcombine.high %v408_v51, %v412_v11  ;;  %v400_v16 = vld [vmem:[#allocation2 + $0x880] sm:$0xff]  ;;  %v6852_v55 = vcombine.low %v408_v51, %v412_v11  ;;  %v6630_v51 = vcombine.low %v8025_v0, %v8027_v37 }
  0x93   :  { %2826 = vmatpush1.bf16.msra.mxu0 %v6868_v47  ;;  %2727 = vmatprep.mubr.bf16.mxu0 %v8053_v49  ;;  %v404_v52 = vld [vmem:[#allocation2 + $0x8a0] sm:$0xff] }
  0x94   :  { %2791 = vmatmul.mubr.bf16.gmra.mxu1 %v8049_v46  ;;  %2827 = vmatprep.subr.bf16.mxu0 %v6861_v48  ;;  %v6845_v56 = vcombine.high %v400_v16, %v404_v52  ;;  %v392_v59 = vld [vmem:[#allocation2 + $0x840] sm:$0xff]  ;;  %v6844_v19 = vcombine.low %v400_v16, %v404_v52  ;;  %v8101_v48 = vcombine.low %v7865_v6, %v7885_v10  ;;  %v169_v52 = vld [vmem:[#allocation2 + $0x148] sm:$0xff] }
  0x95   :  { %2800 = vmatprep.mubr.bf16.mxu1 %v8057_v50  ;;  %v396_v60 = vld [vmem:[#allocation2 + $0x860] sm:$0xff] }
  0x96   :  { %v6837_v20 = vcombine.high %v392_v59, %v396_v60  ;;  %v384_v23 = vld [vmem:[#allocation2 + $0x800] sm:$0xff]  ;;  %v6836_v39 = vcombine.low %v392_v59, %v396_v60  ;;  %9197 = vst [vmem:[#allocation33_spill] sm:$0xff] %v8101_v48  ;;  %v6622_v59 = vcombine.low %v177_v43, %v181_v44  ;;  %v161_v60 = vld [vmem:[#allocation2 + $0x108] sm:$0xff] }
  0x97   :  { %2828 = vmatpush1.bf16.msra.mxu0 %v6860_v12  ;;  %v388_v24 = vld [vmem:[#allocation2 + $0x820] sm:$0xff]  ;;  %v6623_v12 = vcombine.high %v177_v43, %v181_v44 }
  0x98   :  { %2829 = vmatprep.subr.bf16.mxu0 %v6853_v15  ;;  %v6829_v4 = vcombine.high %v384_v23, %v388_v24  ;;  %v504_v7 = vld [vmem:[#allocation2 + $0xbc0] sm:$0xff]  ;;  %v6828_v27 = vcombine.low %v384_v23, %v388_v24  ;;  %v8110_v23 = vcombine.low %v7905_v14, %v7925_v18 }
  0x99   :  { %v508_v8 = vld [vmem:[#allocation2 + $0xbe0] sm:$0xff] }
  0x9a   :  { %2728 = vmatmul.mubr.bf16.gmra.mxu0 %v8065_v53  ;;  %v6949_v28 = vcombine.high %v504_v7, %v508_v8  ;;  %v496_v32 = vld [vmem:[#allocation2 + $0xb80] sm:$0xff]  ;;  %v6948_v47 = vcombine.low %v504_v7, %v508_v8 }
  0x9b   :  { %2830 = vmatpush1.bf16.msra.mxu0 %v6852_v55  ;;  %2737 = vmatprep.mubr.bf16.mxu0 %v8073_v57  ;;  %v500_v42 = vld [vmem:[#allocation2 + $0xba0] sm:$0xff]  ;;  %v173_v55 = vld [vmem:[#allocation2 + $0x168] sm:$0xff] }
  0x9c   :  { %2801 = vmatmul.mubr.bf16.gmra.mxu1 %v8069_v54  ;;  %2831 = vmatprep.subr.bf16.mxu0 %v6845_v56  ;;  %v6941_v11 = vcombine.high %v496_v32, %v500_v42  ;;  %v488_v15 = vld [vmem:[#allocation2 + $0xb40] sm:$0xff]  ;;  %v6940_v56 = vcombine.low %v496_v32, %v500_v42  ;;  %v6615_v10 = vcombine.high %v169_v52, %v173_v55 }
  0x9d   :  { %2810 = vmatprep.mubr.bf16.mxu1 %v8077_v58  ;;  %v492_v16 = vld [vmem:[#allocation2 + $0xb60] sm:$0xff]  ;;  %v6614_v24 = vcombine.low %v169_v52, %v173_v55 }
  0x9e   :  { %v6933_v6 = vcombine.high %v488_v15, %v492_v16  ;;  %v480_v0 = vld [vmem:[#allocation2 + $0xb00] sm:$0xff] }
  0x9f   :  { %2832 = vmatpush1.bf16.msra.mxu0 %v6844_v19  ;;  %v484_v37 = vld [vmem:[#allocation2 + $0xb20] sm:$0xff]  ;;  %v165_v19 = vld [vmem:[#allocation2 + $0x128] sm:$0xff] }
  0xa0   :  { %2833 = vmatprep.subr.bf16.mxu0 %v6837_v20  ;;  %v6932_v20 = vcombine.low %v488_v15, %v492_v16  ;;  %v472_v7 = vld [vmem:[#allocation2 + $0xac0] sm:$0xff]  ;;  %v6924_v32 = vcombine.low %v480_v0, %v484_v37  ;;  %v6606_v42 = vcombine.low %v161_v60, %v165_v19 }
  0xa1   :  { %v476_v8 = vld [vmem:[#allocation2 + $0xae0] sm:$0xff] }
  0xa2   :  { %2738 = vmatmul.mubr.bf16.gmra.mxu0 %v8085_v63  ;;  %v6917_v14 = vcombine.high %v472_v7, %v476_v8  ;;  %v464_v43 = vld [vmem:[#allocation2 + $0xa80] sm:$0xff] }
  0xa3   :  { %2834 = vmatpush1.bf16.msra.mxu0 %v6836_v39  ;;  %2853 = vmatprep.mubr.bf16.mxu0 %v8093_v41  ;;  %v6925_v39 = vcombine.high %v480_v0, %v484_v37  ;;  %v468_v44 = vld [vmem:[#allocation2 + $0xaa0] sm:$0xff] }
  0xa4   :  { %2811 = vmatmul.mubr.bf16.gmra.mxu1 %v8089_v38  ;;  %2835 = vmatprep.subr.bf16.mxu0 %v6829_v4  ;;  %v6607_v4 = vcombine.high %v161_v60, %v165_v19  ;;  %v6909_v16 = vcombine.high %v464_v43, %v468_v44  ;;  %v456_v55 = vld [vmem:[#allocation2 + $0xa40] sm:$0xff]  ;;  %v129_v19 = vld [vmem:[#allocation2 + $0x8] sm:$0xff] }
  0xa5   :  { %2926 = vmatprep.mubr.bf16.mxu1 %v9134_v31  ;;  %v448_v37 = vld [vmem:[#allocation2 + $0xa00] sm:$0xff] }
  0xa6   :  { %v452_v60 = vld [vmem:[#allocation2 + $0xa20] sm:$0xff] }
  0xa7   :  { %2836 = vmatpush1.bf16.msra.mxu0 %v6828_v27  ;;  %v153_v27 = vld [vmem:[#allocation2 + $0xc8] sm:$0xff] }
  0xa8   :  { %2837 = vmatprep.subr.bf16.mxu0 %v6949_v28  ;;  %v157_v28 = vld [vmem:[#allocation2 + $0xe8] sm:$0xff] }
  0xa9   :  { %v6599_v18 = vcombine.high %v153_v27, %v157_v28  ;;  %v6598_v15 = vcombine.low %v153_v27, %v157_v28  ;;  %v313_v27 = vld [vmem:[#allocation2 + $0x5c8] sm:$0xff] }
  0xaa   :  { %v317_v28 = vld [vmem:[#allocation2 + $0x5e8] sm:$0xff] }
  0xab   :  { %2838 = vmatpush2.bf16.msra.mxu0 %v6948_v47  ;;  %v145_v47 = vld [vmem:[#allocation2 + $0x88] sm:$0xff] }
  0xac   :  { %6964 = vmatmul.mubr.msk.bf16.vlgmr.msra.gmra.mxu1 %vm2662_vm0, %v8101_v48  ;;  %2839 = vmatprep.subr.bf16.mxu0 %v6941_v11  ;;  %v6916_v11 = vcombine.low %v472_v7, %v476_v8  ;;  %v6893_v7 = vcombine.high %v448_v37, %v452_v60 }
  0xad   :  { %2968 = vmatpush1.bf16.msra.mxu1 %v6630_v51  ;;  %2936 = vmatprep.mubr.bf16.mxu1 %v9134_v31  ;;  %v149_v51 = vld [vmem:[#allocation2 + $0xa8] sm:$0xff] }
  0xae   :  { %2969 = vmatprep.subr.bf16.mxu1 %v6623_v12  ;;  %v8117_v12 = vcombine.low %v7945_v22, %v7965_v26  ;;  %v6591_v52 = vcombine.high %v145_v47, %v149_v51  ;;  %v6590_v0 = vcombine.low %v145_v47, %v149_v51  ;;  %v8131_v47 = vcombine.low %v7860_v5, %v7880_v9  ;;  %v241_v51 = vld [vmem:[#allocation2 + $0x388] sm:$0xff] }
  0xaf   :  { %2840 = vmatpush2.bf16.msra.mxu0 %v6940_v56  ;;  %v460_v56 = vld [vmem:[#allocation2 + $0xa60] sm:$0xff]  ;;  %v233_v5 = vld [vmem:[#allocation2 + $0x348] sm:$0xff] }
  0xb0   :  { %2841 = vmatprep.subr.bf16.mxu0 %v6933_v6  ;;  %v141_v6 = vld [vmem:[#allocation2 + $0x68] sm:$0xff]  ;;  %v6901_v22 = vcombine.high %v456_v55, %v460_v56  ;;  %9198 = vst [vmem:[#allocation34_spill] sm:$0xff] %v8131_v47 }
  0xb1   :  { %2970 = vmatpush1.bf16.msra.mxu1 %v6622_v59  ;;  %v137_v59 = vld [vmem:[#allocation2 + $0x48] sm:$0xff] }
  0xb2   :  { %2971 = vmatprep.subr.bf16.mxu1 %v6615_v10  ;;  %v6908_v10 = vcombine.low %v464_v43, %v468_v44  ;;  %v6583_v26 = vcombine.high %v137_v59, %v141_v6  ;;  %v305_v43 = vld [vmem:[#allocation2 + $0x588] sm:$0xff] }
  0xb3   :  { %2842 = vmatpush2.bf16.msra.mxu0 %v6932_v20  ;;  %v133_v20 = vld [vmem:[#allocation2 + $0x28] sm:$0xff] }
  0xb4   :  { %6965 = vmatmul.mubr.msk.bf16.gmra.mxu1 %vm2662_vm0, %v8110_v23  ;;  %2843 = vmatprep.subr.bf16.mxu0 %v6925_v39  ;;  %v8124_v39 = vcombine.low %v7985_v30, %v8005_v34  ;;  %v6575_v8 = vcombine.high %v129_v19, %v133_v20  ;;  %v6759_v30 = vcombine.high %v313_v27, %v317_v28  ;;  %v309_v44 = vld [vmem:[#allocation2 + $0x5a8] sm:$0xff] }
  0xb5   :  { %2972 = vmatpush1.bf16.msra.mxu1 %v6614_v24  ;;  %2946 = vmatprep.mubr.bf16.mxu1 %v9134_v31  ;;  %v6900_v24 = vcombine.low %v456_v55, %v460_v56  ;;  %v6751_v55 = vcombine.high %v305_v43, %v309_v44  ;;  %v237_v9 = vld [vmem:[#allocation2 + $0x368] sm:$0xff] }
  0xb6   :  { %2973 = vmatprep.subr.bf16.mxu1 %v6607_v4  ;;  %v6582_v4 = vcombine.low %v137_v59, %v141_v6  ;;  %v297_v59 = vld [vmem:[#allocation2 + $0x548] sm:$0xff] }
  0xb7   :  { %2844 = vmatpush2.bf16.msra.mxu0 %v6924_v32  ;;  %v249_v32 = vld [vmem:[#allocation2 + $0x3c8] sm:$0xff] }
  0xb8   :  { %2845 = vmatprep.subr.bf16.mxu0 %v6917_v14  ;;  %v6892_v14 = vcombine.low %v448_v37, %v452_v60  ;;  %v301_v6 = vld [vmem:[#allocation2 + $0x568] sm:$0xff] }
  0xb9   :  { %2974 = vmatpush1.bf16.msra.mxu1 %v6606_v42  ;;  %v253_v42 = vld [vmem:[#allocation2 + $0x3e8] sm:$0xff] }
  0xba   :  { %2975 = vmatprep.subr.bf16.mxu1 %v6599_v18  ;;  %v6574_v18 = vcombine.low %v129_v19, %v133_v20  ;;  %v6695_v34 = vcombine.high %v249_v32, %v253_v42  ;;  %v289_v37 = vld [vmem:[#allocation2 + $0x508] sm:$0xff]  ;;  %v8141_v19 = vcombine.low %v7900_v13, %v7920_v17 }
  0xbb   :  { %2846 = vmatpush2.bf16.msra.mxu0 %v6916_v11  ;;  %v245_v11 = vld [vmem:[#allocation2 + $0x3a8] sm:$0xff] }
  0xbc   :  { %6966 = vmatmul.mubr.msk.bf16.gmra.mxu1 %vm2662_vm0, %v8117_v12  ;;  %2847 = vmatprep.subr.bf16.mxu0 %v6909_v16  ;;  %v8135_v16 = vcombine.high %v7900_v13, %v7920_v17  ;;  %v6687_v56 = vcombine.high %v241_v51, %v245_v11  ;;  %v293_v60 = vld [vmem:[#allocation2 + $0x528] sm:$0xff]  ;;  %9200 = vst [vmem:[#allocation36_spill] sm:$0xff] %v8141_v19 }
  0xbd   :  { %2976 = vmatpush1.bf16.msra.mxu1 %v6598_v15  ;;  %2956 = vmatprep.mubr.bf16.mxu1 %v9134_v31  ;;  %v6758_v15 = vcombine.low %v313_v27, %v317_v28  ;;  %v225_v20 = vld [vmem:[#allocation2 + $0x308] sm:$0xff]  ;;  %v6735_v27 = vcombine.high %v289_v37, %v293_v60 }
  0xbe   :  { %2977 = vmatprep.subr.bf16.mxu1 %v6591_v52  ;;  %9199 = vst [vmem:[#allocation35_spill] sm:$0xff] %v8135_v16  ;;  %v6694_v52 = vcombine.low %v249_v32, %v253_v42  ;;  %v281_v32 = vld [vmem:[#allocation2 + $0x4c8] sm:$0xff] }
  0xbf   :  { %2848 = vmatpush2.bf16.msra.mxu0 %v6908_v10  ;;  %v6750_v10 = vcombine.low %v305_v43, %v309_v44  ;;  %v285_v42 = vld [vmem:[#allocation2 + $0x4e8] sm:$0xff] }
  0xc0   :  { %2849 = vmatprep.subr.bf16.mxu0 %v6901_v22  ;;  %v6743_v22 = vcombine.high %v297_v59, %v301_v6  ;;  %v217_v13 = vld [vmem:[#allocation2 + $0x2c8] sm:$0xff] }
  0xc1   :  { %2978 = vmatpush1.bf16.msra.mxu1 %v6590_v0  ;;  %v6686_v0 = vcombine.low %v241_v51, %v245_v11  ;;  %v221_v17 = vld [vmem:[#allocation2 + $0x2e8] sm:$0xff]  ;;  %v8151_v51 = vcombine.low %v7940_v21, %v7960_v25 }
  0xc2   :  { %2979 = vmatprep.subr.bf16.mxu1 %v6583_v26  ;;  %v6679_v26 = vcombine.high %v233_v5, %v237_v9  ;;  %v273_v43 = vld [vmem:[#allocation2 + $0x488] sm:$0xff] }
  0xc3   :  { %2850 = vmatpush2.bf16.msra.mxu0 %v6900_v24  ;;  %v229_v24 = vld [vmem:[#allocation2 + $0x328] sm:$0xff]  ;;  %9202 = vst [vmem:[#allocation38_spill] sm:$0xff] %v8151_v51 }
  0xc4   :  { %6967 = vmatmul.mubr.msk.bf16.gmra.mxu1 %vm2662_vm0, %v8124_v39  ;;  %2851 = vmatprep.subr.bf16.mxu0 %v6893_v7  ;;  %v8145_v7 = vcombine.high %v7940_v21, %v7960_v25  ;;  %v6671_v28 = vcombine.high %v225_v20, %v229_v24  ;;  %v277_v44 = vld [vmem:[#allocation2 + $0x4a8] sm:$0xff] }
  0xc5   :  { %2980 = vmatpush1.bf16.msra.mxu1 %v6582_v4  ;;  %2999 = vmatprep.mubr.bf16.mxu1 %v8009_v35  ;;  %v6742_v4 = vcombine.low %v297_v59, %v301_v6  ;;  %v209_v11 = vld [vmem:[#allocation2 + $0x288] sm:$0xff]  ;;  %v6719_v59 = vcombine.high %v273_v43, %v277_v44 }
  0xc6   :  { %2981 = vmatprep.subr.bf16.mxu1 %v6575_v8  ;;  %9201 = vst [vmem:[#allocation37_spill] sm:$0xff] %v8145_v7  ;;  %v6678_v8 = vcombine.low %v233_v5, %v237_v9  ;;  %v265_v5 = vld [vmem:[#allocation2 + $0x448] sm:$0xff] }
  0xc7   :  { %2852 = vmatpush2.bf16.msra.mxu0 %v6892_v14  ;;  %v6734_v14 = vcombine.low %v289_v37, %v293_v60  ;;  %v269_v9 = vld [vmem:[#allocation2 + $0x468] sm:$0xff] }
  0xc8   :  { %3040 = vmatprep.subr.bf16.mxu0 %v6759_v30  ;;  %v6727_v30 = vcombine.high %v281_v32, %v285_v42  ;;  %v201_v21 = vld [vmem:[#allocation2 + $0x248] sm:$0xff] }
  0xc9   :  { %2982 = vmatpush1.bf16.msra.mxu1 %v6574_v18  ;;  %v6670_v18 = vcombine.low %v225_v20, %v229_v24  ;;  %v205_v25 = vld [vmem:[#allocation2 + $0x268] sm:$0xff]  ;;  %v8161_v20 = vcombine.low %v7980_v29, %v8000_v33 }
  0xca   :  { %2983 = vmatprep.subr.bf16.mxu1 %v6695_v34  ;;  %2854 = vmatmul.mubr.bf16.vlgmr.msra.gmra.mxu0 %v8131_v47  ;;  %v6663_v34 = vcombine.high %v217_v13, %v221_v17  ;;  %v257_v37 = vld [vmem:[#allocation2 + $0x408] sm:$0xff] }
  0xcb   :  { %3041 = vmatpush1.bf16.msra.mxu0 %v6758_v15  ;;  %2863 = vmatprep.mubr.bf16.mxu0 %v8135_v16  ;;  %v213_v15 = vld [vmem:[#allocation2 + $0x2a8] sm:$0xff]  ;;  %9204 = vst [vmem:[#allocation40_spill] sm:$0xff] %v8161_v20 }
  0xcc   :  { %3042 = vmatprep.subr.bf16.mxu0 %v6751_v55  ;;  %v8155_v55 = vcombine.high %v7980_v29, %v8000_v33  ;;  %v6655_v6 = vcombine.high %v209_v11, %v213_v15  ;;  %v261_v60 = vld [vmem:[#allocation2 + $0x428] sm:$0xff] }
  0xcd   :  { %2984 = vmatpush2.bf16.msra.mxu1 %v6694_v52  ;;  %v6726_v52 = vcombine.low %v281_v32, %v285_v42  ;;  %v193_v24 = vld [vmem:[#allocation2 + $0x208] sm:$0xff] }
  0xce   :  { %2985 = vmatprep.subr.bf16.mxu1 %v6687_v56  ;;  %9203 = vst [vmem:[#allocation39_spill] sm:$0xff] %v8155_v55  ;;  %v6662_v56 = vcombine.low %v217_v13, %v221_v17  ;;  %v377_v42 = vld [vmem:[#allocation2 + $0x7c8] sm:$0xff] }
  0xcf   :  { %3043 = vmatpush1.bf16.msra.mxu0 %v6750_v10  ;;  %v6718_v10 = vcombine.low %v273_v43, %v277_v44  ;;  %v381_v13 = vld [vmem:[#allocation2 + $0x7e8] sm:$0xff] }
  0xd0   :  { %3044 = vmatprep.subr.bf16.mxu0 %v6743_v22  ;;  %v6711_v22 = vcombine.high %v265_v5, %v269_v9  ;;  %v441_v17 = vld [vmem:[#allocation2 + $0x9c8] sm:$0xff]  ;;  %v6823_v33 = vcombine.high %v377_v42, %v381_v13 }
  0xd1   :  { %2986 = vmatpush2.bf16.msra.mxu1 %v6686_v0  ;;  %v6654_v0 = vcombine.low %v209_v11, %v213_v15  ;;  %v373_v43 = vld [vmem:[#allocation2 + $0x7a8] sm:$0xff]  ;;  %v6822_v15 = vcombine.low %v377_v42, %v381_v13 }
  0xd2   :  { %2987 = vmatprep.subr.bf16.mxu1 %v6679_v26  ;;  %2864 = vmatmul.mubr.bf16.gmra.mxu0 %v8141_v19  ;;  %v6647_v26 = vcombine.high %v201_v21, %v205_v25  ;;  %v433_v44 = vld [vmem:[#allocation2 + $0x988] sm:$0xff] }
  0xd3   :  { %3045 = vmatpush1.bf16.msra.mxu0 %v6742_v4  ;;  %2873 = vmatprep.mubr.bf16.mxu0 %v8145_v7  ;;  %v197_v4 = vld [vmem:[#allocation2 + $0x228] sm:$0xff] }
  0xd4   :  { %3046 = vmatprep.subr.bf16.mxu0 %v6735_v27  ;;  %v6646_v27 = vcombine.low %v201_v21, %v205_v25  ;;  %v6639_v32 = vcombine.high %v193_v24, %v197_v4  ;;  %v6638_v29 = vcombine.low %v193_v24, %v197_v4  ;;  %v437_v11 = vld [vmem:[#allocation2 + $0x9a8] sm:$0xff] }
  0xd5   :  { %2988 = vmatpush2.bf16.msra.mxu1 %v6678_v8  ;;  %v6710_v8 = vcombine.low %v265_v5, %v269_v9  ;;  %v365_v5 = vld [vmem:[#allocation2 + $0x768] sm:$0xff] }
  0xd6   :  { %2989 = vmatprep.subr.bf16.mxu1 %v6671_v28  ;;  %v6703_v28 = vcombine.high %v257_v37, %v261_v60  ;;  %v425_v9 = vld [vmem:[#allocation2 + $0x948] sm:$0xff] }
  0xd7   :  { %3047 = vmatpush1.bf16.msra.mxu0 %v6734_v14  ;;  %v445_v14 = vld [vmem:[#allocation2 + $0x9e8] sm:$0xff] }
  0xd8   :  { %3048 = vmatprep.subr.bf16.mxu0 %v6727_v30  ;;  %v6887_v30 = vcombine.high %v441_v17, %v445_v14  ;;  %v429_v21 = vld [vmem:[#allocation2 + $0x968] sm:$0xff] }
  0xd9   :  { %2990 = vmatpush2.bf16.msra.mxu1 %v6670_v18  ;;  %v6702_v18 = vcombine.low %v257_v37, %v261_v60  ;;  %v357_v37 = vld [vmem:[#allocation2 + $0x728] sm:$0xff] }
  0xda   :  { %2991 = vmatprep.subr.bf16.mxu1 %v6663_v34  ;;  %2874 = vmatmul.mubr.bf16.gmra.mxu0 %v8151_v51  ;;  %v369_v34 = vld [vmem:[#allocation2 + $0x788] sm:$0xff] }
  0xdb   :  { %3049 = vmatpush1.bf16.msra.mxu0 %v6726_v52  ;;  %2883 = vmatprep.mubr.bf16.mxu0 %v8155_v55  ;;  %v6886_v52 = vcombine.low %v441_v17, %v445_v14  ;;  %v6814_v25 = vcombine.low %v369_v34, %v373_v43  ;;  %v417_v60 = vld [vmem:[#allocation2 + $0x908] sm:$0xff] }
  0xdc   :  { %3050 = vmatprep.subr.bf16.mxu0 %v6719_v59  ;;  %v6879_v59 = vcombine.high %v433_v44, %v437_v11  ;;  %v421_v24 = vld [vmem:[#allocation2 + $0x928] sm:$0xff] }
  0xdd   :  { %2992 = vmatpush2.bf16.msra.mxu1 %v6662_v56  ;;  %v6815_v56 = vcombine.high %v369_v34, %v373_v43  ;;  %v349_v42 = vld [vmem:[#allocation2 + $0x6e8] sm:$0xff] }
  0xde   :  { %2993 = vmatprep.subr.bf16.mxu1 %v6655_v6  ;;  %v361_v6 = vld [vmem:[#allocation2 + $0x748] sm:$0xff] }
  0xdf   :  { %3051 = vmatpush1.bf16.msra.mxu0 %v6718_v10  ;;  %v6878_v10 = vcombine.low %v433_v44, %v437_v11  ;;  %v6806_v4 = vcombine.low %v361_v6, %v365_v5  ;;  %v409_v13 = vld [vmem:[#allocation2 + $0x8c8] sm:$0xff] }
  0xe0   :  { %3052 = vmatprep.subr.bf16.mxu0 %v6711_v22  ;;  %v6871_v22 = vcombine.high %v425_v9, %v429_v21  ;;  %v413_v17 = vld [vmem:[#allocation2 + $0x8e8] sm:$0xff] }
  0xe1   :  { %2994 = vmatpush2.bf16.msra.mxu1 %v6654_v0  ;;  %v6807_v0 = vcombine.high %v361_v6, %v365_v5  ;;  %v341_v34 = vld [vmem:[#allocation2 + $0x6a8] sm:$0xff] }
  0xe2   :  { %2995 = vmatprep.subr.bf16.mxu1 %v6647_v26  ;;  %2884 = vmatmul.mubr.bf16.gmra.mxu0 %v8161_v20  ;;  %v353_v26 = vld [vmem:[#allocation2 + $0x708] sm:$0xff] }
  0xe3   :  { %3053 = vmatpush1.bf16.msra.mxu0 %v6710_v8  ;;  %3072 = vmatprep.mubr.bf16.mxu0 %v8013_v36  ;;  %v6870_v8 = vcombine.low %v425_v9, %v429_v21  ;;  %v6798_v14 = vcombine.low %v353_v26, %v357_v37  ;;  %v401_v43 = vld [vmem:[#allocation2 + $0x888] sm:$0xff] }
  0xe4   :  { %3054 = vmatprep.subr.bf16.mxu0 %v6703_v28  ;;  %v6863_v28 = vcombine.high %v417_v60, %v421_v24  ;;  %v405_v44 = vld [vmem:[#allocation2 + $0x8a8] sm:$0xff] }
  0xe5   :  { %2996 = vmatpush2.bf16.msra.mxu1 %v6646_v27  ;;  %v6799_v27 = vcombine.high %v353_v26, %v357_v37  ;;  %v333_v6 = vld [vmem:[#allocation2 + $0x668] sm:$0xff] }
  0xe6   :  { %2997 = vmatprep.subr.bf16.mxu1 %v6639_v32  ;;  %v345_v32 = vld [vmem:[#allocation2 + $0x6c8] sm:$0xff] }
  0xe7   :  { %3055 = vmatpush1.bf16.msra.mxu0 %v6702_v18  ;;  %v6862_v18 = vcombine.low %v417_v60, %v421_v24  ;;  %v6790_v11 = vcombine.low %v345_v32, %v349_v42  ;;  %v393_v5 = vld [vmem:[#allocation2 + $0x848] sm:$0xff] }
  0xe8   :  { %3056 = vmatprep.subr.bf16.mxu0 %v6823_v33  ;;  %v6855_v33 = vcombine.high %v409_v13, %v413_v17  ;;  %v397_v9 = vld [vmem:[#allocation2 + $0x868] sm:$0xff] }
  0xe9   :  { %2998 = vmatpush2.bf16.msra.mxu1 %v6638_v29  ;;  %v6791_v29 = vcombine.high %v345_v32, %v349_v42  ;;  %v325_v26 = vld [vmem:[#allocation2 + $0x628] sm:$0xff] }
  0xea   :  { %3113 = vmatprep.subr.bf16.mxu1 %v6887_v30  ;;  %v337_v30 = vld [vmem:[#allocation2 + $0x688] sm:$0xff] }
  0xeb   :  { %3057 = vmatpush2.bf16.msra.mxu0 %v6822_v15  ;;  %v6854_v15 = vcombine.low %v409_v13, %v413_v17  ;;  %v6782_v21 = vcombine.low %v337_v30, %v341_v34  ;;  %v385_v37 = vld [vmem:[#allocation2 + $0x808] sm:$0xff] }
  0xec   :  { %3000 = vmatmul.mubr.bf16.vlgmr.msra.gmra.mxu1 %v8019_v61  ;;  %3058 = vmatprep.subr.bf16.mxu0 %v6815_v56  ;;  %v6847_v56 = vcombine.high %v401_v43, %v405_v44  ;;  %v389_v60 = vld [vmem:[#allocation2 + $0x828] sm:$0xff] }
  0xed   :  { %3114 = vmatpush1.bf16.msra.mxu1 %v6886_v52  ;;  %3009 = vmatprep.mubr.bf16.mxu1 %v8031_v40  ;;  %v6783_v52 = vcombine.high %v337_v30, %v341_v34  ;;  %v517_v32 = vld [vmem:[#allocation2 + $0xc28] sm:$0xff]  ;;  %v8175_v30 = vld [vmem:[#allocation2 + $0x1f0] sm:$0xff] }
  0xee   :  { %3115 = vmatprep.subr.bf16.mxu1 %v6879_v59  ;;  %v329_v59 = vld [vmem:[#allocation2 + $0x648] sm:$0xff] }
  0xef   :  { %3059 = vmatpush2.bf16.msra.mxu0 %v6814_v25  ;;  %v6846_v25 = vcombine.low %v401_v43, %v405_v44  ;;  %v6774_v24 = vcombine.low %v329_v59, %v333_v6  ;;  %v505_v42 = vld [vmem:[#allocation2 + $0xbc8] sm:$0xff] }
  0xf0   :  { %3060 = vmatprep.subr.bf16.mxu0 %v6807_v0  ;;  %v6839_v0 = vcombine.high %v393_v5, %v397_v9  ;;  %v509_v13 = vld [vmem:[#allocation2 + $0xbe8] sm:$0xff] }
  0xf1   :  { %3116 = vmatpush1.bf16.msra.mxu1 %v6878_v10  ;;  %v6775_v10 = vcombine.high %v329_v59, %v333_v6  ;;  %v497_v34 = vld [vmem:[#allocation2 + $0xb88] sm:$0xff] }
  0xf2   :  { %3117 = vmatprep.subr.bf16.mxu1 %v6871_v22  ;;  %v321_v22 = vld [vmem:[#allocation2 + $0x608] sm:$0xff] }
  0xf3   :  { %3061 = vmatpush2.bf16.msra.mxu0 %v6806_v4  ;;  %v6838_v4 = vcombine.low %v393_v5, %v397_v9  ;;  %v6766_v17 = vcombine.low %v321_v22, %v325_v26  ;;  %v501_v43 = vld [vmem:[#allocation2 + $0xba8] sm:$0xff] }
  0xf4   :  { %3010 = vmatmul.mubr.bf16.gmra.mxu1 %v8045_v45  ;;  %3062 = vmatprep.subr.bf16.mxu0 %v6799_v27  ;;  %v6831_v27 = vcombine.high %v385_v37, %v389_v60  ;;  %v493_v59 = vld [vmem:[#allocation2 + $0xb68] sm:$0xff]  ;;  %v6942_v6 = vcombine.low %v497_v34, %v501_v43 }
  0xf5   :  { %3118 = vmatpush1.bf16.msra.mxu1 %v6870_v8  ;;  %3019 = vmatprep.mubr.bf16.mxu1 %v8053_v49  ;;  %v6767_v8 = vcombine.high %v321_v22, %v325_v26  ;;  %v481_v9 = vld [vmem:[#allocation2 + $0xb08] sm:$0xff] }
  0xf6   :  { %3119 = vmatprep.subr.bf16.mxu1 %v6863_v28  ;;  %v513_v28 = vld [vmem:[#allocation2 + $0xc08] sm:$0xff] }
  0xf7   :  { %3063 = vmatpush2.bf16.msra.mxu0 %v6798_v14  ;;  %v6830_v14 = vcombine.low %v385_v37, %v389_v60  ;;  %v6958_v44 = vcombine.low %v513_v28, %v517_v32  ;;  %v477_v22 = vld [vmem:[#allocation2 + $0xae8] sm:$0xff] }
  0xf8   :  { %3064 = vmatprep.subr.bf16.mxu0 %v6791_v29  ;;  %v6951_v29 = vcombine.high %v505_v42, %v509_v13  ;;  %v465_v60 = vld [vmem:[#allocation2 + $0xa88] sm:$0xff] }
  0xf9   :  { %3120 = vmatpush1.bf16.msra.mxu1 %v6862_v18  ;;  %v6959_v18 = vcombine.high %v513_v28, %v517_v32  ;;  %v461_v28 = vld [vmem:[#allocation2 + $0xa68] sm:$0xff] }
  0xfa   :  { %3121 = vmatprep.subr.bf16.mxu1 %v6855_v33  ;;  %v8173_v33 = vld [vmem:[#allocation2 + $0x1d0] sm:$0xff] }
  0xfb   :  { %3065 = vmatpush2.bf16.msra.mxu0 %v6790_v11  ;;  %v6950_v11 = vcombine.low %v505_v42, %v509_v13  ;;  %v449_v13 = vld [vmem:[#allocation2 + $0xa08] sm:$0xff] }
  0xfc   :  { %3020 = vmatmul.mubr.bf16.gmra.mxu1 %v8065_v53  ;;  %3066 = vmatprep.subr.bf16.mxu0 %v6783_v52  ;;  %v6943_v52 = vcombine.high %v497_v34, %v501_v43  ;;  %v318_v34 = vld [vmem:[#allocation2 + $0x5f0] sm:$0xff] }
  0xfd   :  { %3122 = vmatpush1.bf16.msra.mxu1 %v6854_v15  ;;  %3029 = vmatprep.mubr.bf16.mxu1 %v8073_v57  ;;  %v6633_v15 = vcombine.high %v8173_v33, %v8175_v30 }
  0xfe   :  { %3123 = vmatprep.subr.bf16.mxu1 %v6847_v56  ;;  %v489_v56 = vld [vmem:[#allocation2 + $0xb48] sm:$0xff] }
  0xff   :  { %3067 = vmatpush2.bf16.msra.mxu0 %v6782_v21  ;;  %v6935_v5 = vcombine.high %v489_v56, %v493_v59  ;;  %v485_v21 = vld [vmem:[#allocation2 + $0xb28] sm:$0xff] }
 0x100   :  { %3068 = vmatprep.subr.bf16.mxu0 %v6775_v10  ;;  %v6927_v10 = vcombine.high %v481_v9, %v485_v21  ;;  %v6926_v26 = vcombine.low %v481_v9, %v485_v21  ;;  %v170_v21 = vld [vmem:[#allocation2 + $0x150] sm:$0xff] }
 0x101   :  { %3124 = vmatpush1.bf16.msra.mxu1 %v6846_v25  ;;  %v6934_v25 = vcombine.low %v489_v56, %v493_v59  ;;  %v310_v56 = vld [vmem:[#allocation2 + $0x5b0] sm:$0xff]  ;;  %v6632_v59 = vcombine.low %v8173_v33, %v8175_v30 }
 0x102   :  { %3125 = vmatprep.subr.bf16.mxu1 %v6839_v0  ;;  %v473_v0 = vld [vmem:[#allocation2 + $0xac8] sm:$0xff] }
 0x103   :  { %3069 = vmatpush2.bf16.msra.mxu0 %v6774_v24  ;;  %v6919_v37 = vcombine.high %v473_v0, %v477_v22  ;;  %v469_v24 = vld [vmem:[#allocation2 + $0xaa8] sm:$0xff] }
 0x104   :  { %3030 = vmatmul.mubr.bf16.gmra.mxu1 %v8085_v63  ;;  %3070 = vmatprep.subr.bf16.mxu0 %v6767_v8  ;;  %v6911_v8 = vcombine.high %v465_v60, %v469_v24  ;;  %v6910_v32 = vcombine.low %v465_v60, %v469_v24  ;;  %v166_v60 = vld [vmem:[#allocation2 + $0x130] sm:$0xff] }
 0x105   :  { %3126 = vmatpush1.bf16.msra.mxu1 %v6838_v4  ;;  %3145 = vmatprep.mubr.bf16.mxu1 %v8093_v41  ;;  %v6918_v4 = vcombine.low %v473_v0, %v477_v22  ;;  %v302_v0 = vld [vmem:[#allocation2 + $0x570] sm:$0xff] }
 0x106   :  { %3127 = vmatprep.subr.bf16.mxu1 %v6831_v27  ;;  %v457_v27 = vld [vmem:[#allocation2 + $0xa48] sm:$0xff]  ;;  %v290_v24 = vld [vmem:[#allocation2 + $0x510] sm:$0xff] }
 0x107   :  { %3071 = vmatpush2.bf16.msra.mxu0 %v6766_v17  ;;  %v6903_v42 = vcombine.high %v457_v27, %v461_v28  ;;  %v453_v17 = vld [vmem:[#allocation2 + $0xa28] sm:$0xff] }
 0x108   :  { %3200 = vmatprep.subr.bf16.mxu0 %v6959_v18  ;;  %v6895_v18 = vcombine.high %v449_v13, %v453_v17  ;;  %v6894_v43 = vcombine.low %v449_v13, %v453_v17  ;;  %v158_v13 = vld [vmem:[#allocation2 + $0xf0] sm:$0xff] }
 0x109   :  { %3128 = vmatpush1.bf16.msra.mxu1 %v6830_v14  ;;  %v6902_v14 = vcombine.low %v457_v27, %v461_v28  ;;  %v282_v17 = vld [vmem:[#allocation2 + $0x4d0] sm:$0xff] }
 0x10a   :  { %3129 = vmatprep.subr.bf16.mxu1 %v6951_v29  ;;  %3073 = vmatmul.mubr.bf16.vlgmr.msra.gmra.mxu0 %v8023_v62  ;;  %v314_v29 = vld [vmem:[#allocation2 + $0x5d0] sm:$0xff] }
 0x10b   :  { %3201 = vmatpush1.bf16.msra.mxu0 %v6958_v44  ;;  %3082 = vmatprep.mubr.bf16.mxu0 %v8035_v3  ;;  %v6761_v44 = vcombine.high %v314_v29, %v318_v34 }
 0x10c   :  { %3259 = vmatprep.subr.bf16.mxu0 %v6633_v15  ;;  %v182_v15 = vld [vmem:[#allocation2 + $0x1b0] sm:$0xff] }
 0x10d   :  { %3130 = vmatpush2.bf16.msra.mxu1 %v6950_v11  ;;  %v178_v11 = vld [vmem:[#allocation2 + $0x190] sm:$0xff] }
 0x10e   :  { %3131 = vmatprep.subr.bf16.mxu1 %v6943_v52  ;;  %v306_v52 = vld [vmem:[#allocation2 + $0x590] sm:$0xff]  ;;  %v6624_v22 = vcombine.low %v178_v11, %v182_v15 }
 0x10f   :  { %v6753_v9 = vcombine.high %v306_v52, %v310_v56 }
 0x111   :  { %3132 = vmatpush2.bf16.msra.mxu1 %v6942_v6  ;;  %v6760_v6 = vcombine.low %v314_v29, %v318_v34 }
 0x112   :  { %3133 = vmatprep.subr.bf16.mxu1 %v6935_v5  ;;  %3083 = vmatmul.mubr.bf16.gmra.mxu0 %v8049_v46  ;;  %v6625_v5 = vcombine.high %v178_v11, %v182_v15  ;;  %v150_v11 = vld [vmem:[#allocation2 + $0xb0] sm:$0xff] }
 0x113   :  { %3092 = vmatprep.mubr.bf16.mxu0 %v8057_v50  ;;  %v274_v15 = vld [vmem:[#allocation2 + $0x490] sm:$0xff] }
 0x115   :  { %3134 = vmatpush2.bf16.msra.mxu1 %v6934_v25  ;;  %v174_v25 = vld [vmem:[#allocation2 + $0x170] sm:$0xff] }
 0x116   :  { %3135 = vmatprep.subr.bf16.mxu1 %v6927_v10  ;;  %v298_v10 = vld [vmem:[#allocation2 + $0x550] sm:$0xff]  ;;  %v6617_v33 = vcombine.high %v170_v21, %v174_v25 }
 0x117   :  { %v6745_v30 = vcombine.high %v298_v10, %v302_v0  ;;  %v6744_v27 = vcombine.low %v298_v10, %v302_v0  ;;  %v270_v10 = vld [vmem:[#allocation2 + $0x470] sm:$0xff] }
 0x119   :  { %3136 = vmatpush2.bf16.msra.mxu1 %v6926_v26  ;;  %v6752_v26 = vcombine.low %v306_v52, %v310_v56  ;;  %v278_v52 = vld [vmem:[#allocation2 + $0x4b0] sm:$0xff] }
 0x11a   :  { %3137 = vmatprep.subr.bf16.mxu1 %v6919_v37  ;;  %3093 = vmatmul.mubr.bf16.gmra.mxu0 %v8069_v54  ;;  %v162_v37 = vld [vmem:[#allocation2 + $0x110] sm:$0xff] }
 0x11b   :  { %3102 = vmatprep.mubr.bf16.mxu0 %v8077_v58  ;;  %v6609_v28 = vcombine.high %v162_v37, %v166_v60 }
 0x11d   :  { %3138 = vmatpush2.bf16.msra.mxu1 %v6918_v4  ;;  %v294_v4 = vld [vmem:[#allocation2 + $0x530] sm:$0xff] }
 0x11e   :  { %3139 = vmatprep.subr.bf16.mxu1 %v6911_v8  ;;  %v6616_v8 = vcombine.low %v170_v21, %v174_v25  ;;  %v6736_v29 = vcombine.low %v290_v24, %v294_v4  ;;  %v142_v21 = vld [vmem:[#allocation2 + $0x70] sm:$0xff] }
 0x11f   :  { %v266_v25 = vld [vmem:[#allocation2 + $0x450] sm:$0xff] }
 0x121   :  { %3140 = vmatpush2.bf16.msra.mxu1 %v6910_v32  ;;  %v6737_v32 = vcombine.high %v290_v24, %v294_v4  ;;  %v258_v24 = vld [vmem:[#allocation2 + $0x410] sm:$0xff] }
 0x122   :  { %3141 = vmatprep.subr.bf16.mxu1 %v6903_v42  ;;  %3103 = vmatmul.mubr.bf16.gmra.mxu0 %v8089_v38  ;;  %v154_v42 = vld [vmem:[#allocation2 + $0xd0] sm:$0xff] }
 0x123   :  { %3218 = vmatprep.mubr.bf16.mxu0 %v9134_v31  ;;  %v6601_v34 = vcombine.high %v154_v42, %v158_v13  ;;  %v6600_v56 = vcombine.low %v154_v42, %v158_v13  ;;  %v262_v4 = vld [vmem:[#allocation2 + $0x430] sm:$0xff] }
 0x124   :  { %v6705_v42 = vcombine.high %v258_v24, %v262_v4  ;;  %v250_v13 = vld [vmem:[#allocation2 + $0x3d0] sm:$0xff] }
 0x125   :  { %3142 = vmatpush2.bf16.msra.mxu1 %v6902_v14  ;;  %v286_v14 = vld [vmem:[#allocation2 + $0x4f0] sm:$0xff] }
 0x126   :  { %3143 = vmatprep.subr.bf16.mxu1 %v6895_v18  ;;  %v6608_v18 = vcombine.low %v162_v37, %v166_v60  ;;  %v130_v37 = vld [vmem:[#allocation2 + $0x10] sm:$0xff] }
 0x127   :  { %v134_v60 = vld [vmem:[#allocation2 + $0x30] sm:$0xff] }
 0x129   :  { %3144 = vmatpush2.bf16.msra.mxu1 %v6894_v43  ;;  %v6729_v43 = vcombine.high %v282_v17, %v286_v14 }
 0x12a   :  { %3332 = vmatprep.subr.bf16.mxu1 %v6761_v44  ;;  %6968 = vmatmul.mubr.msk.bf16.vlgmr.msra.gmra.mxu0 %vm2662_vm0, %v8101_v48  ;;  %v146_v44 = vld [vmem:[#allocation2 + $0x90] sm:$0xff] }
 0x12b   :  { %3260 = vmatpush1.bf16.msra.mxu0 %v6632_v59  ;;  %3228 = vmatprep.mubr.bf16.mxu0 %v9134_v31  ;;  %v6728_v59 = vcombine.low %v282_v17, %v286_v14  ;;  %v6592_v0 = vcombine.low %v146_v44, %v150_v11  ;;  %v254_v17 = vld [vmem:[#allocation2 + $0x3f0] sm:$0xff] }
 0x12c   :  { %3146 = vmatmul.mubr.bf16.vlgmr.msra.gmra.mxu1 %v8131_v47  ;;  %3261 = vmatprep.subr.bf16.mxu0 %v6625_v5  ;;  %v6721_v5 = vcombine.high %v274_v15, %v278_v52  ;;  %v378_v14 = vld [vmem:[#allocation2 + $0x7d0] sm:$0xff] }
 0x12d   :  { %3333 = vmatpush1.bf16.msra.mxu1 %v6760_v6  ;;  %3155 = vmatprep.mubr.bf16.mxu1 %v8135_v16  ;;  %v6593_v6 = vcombine.high %v146_v44, %v150_v11  ;;  %v6697_v44 = vcombine.high %v250_v13, %v254_v17  ;;  %v520_v11 = vld [vmem:[#allocation6] sm:$0xff] }
 0x12e   :  { %3334 = vmatprep.subr.bf16.mxu1 %v6753_v9  ;;  %v138_v9 = vld [vmem:[#allocation2 + $0x50] sm:$0xff] }
 0x12f   :  { %3262 = vmatpush1.bf16.msra.mxu0 %v6624_v22  ;;  %v522_v22 = vlaneseq }
 0x130   :  { %3263 = vmatprep.subr.bf16.mxu0 %v6617_v33  ;;  %v6585_v33 = vcombine.high %v138_v9, %v142_v21 }
 0x131   :  { %3335 = vmatpush1.bf16.msra.mxu1 %v6752_v26  ;;  %v6720_v26 = vcombine.low %v274_v15, %v278_v52 }
 0x132   :  { %3336 = vmatprep.subr.bf16.mxu1 %v6745_v30  ;;  %6969 = vmatmul.mubr.msk.bf16.gmra.mxu0 %vm2662_vm0, %v8110_v23  ;;  %v6713_v30 = vcombine.high %v266_v25, %v270_v10 }
 0x133   :  { %3264 = vmatpush1.bf16.msra.mxu0 %v6616_v8  ;;  %3238 = vmatprep.mubr.bf16.mxu0 %v9134_v31  ;;  %v6584_v8 = vcombine.low %v138_v9, %v142_v21  ;;  %v6696_v9 = vcombine.low %v250_v13, %v254_v17 }
 0x134   :  { %3156 = vmatmul.mubr.bf16.gmra.mxu1 %v8141_v19  ;;  %3265 = vmatprep.subr.bf16.mxu0 %v6609_v28  ;;  %v6712_v28 = vcombine.low %v266_v25, %v270_v10  ;;  %v438_v19 = vld [vmem:[#allocation2 + $0x9b0] sm:$0xff] }
 0x135   :  { %3337 = vmatpush1.bf16.msra.mxu1 %v6744_v27  ;;  %3165 = vmatprep.mubr.bf16.mxu1 %v8145_v7  ;;  %v8204_v27 = vshrl.u32 %v522_v22, 7  ;;  %v434_v7 = vld [vmem:[#allocation2 + $0x990] sm:$0xff] }
 0x136   :  { %3338 = vmatprep.subr.bf16.mxu1 %v6737_v32  ;;  %v6577_v32 = vcombine.high %v130_v37, %v134_v60 }
 0x137   :  { %3266 = vmatpush1.bf16.msra.mxu0 %v6608_v18  ;;  %9205 = vst [vmem:[#allocation41_spill] sm:$0xff] %v8204_v27  ;;  %v382_v18 = vld [vmem:[#allocation2 + $0x7f0] sm:$0xff]  ;;  %v8213_v52 = vsub.s32 1, %v8204_v27 }
 0x138   :  { %3267 = vmatprep.subr.bf16.mxu0 %v6601_v34  ;;  %v8210_v34 = vsub.s32 0, %v8204_v27  ;;  %v6825_v15 = vcombine.high %v378_v14, %v382_v18  ;;  %v6824_v25 = vcombine.low %v378_v14, %v382_v18 }
 0x139   :  { %3339 = vmatpush1.bf16.msra.mxu1 %v6736_v29  ;;  %v6576_v29 = vcombine.low %v130_v37, %v134_v60  ;;  %9207 = vst [vmem:[#allocation43_spill] sm:$0xff] %v8213_v52  ;;  %v362_v37 = vld [vmem:[#allocation2 + $0x750] sm:$0xff] }
 0x13a   :  { %3340 = vmatprep.subr.bf16.mxu1 %v6729_v43  ;;  %6970 = vmatmul.mubr.msk.bf16.gmra.mxu0 %vm2662_vm0, %v8117_v12  ;;  %9206 = vst [vmem:[#allocation42_spill] sm:$0xff] %v8210_v34  ;;  %v6704_v43 = vcombine.low %v258_v24, %v262_v4  ;;  %v8218_v21 = vrot.slane %v520_v11, %v8210_v34  ;;  %v366_v60 = vld [vmem:[#allocation2 + $0x770] sm:$0xff] }
 0x13b   :  { %3268 = vmatpush1.bf16.msra.mxu0 %v6600_v56  ;;  %3248 = vmatprep.mubr.bf16.mxu0 %v9134_v31  ;;  %v242_v56 = vld [vmem:[#allocation2 + $0x390] sm:$0xff]  ;;  %v6809_v18 = vcombine.high %v362_v37, %v366_v60 }
 0x13c   :  { %3166 = vmatmul.mubr.bf16.gmra.mxu1 %v8151_v51  ;;  %3269 = vmatprep.subr.bf16.mxu0 %v6593_v6  ;;  %v370_v6 = vld [vmem:[#allocation2 + $0x790] sm:$0xff] }
 0x13d   :  { %3341 = vmatpush1.bf16.msra.mxu1 %v6728_v59  ;;  %3175 = vmatprep.mubr.bf16.mxu1 %v8155_v55  ;;  %v246_v59 = vld [vmem:[#allocation2 + $0x3b0] sm:$0xff] }
 0x13e   :  { %3342 = vmatprep.subr.bf16.mxu1 %v6721_v5  ;;  %v374_v5 = vld [vmem:[#allocation2 + $0x7b0] sm:$0xff]  ;;  %v6689_v10 = vcombine.high %v242_v56, %v246_v59 }
 0x13f   :  { %3270 = vmatpush1.bf16.msra.mxu0 %v6592_v0  ;;  %v8221_v0 = vrot.slane %v520_v11, %v8213_v52  ;;  %v6817_v22 = vcombine.high %v370_v6, %v374_v5  ;;  %v354_v11 = vld [vmem:[#allocation2 + $0x710] sm:$0xff] }
 0x140   :  { %3271 = vmatprep.subr.bf16.mxu0 %v6585_v33  ;;  %v238_v33 = vld [vmem:[#allocation2 + $0x370] sm:$0xff] }
 0x141   :  { %3343 = vmatpush1.bf16.msra.mxu1 %v6720_v26  ;;  %v234_v26 = vld [vmem:[#allocation2 + $0x350] sm:$0xff] }
 0x142   :  { %3344 = vmatprep.subr.bf16.mxu1 %v6713_v30  ;;  %6971 = vmatmul.mubr.msk.bf16.gmra.mxu0 %vm2662_vm0, %v8124_v39  ;;  %v210_v31 = vld [vmem:[#allocation2 + $0x290] sm:$0xff] }
 0x143   :  { %3272 = vmatpush1.bf16.msra.mxu0 %v6584_v8  ;;  %3291 = vmatprep.mubr.bf16.mxu0 %v8009_v35  ;;  %v6688_v8 = vcombine.low %v242_v56, %v246_v59  ;;  %v338_v52 = vld [vmem:[#allocation2 + $0x690] sm:$0xff] }
 0x144   :  { %3176 = vmatmul.mubr.bf16.gmra.mxu1 %v8161_v20  ;;  %3273 = vmatprep.subr.bf16.mxu0 %v6577_v32  ;;  %v6816_v32 = vcombine.low %v370_v6, %v374_v5  ;;  %v6680_v6 = vcombine.low %v234_v26, %v238_v33  ;;  %v198_v20 = vld [vmem:[#allocation2 + $0x230] sm:$0xff] }
 0x145   :  { %3345 = vmatpush1.bf16.msra.mxu1 %v6712_v28  ;;  %3364 = vmatprep.mubr.bf16.mxu1 %v8013_v36  ;;  %v194_v36 = vld [vmem:[#allocation2 + $0x210] sm:$0xff] }
 0x146   :  { %3346 = vmatprep.subr.bf16.mxu1 %v6705_v42  ;;  %v6681_v42 = vcombine.high %v234_v26, %v238_v33  ;;  %v322_v55 = vld [vmem:[#allocation2 + $0x610] sm:$0xff] }
 0x147   :  { %3274 = vmatpush1.bf16.msra.mxu0 %v6576_v29  ;;  %v226_v29 = vld [vmem:[#allocation2 + $0x310] sm:$0xff] }
 0x148   :  { %3275 = vmatprep.subr.bf16.mxu0 %v6697_v44 }
 0x149   :  { %3347 = vmatpush1.bf16.msra.mxu1 %v6704_v43  ;;  %v230_v43 = vld [vmem:[#allocation2 + $0x330] sm:$0xff] }
 0x14a   :  { %3348 = vmatprep.subr.bf16.mxu1 %v6825_v15  ;;  %v2709_v30 = vpop.f32.mrf.mxu0  ;;  %v358_v15 = vld [vmem:[#allocation2 + $0x730] sm:$0xff]  ;;  %v6672_v33 = vcombine.low %v226_v29, %v230_v43 }
 0x14b   :  { %v2710_v24 = vadd.f32 %v2709_v30, %v8218_v21  ;;  %3276 = vmatpush2.bf16.msra.mxu0 %v6696_v9  ;;  %v6808_v9 = vcombine.low %v362_v37, %v366_v60  ;;  %v6800_v37 = vcombine.low %v354_v11, %v358_v15 }
 0x14c   :  { %v2782_v4 = vpop.f32.mrf.mxu1  ;;  %v2711_v28 = vpop.f32.mrf.mxu0  ;;  %3277 = vmatprep.subr.bf16.mxu0 %v6689_v10 }
 0x14d   :  { %3349 = vmatpush2.bf16.msra.mxu1 %v6824_v25  ;;  %v8224_v13 = vadd.f32 %v2782_v4, %v2710_v24  ;;  %v2712_v17 = vadd.f32 %v2711_v28, %v8221_v0  ;;  %v6673_v25 = vcombine.high %v226_v29, %v230_v43  ;;  %v6801_v24 = vcombine.high %v354_v11, %v358_v15  ;;  %v218_v4 = vld [vmem:[#allocation2 + $0x2d0] sm:$0xff] }
 0x14e   :  { %v2784_v14 = vpop.f32.mrf.mxu1  ;;  %3350 = vmatprep.subr.bf16.mxu1 %v6817_v22  ;;  %v2713_v44 = vpop.f32.mrf.mxu0  ;;  %v222_v28 = vld [vmem:[#allocation2 + $0x2f0] sm:$0xff] }
 0x14f   :  { %v8227_v30 = vadd.f32 %v2784_v14, %v2712_v17  ;;  %v2714_v56 = vadd.f32 %v2713_v44, %v8218_v21  ;;  %3278 = vmatpush2.bf16.msra.mxu0 %v6688_v8  ;;  %v346_v14 = vld [vmem:[#allocation2 + $0x6d0] sm:$0xff]  ;;  %v6665_v60 = vcombine.high %v218_v4, %v222_v28  ;;  %v6664_v11 = vcombine.low %v218_v4, %v222_v28 }
 0x150   :  { %v2786_v59 = vpop.f32.mrf.mxu1  ;;  %v8230_v5 = vpop.f32.mrf.mxu0  ;;  %3279 = vmatprep.subr.bf16.mxu0 %v6681_v42  ;;  %v350_v44 = vld [vmem:[#allocation2 + $0x6f0] sm:$0xff]  ;;  %v6656_v28 = vcombine.low %v210_v31, %v214_v2 }
 0x151   :  { %3351 = vmatpush2.bf16.msra.mxu1 %v6816_v32  ;;  %v8232_v10 = vadd.f32 %v2786_v59, %v2714_v56  ;;  %v6793_v59 = vcombine.high %v346_v14, %v350_v44 }
 0x152   :  { %v8234_v22 = vpop.f32.mrf.mxu1  ;;  %3352 = vmatprep.subr.bf16.mxu1 %v6809_v18  ;;  %v2719_v17 = vpop.f32.mrf.mxu0 }
 0x153   :  { %v2720_v8 = vadd.f32 %v2719_v17, %v8218_v21  ;;  %3280 = vmatpush2.bf16.msra.mxu0 %v6680_v6  ;;  %v342_v17 = vld [vmem:[#allocation2 + $0x6b0] sm:$0xff]  ;;  %v6792_v6 = vcombine.low %v346_v14, %v350_v44 }
 0x154   :  { %v2792_v26 = vpop.f32.mrf.mxu1  ;;  %v2721_v32 = vpop.f32.mrf.mxu0  ;;  %3281 = vmatprep.subr.bf16.mxu0 %v6673_v25  ;;  %v6784_v14 = vcombine.low %v338_v52, %v342_v17 }
 0x155   :  { %3353 = vmatpush2.bf16.msra.mxu1 %v6808_v9  ;;  %v8237_v42 = vadd.f32 %v2792_v26, %v2720_v8  ;;  %v2722_v18 = vadd.f32 %v2721_v32, %v8221_v0  ;;  %v6657_v9 = vcombine.high %v210_v31, %v214_v2  ;;  %v6785_v8 = vcombine.high %v338_v52, %v342_v17  ;;  %v202_v26 = vld [vmem:[#allocation2 + $0x250] sm:$0xff] }
 0x156   :  { %v2794_v56 = vpop.f32.mrf.mxu1  ;;  %3354 = vmatprep.subr.bf16.mxu1 %v6801_v24  ;;  %v2723_v1 = vpop.f32.mrf.mxu0  ;;  %v206_v32 = vld [vmem:[#allocation2 + $0x270] sm:$0xff] }
 0x157   :  { %v8240_v34 = vadd.f32 %v2794_v56, %v2722_v18  ;;  %v2724_v29 = vadd.f32 %v2723_v1, %v8218_v21  ;;  %3282 = vmatpush2.bf16.msra.mxu0 %v6672_v33  ;;  %v330_v56 = vld [vmem:[#allocation2 + $0x650] sm:$0xff]  ;;  %v6649_v44 = vcombine.high %v202_v26, %v206_v32  ;;  %v6648_v52 = vcombine.low %v202_v26, %v206_v32 }
 0x158   :  { %v2796_v43 = vpop.f32.mrf.mxu1  ;;  %v8243_v15 = vpop.f32.mrf.mxu0  ;;  %3283 = vmatprep.subr.bf16.mxu0 %v6665_v60  ;;  %v334_v1 = vld [vmem:[#allocation2 + $0x670] sm:$0xff]  ;;  %v6640_v32 = vcombine.low %v194_v36, %v198_v20 }
 0x159   :  { %3355 = vmatpush2.bf16.msra.mxu1 %v6800_v37  ;;  %v8245_v25 = vadd.f32 %v2796_v43, %v2724_v29  ;;  %v6777_v43 = vcombine.high %v330_v56, %v334_v1 }
 0x15a   :  { %v8247_v24 = vpop.f32.mrf.mxu1  ;;  %3356 = vmatprep.subr.bf16.mxu1 %v6793_v59  ;;  %v2729_v18 = vpop.f32.mrf.mxu0 }
 0x15b   :  { %v2730_v33 = vadd.f32 %v2729_v18, %v8218_v21  ;;  %3284 = vmatpush2.bf16.msra.mxu0 %v6664_v11  ;;  %v326_v18 = vld [vmem:[#allocation2 + $0x630] sm:$0xff]  ;;  %v6776_v11 = vcombine.low %v330_v56, %v334_v1 }
 0x15c   :  { %v2802_v4 = vpop.f32.mrf.mxu1  ;;  %v2731_v37 = vpop.f32.mrf.mxu0  ;;  %3285 = vmatprep.subr.bf16.mxu0 %v6657_v9  ;;  %v6768_v56 = vcombine.low %v322_v55, %v326_v18 }
 0x15d   :  { %3357 = vmatpush2.bf16.msra.mxu1 %v6792_v6  ;;  %v8250_v60 = vadd.f32 %v2802_v4, %v2730_v33  ;;  %v2732_v59 = vadd.f32 %v2731_v37, %v8221_v0  ;;  %v6641_v6 = vcombine.high %v194_v36, %v198_v20  ;;  %v6769_v33 = vcombine.high %v322_v55, %v326_v18  ;;  %v442_v4 = vld [vmem:[#allocation2 + $0x9d0] sm:$0xff]  ;;  %v8271_v55 = vld [vmem:[#allocation2 + $0x1f8] sm:$0xff] }
 0x15e   :  { %v2804_v29 = vpop.f32.mrf.mxu1  ;;  %3358 = vmatprep.subr.bf16.mxu1 %v6785_v8  ;;  %v2733_v27 = vpop.f32.mrf.mxu0  ;;  %v446_v37 = vld [vmem:[#allocation2 + $0x9f0] sm:$0xff] }
 0x15f   :  { %v8253_v51 = vadd.f32 %v2804_v29, %v2732_v59  ;;  %v2734_v2 = vadd.f32 %v2733_v27, %v8218_v21  ;;  %3286 = vmatpush2.bf16.msra.mxu0 %v6656_v28  ;;  %v514_v29 = vld [vmem:[#allocation2 + $0xc10] sm:$0xff]  ;;  %v6889_v1 = vcombine.high %v442_v4, %v446_v37  ;;  %v6888_v20 = vcombine.low %v442_v4, %v446_v37 }
 0x160   :  { %v2806_v31 = vpop.f32.mrf.mxu1  ;;  %v8256_v17 = vpop.f32.mrf.mxu0  ;;  %3287 = vmatprep.subr.bf16.mxu0 %v6649_v44  ;;  %v518_v27 = vld [vmem:[#allocation2 + $0xc30] sm:$0xff]  ;;  %v6880_v4 = vcombine.low %v434_v7, %v438_v19 }
 0x161   :  { %3359 = vmatpush2.bf16.msra.mxu1 %v6784_v14  ;;  %v8258_v9 = vadd.f32 %v2806_v31, %v2734_v2  ;;  %v6961_v31 = vcombine.high %v514_v29, %v518_v27  ;;  %v6960_v18 = vcombine.low %v514_v29, %v518_v27  ;;  %v418_v29 = vld [vmem:[#allocation2 + $0x910] sm:$0xff] }
 0x162   :  { %v8260_v8 = vpop.f32.mrf.mxu1  ;;  %3360 = vmatprep.subr.bf16.mxu1 %v6777_v43  ;;  %v2739_v59 = vpop.f32.mrf.mxu0  ;;  %v422_v27 = vld [vmem:[#allocation2 + $0x930] sm:$0xff] }
 0x163   :  { %v2740_v28 = vadd.f32 %v2739_v59, %v8218_v21  ;;  %3288 = vmatpush2.bf16.msra.mxu0 %v6648_v52  ;;  %v426_v59 = vld [vmem:[#allocation2 + $0x950] sm:$0xff] }
 0x164   :  { %v2812_v26 = vpop.f32.mrf.mxu1  ;;  %v2741_v14 = vpop.f32.mrf.mxu0  ;;  %3289 = vmatprep.subr.bf16.mxu0 %v6641_v6  ;;  %v6881_v6 = vcombine.high %v434_v7, %v438_v19  ;;  %v6864_v7 = vcombine.low %v418_v29, %v422_v27 }
 0x165   :  { %3361 = vmatpush2.bf16.msra.mxu1 %v6776_v11  ;;  %v8263_v44 = vadd.f32 %v2812_v26, %v2740_v28  ;;  %v2742_v43 = vadd.f32 %v2741_v14, %v8221_v0  ;;  %v8269_v11 = vld [vmem:[#allocation2 + $0x1d8] sm:$0xff]  ;;  %v430_v28 = vld [vmem:[#allocation2 + $0x970] sm:$0xff]  ;;  %v6865_v14 = vcombine.high %v418_v29, %v422_v27 }
 0x166   :  { %v2814_v2 = vpop.f32.mrf.mxu1  ;;  %3362 = vmatprep.subr.bf16.mxu1 %v6769_v33  ;;  %v2743_v16 = vpop.f32.mrf.mxu0  ;;  %v6873_v37 = vcombine.high %v426_v59, %v430_v28 }
 0x167   :  { %v8266_v47 = vadd.f32 %v2814_v2, %v2742_v43  ;;  %v2744_v52 = vadd.f32 %v2743_v16, %v8218_v21  ;;  %3290 = vmatpush2.bf16.msra.mxu0 %v6640_v32  ;;  %v6635_v16 = vcombine.high %v8269_v11, %v8271_v55  ;;  %v6872_v32 = vcombine.low %v426_v59, %v430_v28  ;;  %v402_v2 = vld [vmem:[#allocation2 + $0x890] sm:$0xff] }
 0x168   :  { %v2816_v36 = vpop.f32.mrf.mxu1  ;;  %3405 = vmatprep.subr.bf16.mxu0 %v6889_v1  ;;  %v414_v1 = vld [vmem:[#allocation2 + $0x8f0] sm:$0xff] }
 0x169   :  { %3363 = vmatpush2.bf16.msra.mxu1 %v6768_v56  ;;  %v8273_v33 = vadd.f32 %v2816_v36, %v2744_v52  ;;  %v410_v56 = vld [vmem:[#allocation2 + $0x8d0] sm:$0xff] }
 0x16a   :  { %3492 = vmatprep.subr.bf16.mxu1 %v6961_v31  ;;  %3292 = vmatmul.mubr.bf16.vlgmr.msra.gmra.mxu0 %v8019_v61  ;;  %v8278_v21 = vpop.f32.mrf.mxu1  ;;  %v6857_v43 = vcombine.high %v410_v56, %v414_v1  ;;  %v406_v31 = vld [vmem:[#allocation2 + $0x8b0] sm:$0xff]  ;;  %v6856_v36 = vcombine.low %v410_v56, %v414_v1 }
 0x16b   :  { %3406 = vmatpush1.bf16.msra.mxu0 %v6888_v20  ;;  %3301 = vmatprep.mubr.bf16.mxu0 %v8031_v40  ;;  %v6849_v20 = vcombine.high %v402_v2, %v406_v31  ;;  %v6848_v28 = vcombine.low %v402_v2, %v406_v31  ;;  %v510_v56 = vld [vmem:[#allocation2 + $0xbf0] sm:$0xff] }
 0x16c   :  { %3365 = vmatmul.mubr.bf16.vlgmr.msra.gmra.mxu1 %v8023_v62  ;;  %3407 = vmatprep.subr.bf16.mxu0 %v6881_v6  ;;  %v8283_v26 = vpop.f32.mrf.mxu1  ;;  %v398_v6 = vld [vmem:[#allocation2 + $0x870] sm:$0xff] }
 0x16d   :  { %3493 = vmatpush1.bf16.msra.mxu1 %v6960_v18  ;;  %3374 = vmatprep.mubr.bf16.mxu1 %v8035_v3  ;;  %v394_v18 = vld [vmem:[#allocation2 + $0x850] sm:$0xff]  ;;  %v8320_v3 = vld [vmem:[#allocation2 + $0x118] sm:$0xff] }
 0x16e   :  { %3551 = vmatprep.subr.bf16.mxu1 %v6635_v16  ;;  %v8286_v19 = vpop.f32.mrf.mxu1  ;;  %v6841_v16 = vcombine.high %v394_v18, %v398_v6  ;;  %v6840_v27 = vcombine.low %v394_v18, %v398_v6  ;;  %v498_v31 = vld [vmem:[#allocation2 + $0xb90] sm:$0xff]  ;;  %v179_v18 = vld [vmem:[#allocation2 + $0x198] sm:$0xff] }
 0x16f   :  { %3408 = vmatpush1.bf16.msra.mxu0 %v6880_v4  ;;  %v386_v4 = vld [vmem:[#allocation2 + $0x810] sm:$0xff]  ;;  %v183_v6 = vld [vmem:[#allocation2 + $0x1b8] sm:$0xff] }
 0x170   :  { %3409 = vmatprep.subr.bf16.mxu0 %v6873_v37  ;;  %v8291_v52 = vpop.f32.mrf.mxu1  ;;  %v390_v37 = vld [vmem:[#allocation2 + $0x830] sm:$0xff] }
 0x172   :  { %3302 = vmatmul.mubr.bf16.gmra.mxu0 %v8045_v45  ;;  %v8294_v59 = vpop.f32.mrf.mxu1 }
 0x173   :  { %3410 = vmatpush1.bf16.msra.mxu0 %v6872_v32  ;;  %3311 = vmatprep.mubr.bf16.mxu0 %v8053_v49  ;;  %v6833_v32 = vcombine.high %v386_v4, %v390_v37 }
 0x174   :  { %3375 = vmatmul.mubr.bf16.gmra.mxu1 %v8049_v46  ;;  %3411 = vmatprep.subr.bf16.mxu0 %v6865_v14  ;;  %v8299_v29 = vpop.f32.mrf.mxu1  ;;  %v506_v14 = vld [vmem:[#allocation2 + $0xbd0] sm:$0xff]  ;;  %v175_v46 = vld [vmem:[#allocation2 + $0x178] sm:$0xff] }
 0x175   :  { %3384 = vmatprep.mubr.bf16.mxu1 %v8057_v50  ;;  %v6953_v2 = vcombine.high %v506_v14, %v510_v56  ;;  %v171_v50 = vld [vmem:[#allocation2 + $0x158] sm:$0xff] }
 0x176   :  { %v8301_v1 = vpop.f32.mrf.mxu1 }
 0x177   :  { %3412 = vmatpush1.bf16.msra.mxu0 %v6864_v7  ;;  %v6832_v7 = vcombine.low %v386_v4, %v390_v37  ;;  %v6627_v37 = vcombine.high %v179_v18, %v183_v6 }
 0x178   :  { %3413 = vmatprep.subr.bf16.mxu0 %v6857_v43  ;;  %v9208_v43 = vmov 0  }
 0x17a   :  { %3312 = vmatmul.mubr.bf16.gmra.mxu0 %v8065_v53 }
 0x17b   :  { %3414 = vmatpush1.bf16.msra.mxu0 %v6856_v36  ;;  %3321 = vmatprep.mubr.bf16.mxu0 %v8073_v57  ;;  %v502_v36 = vld [vmem:[#allocation2 + $0xbb0] sm:$0xff] }
 0x17c   :  { %3385 = vmatmul.mubr.bf16.gmra.mxu1 %v8069_v54  ;;  %3415 = vmatprep.subr.bf16.mxu0 %v6849_v20  ;;  %v8306_v20 = vpop.f32.mrf.mxu1  ;;  %v6945_v4 = vcombine.high %v498_v31, %v502_v36 }
 0x17d   :  { %3394 = vmatprep.mubr.bf16.mxu1 %v8077_v58 }
 0x17e   :  { %v8313_v58 = vpop.f32.mrf.mxu1 }
 0x17f   :  { %3416 = vmatpush1.bf16.msra.mxu0 %v6848_v28  ;;  %v6952_v28 = vcombine.low %v506_v14, %v510_v56  ;;  %v6944_v56 = vcombine.low %v498_v31, %v502_v36  ;;  %v8333_v36 = vld [vmem:[#allocation2 + $0xd8] sm:$0xff] }
 0x180   :  { %3417 = vmatprep.subr.bf16.mxu0 %v6841_v16  ;;  %v8309_v16 = vpop.f32.mrf.mxu0 }
 0x182   :  { %3322 = vmatmul.mubr.bf16.gmra.mxu0 %v8085_v63  ;;  %v8324_v63 = vpop.f32.mrf.mxu1 }
 0x183   :  { %3418 = vmatpush1.bf16.msra.mxu0 %v6840_v27  ;;  %3437 = vmatprep.mubr.bf16.mxu0 %v8093_v41  ;;  %v6634_v27 = vcombine.low %v8269_v11, %v8271_v55  ;;  %v2716_v11 = vadd.f32 %v8230_v5, %v8221_v0  ;;  %v8330_v5 = vld [vmem:[#allocation2 + $0xb30] sm:$0xff] }
 0x184   :  { %3395 = vmatmul.mubr.bf16.gmra.mxu1 %v8089_v38  ;;  %3419 = vmatprep.subr.bf16.mxu0 %v6833_v32  ;;  %v490_v32 = vld [vmem:[#allocation2 + $0xb50] sm:$0xff] }
 0x185   :  { %3510 = vmatprep.mubr.bf16.mxu1 %v9208_v43  ;;  %v494_v38 = vld [vmem:[#allocation2 + $0xb70] sm:$0xff] }
 0x187   :  { %3420 = vmatpush1.bf16.msra.mxu0 %v6832_v7  ;;  %v6626_v7 = vcombine.low %v179_v18, %v183_v6  ;;  %v6936_v6 = vcombine.low %v490_v32, %v494_v38 }
 0x188   :  { %3421 = vmatprep.subr.bf16.mxu0 %v6953_v2  ;;  %v6937_v2 = vcombine.high %v490_v32, %v494_v38 }
 0x18a   :  { %v2855_v54 = vpop.f32.mrf.mxu0 }
 0x18b   :  { %v2856_v14 = vadd.f32 %v2855_v54, %v8224_v13  ;;  %3422 = vmatpush2.bf16.msra.mxu0 %v6952_v28  ;;  %v8326_v54 = vld [vmem:[#allocation2 + $0x138] sm:$0xff]  ;;  %v8328_v13 = vld [vmem:[#allocation2 + $0xb10] sm:$0xff] }
 0x18c   :  { %6972 = vmatmul.mubr.msk.bf16.vlgmr.msra.gmra.mxu1 %vm2662_vm0, %v8101_v48  ;;  %v2857_v55 = vpop.f32.mrf.mxu0  ;;  %3423 = vmatprep.subr.bf16.mxu0 %v6945_v4  ;;  %v6619_v48 = vcombine.high %v171_v50, %v175_v46  ;;  %v8339_v28 = vld [vmem:[#allocation2 + $0xf8] sm:$0xff]  ;;  %v8343_v4 = vld [vmem:[#allocation2 + $0xaf0] sm:$0xff]  ;;  %v6928_v38 = vcombine.low %v8328_v13, %v8330_v5 }
 0x18d   :  { %3552 = vmatpush1.bf16.msra.mxu1 %v6634_v27  ;;  %v2929_v62 = vadd.f32 %v8283_v26, %v2856_v14  ;;  %v2858_v41 = vadd.f32 %v2857_v55, %v8227_v30  ;;  %3520 = vmatprep.mubr.bf16.mxu1 %v9208_v43  ;;  %v6618_v26 = vcombine.low %v171_v50, %v175_v46  ;;  %v8341_v27 = vld [vmem:[#allocation2 + $0xad0] sm:$0xff] }
 0x18e   :  { %3553 = vmatprep.subr.bf16.mxu1 %v6627_v37  ;;  %v2859_v31 = vpop.f32.mrf.mxu0  ;;  %v2789_v37 = vadd.f32 %v8234_v22, %v2716_v11  ;;  %v6610_v50 = vcombine.low %v8320_v3, %v8326_v54  ;;  %v8355_v22 = vpop.f32.mrf.mxu1  ;;  %v6603_v11 = vcombine.high %v8333_v36, %v8339_v28 }
 0x18f   :  { %v8336_v18 = vadd.f32 %v8286_v19, %v2858_v41  ;;  %v2860_v30 = vadd.f32 %v2859_v31, %v8232_v10  ;;  %3424 = vmatpush2.bf16.msra.mxu0 %v6944_v56  ;;  %v3907_v14 = vmul.f32 0.2, %v2929_v62  ;;  %v6611_v41 = vcombine.high %v8320_v3, %v8326_v54  ;;  %v8368_v54 = vld [vmem:[#allocation2 + $0xb8] sm:$0xff] }
 0x190   :  { %v2861_v55 = vpop.f32.mrf.mxu0  ;;  %3425 = vmatprep.subr.bf16.mxu0 %v6937_v2  ;;  %v6929_v10 = vcombine.high %v8328_v13, %v8330_v5  ;;  %vm3843_vm1 = vcmp.gt.f32.partialorder %v2929_v62, 0.0  ;;  %v6602_v56 = vcombine.low %v8333_v36, %v8339_v28  ;;  %v8366_v2 = vld [vmem:[#allocation2 + $0x98] sm:$0xff]  ;;  %v2726_v13 = vadd.f32 %v8243_v15, %v8221_v0 }
 0x191   :  { %3554 = vmatpush1.bf16.msra.mxu1 %v6626_v7  ;;  %v2933_v46 = vadd.f32 %v8291_v52, %v2860_v30  ;;  %v2862_v19 = vadd.f32 %v2861_v55, %v2789_v37  ;;  %v6921_v52 = vcombine.high %v8341_v27, %v8343_v4  ;;  %v6920_v7 = vcombine.low %v8341_v27, %v8343_v4  ;;  %v8379_v27 = vld [vmem:[#allocation2 + $0xab0] sm:$0xff] }
 0x192   :  { %3555 = vmatprep.subr.bf16.mxu1 %v6619_v48  ;;  %v2865_v32 = vpop.f32.mrf.mxu0  ;;  %v3971_v5 = vsel %vm3843_vm1, %v2929_v62, %v3907_v14  ;;  %v3908_v31 = vmul.f32 0.2, %v8336_v18  ;;  %vm3844_vm3 = vcmp.gt.f32.partialorder %v8336_v18, 0.0  ;;  %v8385_v62 = vpop.f32.mrf.mxu1  ;;  %v6595_v55 = vcombine.high %v8366_v2, %v8368_v54 }
 0x193   :  { %vm3851_vm2 = vcmp.gt.f32.partialorder %v2933_v46, 0.0  ;;  %v3915_v48 = vmul.f32 0.2, %v2933_v46  ;;  %v2866_v3 = vadd.f32 %v2865_v32, %v8237_v42  ;;  %3426 = vmatpush2.bf16.msra.mxu0 %v6936_v6  ;;  %v2935_v42 = vadd.f32 %v8294_v59, %v2862_v19  ;;  %v8377_v6 = vld [vmem:[#allocation2 + $0xa90] sm:$0xff] }
 0x194   :  { %6973 = vmatmul.mubr.msk.bf16.gmra.mxu1 %vm2662_vm0, %v8110_v23  ;;  %v2867_v30 = vpop.f32.mrf.mxu0  ;;  %3427 = vmatprep.subr.bf16.mxu0 %v6929_v10  ;;  %v8392_v10 = vld [vmem:[#allocation2 + $0x58] sm:$0xff]  ;;  %v6913_v19 = vcombine.high %v8377_v6, %v8379_v27  ;;  %v8402_v32 = vld [vmem:[#allocation2 + $0xa50] sm:$0xff] }
 0x195   :  { %3556 = vmatpush1.bf16.msra.mxu1 %v6618_v26  ;;  %v3979_v4 = vsel %vm3851_vm2, %v2933_v46, %v3915_v48  ;;  %v2939_v37 = vadd.f32 %v8299_v29, %v2866_v3  ;;  %v2868_v15 = vadd.f32 %v2867_v30, %v8240_v34  ;;  %3530 = vmatprep.mubr.bf16.mxu1 %v9208_v43  ;;  %vm3852_vm4 = vcmp.gt.f32.partialorder %v2935_v42, 0.0  ;;  %v8394_v46 = vld [vmem:[#allocation2 + $0x78] sm:$0xff]  ;;  %v8404_v48 = vld [vmem:[#allocation2 + $0xa70] sm:$0xff] }
 0x196   :  { %3557 = vmatprep.subr.bf16.mxu1 %v6611_v41  ;;  %v8388_v59 = vpack.c.bf16 %v3979_v4, %v3971_v5  ;;  %v3916_v26 = vmul.f32 0.2, %v2935_v42  ;;  %v2869_v14 = vpop.f32.mrf.mxu0  ;;  %v6594_v41 = vcombine.low %v8366_v2, %v8368_v54  ;;  %v2799_v3 = vadd.f32 %v8247_v24, %v2726_v13  ;;  %v8412_v2 = vpop.f32.mrf.mxu1 }
 0x197   :  { %v2941_v29 = vadd.f32 %v8301_v1, %v2868_v15  ;;  %v2870_v34 = vadd.f32 %v2869_v14, %v8245_v25  ;;  %3428 = vmatpush2.bf16.msra.mxu0 %v6928_v38  ;;  %v3972_v5 = vsel %vm3844_vm3, %v8336_v18, %v3908_v31  ;;  %v6912_v54 = vcombine.low %v8377_v6, %v8379_v27 }
 0x198   :  { %v3980_v1 = vsel %vm3852_vm4, %v2935_v42, %v3916_v26  ;;  %v2871_v25 = vpop.f32.mrf.mxu0  ;;  %3429 = vmatprep.subr.bf16.mxu0 %v6921_v52  ;;  %v6586_v30 = vcombine.low %v8392_v10, %v8394_v46  ;;  %v6587_v24 = vcombine.high %v8392_v10, %v8394_v46  ;;  %v3923_v13 = vmul.f32 0.2, %v2939_v37  ;;  %v8425_v42 = vld [vmem:[#allocation2 + $0x38] sm:$0xff] }
 0x199   :  { %3558 = vmatpush1.bf16.msra.mxu1 %v6610_v50  ;;  %v8410_v38 = vpack.c.bf16 %v3980_v1, %v3972_v5  ;;  %v2943_v18 = vadd.f32 %v8306_v20, %v2870_v34  ;;  %v2872_v50 = vadd.f32 %v2871_v25, %v2799_v3  ;;  %v6905_v52 = vcombine.high %v8402_v32, %v8404_v48  ;;  %v8432_v20 = vld [vmem:[#allocation2 + $0xa10] sm:$0xff]  ;;  %v8450_v3 = vld [vmem:[#allocation2 + $0x3f8] sm:$0xff] }
 0x19a   :  { %3559 = vmatprep.subr.bf16.mxu1 %v6603_v11  ;;  %v2875_v31 = vpop.f32.mrf.mxu0  ;;  %v8423_v11 = vld [vmem:[#allocation2 + $0x18] sm:$0xff]  ;;  %v2736_v6 = vadd.f32 %v8256_v17, %v8221_v0  ;;  %vm3859_vm5 = vcmp.gt.f32.partialorder %v2939_v37, 0.0  ;;  %v6904_v4 = vcombine.low %v8402_v32, %v8404_v48  ;;  %v3924_v15 = vmul.f32 0.2, %v2941_v29  ;;  %v2958_v32 = vpop.f32.mrf.mxu1 }
 0x19b   :  { %v2876_v27 = vadd.f32 %v2875_v31, %v8250_v60  ;;  %3430 = vmatpush2.bf16.msra.mxu0 %v6920_v7  ;;  %vm3867_vm6 = vcmp.gt.f32.partialorder %v2943_v18, 0.0  ;;  %v3931_v26 = vmul.f32 0.2, %v2943_v18  ;;  %v2945_v14 = vadd.f32 %v8313_v58, %v2872_v50  ;;  %v8440_v60 = vld [vmem:[#allocation2 + $0xa30] sm:$0xff]  ;;  %v8462_v50 = vld [vmem:[#allocation2 + $0x5f8] sm:$0xff] }
 0x19c   :  { %6974 = vmatmul.mubr.msk.bf16.gmra.mxu1 %vm2662_vm0, %v8117_v12  ;;  %v2877_v17 = vpop.f32.mrf.mxu0  ;;  %3431 = vmatprep.subr.bf16.mxu0 %v6913_v19  ;;  %vm3860_vm7 = vcmp.gt.f32.partialorder %v2941_v29, 0.0  ;;  %v6579_v48 = vcombine.high %v8423_v11, %v8425_v42  ;;  %v3987_v58 = vsel %vm3859_vm5, %v2939_v37, %v3923_v13  ;;  %v8448_v19 = vld [vmem:[#allocation2 + $0x3d8] sm:$0xff]  ;;  %v6897_v5 = vcombine.high %v8432_v20, %v8440_v60  ;;  %v2960_v31 = vpop.f32.mrf.mxu1 }
 0x19d   :  { %3560 = vmatpush1.bf16.msra.mxu1 %v6602_v56  ;;  %v2949_v7 = vadd.f32 %v8324_v63, %v2876_v27  ;;  %v2878_v34 = vadd.f32 %v2877_v17, %v8253_v51  ;;  %3540 = vmatprep.mubr.bf16.mxu1 %v9208_v43  ;;  %v3995_v36 = vsel %vm3867_vm6, %v2943_v18, %v3931_v26  ;;  %vm3868_vm8 = vcmp.gt.f32.partialorder %v2945_v14, 0.0  ;;  %v8460_v18 = vld [vmem:[#allocation2 + $0x5d8] sm:$0xff] }
 0x19e   :  { %3561 = vmatprep.subr.bf16.mxu1 %v6595_v55  ;;  %v3932_v28 = vmul.f32 0.2, %v2945_v14  ;;  %v2879_v56 = vpop.f32.mrf.mxu0  ;;  %v2809_v63 = vadd.f32 %v8260_v8, %v2736_v6  ;;  %v8453_v51 = vpack.c.bf16 %v3995_v36, %v3987_v58  ;;  %v3988_v37 = vsel %vm3860_vm7, %v2941_v29, %v3924_v15 }
 0x19f   :  { %v2951_v55 = vadd.f32 %v8355_v22, %v2878_v34  ;;  %3432 = vmatpush2.bf16.msra.mxu0 %v6912_v54  ;;  %v2880_v25 = vadd.f32 %v2879_v56, %v8258_v9  ;;  %v6578_v22 = vcombine.low %v8423_v11, %v8425_v42  ;;  %v6896_v29 = vcombine.low %v8432_v20, %v8440_v60  ;;  %v8480_v20 = vld [vmem:[#allocation2 + $0x598] sm:$0xff] }
 0x1a0   :  { %v3996_v1 = vsel %vm3868_vm8, %v2945_v14, %v3932_v28  ;;  %v2881_v13 = vpop.f32.mrf.mxu0  ;;  %3433 = vmatprep.subr.bf16.mxu0 %v6905_v52  ;;  %v3939_v9 = vmul.f32 0.2, %v2949_v7  ;;  %v6698_v27 = vcombine.low %v8448_v19, %v8450_v3  ;;  %vm3875_vm9 = vcmp.gt.f32.partialorder %v2949_v7, 0.0  ;;  %v247_v34 = vld [vmem:[#allocation2 + $0x3b8] sm:$0xff] }
 0x1a1   :  { %3562 = vmatpush1.bf16.msra.mxu1 %v6594_v41  ;;  %v8464_v8 = vpack.c.bf16 %v3996_v1, %v3988_v37  ;;  %v6699_v41 = vcombine.high %v8448_v19, %v8450_v3  ;;  %v2953_v54 = vadd.f32 %v8385_v62, %v2880_v25  ;;  %v2882_v52 = vadd.f32 %v2881_v13, %v2809_v63  ;;  %v299_v56 = vld [vmem:[#allocation2 + $0x558] sm:$0xff] }
 0x1a2   :  { %3563 = vmatprep.subr.bf16.mxu1 %v6587_v24  ;;  %v2885_v6 = vpop.f32.mrf.mxu0  ;;  %v2746_v24 = vadd.f32 %v8309_v16, %v8221_v0  ;;  %v6763_v42 = vcombine.high %v8460_v18, %v8462_v50  ;;  %v3940_v62 = vmul.f32 0.2, %v2951_v55  ;;  %vm3876_vm11 = vcmp.gt.f32.partialorder %v2951_v55, 0.0  ;;  %v2962_v16 = vpop.f32.mrf.mxu1  ;;  %v303_v63 = vld [vmem:[#allocation2 + $0x578] sm:$0xff] }
 0x1a3   :  { %v2886_v11 = vadd.f32 %v2885_v6, %v8263_v44  ;;  %3434 = vmatpush2.bf16.msra.mxu0 %v6904_v4  ;;  %vm3883_vm10 = vcmp.gt.f32.partialorder %v2953_v54, 0.0  ;;  %v3947_v15 = vmul.f32 0.2, %v2953_v54  ;;  %v2955_v26 = vadd.f32 %v8412_v2, %v2882_v52  ;;  %v8488_v44 = vld [vmem:[#allocation2 + $0x5b8] sm:$0xff] }
 0x1a4   :  { %6975 = vmatmul.mubr.msk.bf16.gmra.mxu1 %vm2662_vm0, %v8124_v39  ;;  %v2887_v0 = vpop.f32.mrf.mxu0  ;;  %3435 = vmatprep.subr.bf16.mxu0 %v6897_v5  ;;  %v6762_v17 = vcombine.low %v8460_v18, %v8462_v50  ;;  %v4003_v2 = vsel %vm3875_vm9, %v2949_v7, %v3939_v9  ;;  %v2819_v58 = vadd.f32 %v8278_v21, %v2746_v24  ;;  %v2964_v21 = vpop.f32.mrf.mxu1  ;;  %v9209_v18 = vld [vmem:[#allocation34_spill] sm:$0xff] }
 0x1a5   :  { %3564 = vmatpush1.bf16.msra.mxu1 %v6586_v30  ;;  %v2959_v4 = vadd.f32 %v2958_v32, %v2886_v11  ;;  %v2888_v14 = vadd.f32 %v2887_v0, %v8266_v47  ;;  %3583 = vmatprep.mubr.bf16.mxu1 %v8009_v35  ;;  %v4011_v60 = vsel %vm3883_vm10, %v2953_v54, %v3947_v15  ;;  %vm3884_vm12 = vcmp.gt.f32.partialorder %v2955_v26, 0.0  ;;  %v243_v30 = vld [vmem:[#allocation2 + $0x398] sm:$0xff] }
 0x1a6   :  { %3565 = vmatprep.subr.bf16.mxu1 %v6579_v48  ;;  %v3948_v10 = vmul.f32 0.2, %v2955_v26  ;;  %v2889_v46 = vpop.f32.mrf.mxu0  ;;  %v8496_v36 = vpack.c.bf16 %v4011_v60, %v4003_v2  ;;  %v6755_v47 = vcombine.high %v8480_v20, %v8488_v44  ;;  %v4004_v48 = vsel %vm3876_vm11, %v2951_v55, %v3940_v62  ;;  %v235_v50 = vld [vmem:[#allocation2 + $0x358] sm:$0xff] }
 0x1a7   :  { %v2961_v32 = vadd.f32 %v2960_v31, %v2888_v14  ;;  %3436 = vmatpush2.bf16.msra.mxu0 %v6896_v29  ;;  %v2890_v7 = vadd.f32 %v2889_v46, %v8273_v33  ;;  %v6691_v37 = vcombine.high %v243_v30, %v247_v34  ;;  %v3955_v1 = vmul.f32 0.2, %v2959_v4  ;;  %v239_v55 = vld [vmem:[#allocation2 + $0x378] sm:$0xff]  ;;  %v9210_v29 = vld [vmem:[#allocation35_spill] sm:$0xff]  ;;  %v9213_v46 = vld [vmem:[#allocation36_spill] sm:$0xff] }
 0x1a8   :  { %v4012_v35 = vsel %vm3884_vm12, %v2955_v26, %v3948_v10  ;;  %v2891_v28 = vpop.f32.mrf.mxu0  ;;  %3624 = vmatprep.subr.bf16.mxu0 %v6763_v42  ;;  %vm3891_vm13 = vcmp.gt.f32.partialorder %v2959_v4, 0.0  ;;  %v6690_v33 = vcombine.low %v243_v30, %v247_v34  ;;  %v6747_v9 = vcombine.high %v299_v56, %v303_v63  ;;  %v291_v24 = vld [vmem:[#allocation2 + $0x518] sm:$0xff] }
 0x1a9   :  { %3566 = vmatpush1.bf16.msra.mxu1 %v6578_v22  ;;  %v8502_v5 = vpack.c.bf16 %v4012_v35, %v4004_v48  ;;  %v2963_v25 = vadd.f32 %v2962_v16, %v2890_v7  ;;  %v2892_v13 = vadd.f32 %v2891_v28, %v2819_v58  ;;  %v6754_v22 = vcombine.low %v8480_v20, %v8488_v44  ;;  %v295_v11 = vld [vmem:[#allocation2 + $0x538] sm:$0xff] }
 0x1aa   :  { %3567 = vmatprep.subr.bf16.mxu1 %v6699_v41  ;;  %3438 = vmatmul.mubr.bf16.vlgmr.msra.gmra.mxu0 %v9209_v18  ;;  %v3956_v41 = vmul.f32 0.2, %v2961_v32  ;;  %vm3892_vm15 = vcmp.gt.f32.partialorder %v2961_v32, 0.0  ;;  %v6683_v6 = vcombine.high %v235_v50, %v239_v55  ;;  %v4019_v42 = vsel %vm3891_vm13, %v2959_v4, %v3955_v1  ;;  %v227_v26 = vld [vmem:[#allocation2 + $0x318] sm:$0xff] }
 0x1ab   :  { %3625 = vmatpush1.bf16.msra.mxu0 %v6762_v17  ;;  %3447 = vmatprep.mubr.bf16.mxu0 %v9210_v29  ;;  %vm3899_vm14 = vcmp.gt.f32.partialorder %v2963_v25, 0.0  ;;  %v3963_v54 = vmul.f32 0.2, %v2963_v25  ;;  %v2965_v52 = vadd.f32 %v2964_v21, %v2892_v13  ;;  %v231_v0 = vld [vmem:[#allocation2 + $0x338] sm:$0xff]  ;;  %v6682_v19 = vcombine.low %v235_v50, %v239_v55 }
 0x1ac   :  { %v8505_v31 = vpop.f32.mrf.mxu1  ;;  %3626 = vmatprep.subr.bf16.mxu0 %v6755_v47  ;;  %v6746_v3 = vcombine.low %v299_v56, %v303_v63  ;;  %v6739_v14 = vcombine.high %v291_v24, %v295_v11  ;;  %v6675_v4 = vcombine.high %v227_v26, %v231_v0  ;;  %v283_v2 = vld [vmem:[#allocation2 + $0x4d8] sm:$0xff]  ;;  %v6738_v58 = vcombine.low %v291_v24, %v295_v11 }
 0x1ad   :  { %3568 = vmatpush2.bf16.msra.mxu1 %v6698_v27  ;;  %v4027_v20 = vsel %vm3899_vm14, %v2963_v25, %v3963_v54  ;;  %vm3900_vm1 = vcmp.gt.f32.partialorder %v2965_v52, 0.0  ;;  %v3964_v62 = vmul.f32 0.2, %v2965_v52  ;;  %v4020_v27 = vsel %vm3892_vm15, %v2961_v32, %v3956_v41  ;;  %v287_v60 = vld [vmem:[#allocation2 + $0x4f8] sm:$0xff] }
 0x1ae   :  { %3569 = vmatprep.subr.bf16.mxu1 %v6691_v37  ;;  %v8514_v15 = vpop.f32.mrf.mxu1  ;;  %v8516_v44 = vpack.c.bf16 %v4027_v20, %v4019_v42  ;;  %v219_v30 = vld [vmem:[#allocation2 + $0x2d8] sm:$0xff]  ;;  %v6674_v32 = vcombine.low %v227_v26, %v231_v0  ;;  %v6731_v48 = vcombine.high %v283_v2, %v287_v60  ;;  %v6730_v37 = vcombine.low %v283_v2, %v287_v60 }
 0x1af   :  { %3627 = vmatpush1.bf16.msra.mxu0 %v6754_v22  ;;  %v4028_v16 = vsel %vm3900_vm1, %v2965_v52, %v3964_v62  ;;  %v223_v34 = vld [vmem:[#allocation2 + $0x2f8] sm:$0xff]  ;;  %v9216_v52 = vld [vmem:[#allocation39_spill] sm:$0xff] }
 0x1b0   :  { %9211 = vst [vmem:[#allocation34_spill] sm:$0xff] %v8516_v44  ;;  %3628 = vmatprep.subr.bf16.mxu0 %v6747_v9  ;;  %v8519_v17 = vpack.c.bf16 %v4028_v16, %v4020_v27  ;;  %v8521_v10 = vpop.f32.mrf.mxu1  ;;  %v9214_v47 = vld [vmem:[#allocation37_spill] sm:$0xff]  ;;  %v6667_v35 = vcombine.high %v219_v30, %v223_v34  ;;  %v6666_v1 = vcombine.low %v219_v30, %v223_v34  ;;  %v9215_v22 = vld [vmem:[#allocation38_spill] sm:$0xff]  ;;  %v9219_v34 = vld [vmem:[#allocation40_spill] sm:$0xff] }
 0x1b1   :  { %3570 = vmatpush2.bf16.msra.mxu1 %v6690_v33  ;;  %v275_v7 = vld [vmem:[#allocation2 + $0x498] sm:$0xff] }
 0x1b2   :  { %9212 = vst [vmem:[#allocation35_spill] sm:$0xff] %v8519_v17  ;;  %3571 = vmatprep.subr.bf16.mxu1 %v6683_v6  ;;  %3448 = vmatmul.mubr.bf16.gmra.mxu0 %v9213_v46  ;;  %v279_v28 = vld [vmem:[#allocation2 + $0x4b8] sm:$0xff]  ;;  %v8525_v56 = vpop.f32.mrf.mxu1 }
 0x1b3   :  { %3629 = vmatpush1.bf16.msra.mxu0 %v6746_v3  ;;  %3457 = vmatprep.mubr.bf16.mxu0 %v9214_v47  ;;  %v211_v63 = vld [vmem:[#allocation2 + $0x298] sm:$0xff]  ;;  %v6723_v25 = vcombine.high %v275_v7, %v279_v28  ;;  %v6722_v54 = vcombine.low %v275_v7, %v279_v28  ;;  %v9221_v7 = vld [vmem:[#allocation23_spill] sm:$0xff] }
 0x1b4   :  { %3630 = vmatprep.subr.bf16.mxu0 %v6739_v14  ;;  %v215_v21 = vld [vmem:[#allocation2 + $0x2b8] sm:$0xff]  ;;  %v8527_v13 = vpop.f32.mrf.mxu1 }
 0x1b5   :  { %3572 = vmatpush2.bf16.msra.mxu1 %v6682_v19  ;;  %v6659_v50 = vcombine.high %v211_v63, %v215_v21  ;;  %v267_v55 = vld [vmem:[#allocation2 + $0x458] sm:$0xff]  ;;  %v6658_v6 = vcombine.low %v211_v63, %v215_v21 }
 0x1b6   :  { %3573 = vmatprep.subr.bf16.mxu1 %v6675_v4  ;;  %v271_v33 = vld [vmem:[#allocation2 + $0x478] sm:$0xff]  ;;  %v8531_v11 = vpop.f32.mrf.mxu1 }
 0x1b7   :  { %3631 = vmatpush1.bf16.msra.mxu0 %v6738_v58  ;;  %v203_v9 = vld [vmem:[#allocation2 + $0x258] sm:$0xff]  ;;  %v6715_v24 = vcombine.high %v267_v55, %v271_v33  ;;  %v6714_v19 = vcombine.low %v267_v55, %v271_v33 }
 0x1b8   :  { %3632 = vmatprep.subr.bf16.mxu0 %v6731_v48  ;;  %v207_v41 = vld [vmem:[#allocation2 + $0x278] sm:$0xff]  ;;  %v8533_v16 = vpop.f32.mrf.mxu1 }
 0x1b9   :  { %3574 = vmatpush2.bf16.msra.mxu1 %v6674_v32  ;;  %v6651_v42 = vcombine.high %v203_v9, %v207_v41  ;;  %v259_v20 = vld [vmem:[#allocation2 + $0x418] sm:$0xff]  ;;  %v6650_v3 = vcombine.low %v203_v9, %v207_v41 }
 0x1ba   :  { %3575 = vmatprep.subr.bf16.mxu1 %v6667_v35  ;;  %3458 = vmatmul.mubr.bf16.gmra.mxu0 %v9215_v22  ;;  %v263_v62 = vld [vmem:[#allocation2 + $0x438] sm:$0xff]  ;;  %v8543_v21 = vpop.f32.mrf.mxu1 }
 0x1bb   :  { %3633 = vmatpush1.bf16.msra.mxu0 %v6730_v37  ;;  %3467 = vmatprep.mubr.bf16.mxu0 %v9216_v52  ;;  %v195_v26 = vld [vmem:[#allocation2 + $0x218] sm:$0xff]  ;;  %v6707_v27 = vcombine.high %v259_v20, %v263_v62  ;;  %v6706_v35 = vcombine.low %v259_v20, %v263_v62  ;;  %v8545_v37 = vld [vmem:[#allocation6] sm:$0xff] }
 0x1bc   :  { %3634 = vmatprep.subr.bf16.mxu0 %v6723_v25  ;;  %v199_v0 = vld [vmem:[#allocation2 + $0x238] sm:$0xff] }
 0x1bd   :  { %3576 = vmatpush2.bf16.msra.mxu1 %v6666_v1  ;;  %v9217_v14 = vld [vmem:[#allocation41_spill] sm:$0xff]  ;;  %v6643_v2 = vcombine.high %v195_v26, %v199_v0  ;;  %v6642_v28 = vcombine.low %v195_v26, %v199_v0 }
 0x1be   :  { %3577 = vmatprep.subr.bf16.mxu1 %v6659_v50  ;;  %v8536_v4 = vsub.s32 2, %v9217_v14  ;;  %v379_v60 = vld [vmem:[#allocation2 + $0x7d8] sm:$0xff]  ;;  %v8540_v48 = vsub.s32 3, %v9217_v14 }
 0x1bf   :  { %3635 = vmatpush1.bf16.msra.mxu0 %v6722_v54  ;;  %v383_v30 = vld [vmem:[#allocation2 + $0x7f8] sm:$0xff] }
 0x1c0   :  { %3636 = vmatprep.subr.bf16.mxu0 %v6715_v24  ;;  %9218 = vst [vmem:[#allocation36_spill] sm:$0xff] %v8536_v4  ;;  %v443_v58 = vld [vmem:[#allocation2 + $0x9d8] sm:$0xff]  ;;  %9220 = vst [vmem:[#allocation37_spill] sm:$0xff] %v8540_v48  ;;  %v6827_v63 = vcombine.high %v379_v60, %v383_v30  ;;  %v8549_v1 = vrot.slane %v8545_v37, %v8536_v4  ;;  %v8553_v41 = vrot.slane %v8545_v37, %v8540_v48 }
 0x1c1   :  { %3578 = vmatpush2.bf16.msra.mxu1 %v6658_v6  ;;  %v447_v32 = vld [vmem:[#allocation2 + $0x9f8] sm:$0xff]  ;;  %v6826_v54 = vcombine.low %v379_v60, %v383_v30 }
 0x1c2   :  { %3579 = vmatprep.subr.bf16.mxu1 %v6651_v42  ;;  %3468 = vmatmul.mubr.bf16.gmra.mxu0 %v9219_v34  ;;  %v6891_v25 = vcombine.high %v443_v58, %v447_v32  ;;  %v371_v50 = vld [vmem:[#allocation2 + $0x798] sm:$0xff]  ;;  %v6890_v6 = vcombine.low %v443_v58, %v447_v32  ;;  %v8555_v42 = vpop.f32.mrf.mxu1  ;;  %v3002_v20 = vadd.f32 %v8505_v31, %v8549_v1 }
 0x1c3   :  { %3637 = vmatpush1.bf16.msra.mxu0 %v6714_v19  ;;  %3656 = vmatprep.mubr.bf16.mxu0 %v9221_v7  ;;  %v375_v55 = vld [vmem:[#allocation2 + $0x7b8] sm:$0xff]  ;;  %v3006_v7 = vadd.f32 %v8521_v10, %v8549_v1 }
 0x1c4   :  { %3638 = vmatprep.subr.bf16.mxu0 %v6707_v27  ;;  %v435_v33 = vld [vmem:[#allocation2 + $0x998] sm:$0xff]  ;;  %v6819_v24 = vcombine.high %v371_v50, %v375_v55  ;;  %v6818_v30 = vcombine.low %v371_v50, %v375_v55  ;;  %v3008_v55 = vadd.f32 %v8525_v56, %v8553_v41 }
 0x1c5   :  { %3580 = vmatpush2.bf16.msra.mxu1 %v6650_v3  ;;  %v439_v9 = vld [vmem:[#allocation2 + $0x9b8] sm:$0xff] }
 0x1c6   :  { %3581 = vmatprep.subr.bf16.mxu1 %v6643_v2  ;;  %v6883_v62 = vcombine.high %v435_v33, %v439_v9  ;;  %v363_v26 = vld [vmem:[#allocation2 + $0x758] sm:$0xff]  ;;  %v3004_v2 = vadd.f32 %v8514_v15, %v8553_v41  ;;  %v6882_v32 = vcombine.low %v435_v33, %v439_v9  ;;  %v3012_v33 = vadd.f32 %v8527_v13, %v8549_v1 }
 0x1c7   :  { %3639 = vmatpush1.bf16.msra.mxu0 %v6706_v35  ;;  %v367_v0 = vld [vmem:[#allocation2 + $0x778] sm:$0xff]  ;;  %v3023_v35 = vpop.f32.mrf.mxu1 }
 0x1c8   :  { %3640 = vmatprep.subr.bf16.mxu0 %v6827_v63  ;;  %v427_v3 = vld [vmem:[#allocation2 + $0x958] sm:$0xff]  ;;  %v6811_v31 = vcombine.high %v363_v26, %v367_v0  ;;  %v6810_v10 = vcombine.low %v363_v26, %v367_v0 }
 0x1c9   :  { %3582 = vmatpush2.bf16.msra.mxu1 %v6642_v28  ;;  %v431_v27 = vld [vmem:[#allocation2 + $0x978] sm:$0xff] }
 0x1ca   :  { %3697 = vmatprep.subr.bf16.mxu1 %v6891_v25  ;;  %v3074_v19 = vpop.f32.mrf.mxu0  ;;  %v6875_v63 = vcombine.high %v427_v3, %v431_v27  ;;  %v355_v15 = vld [vmem:[#allocation2 + $0x718] sm:$0xff] }
 0x1cb   :  { %v8562_v60 = vadd.f32 %v3074_v19, %v3002_v20  ;;  %3641 = vmatpush2.bf16.msra.mxu0 %v6826_v54  ;;  %v359_v25 = vld [vmem:[#allocation2 + $0x738] sm:$0xff] }
 0x1cc   :  { %3584 = vmatmul.mubr.bf16.vlgmr.msra.gmra.mxu1 %v8019_v61  ;;  %v3076_v58 = vpop.f32.mrf.mxu0  ;;  %3642 = vmatprep.subr.bf16.mxu0 %v6819_v24  ;;  %v419_v54 = vld [vmem:[#allocation2 + $0x918] sm:$0xff]  ;;  %v6874_v24 = vcombine.low %v427_v3, %v431_v27  ;;  %v6803_v20 = vcombine.high %v355_v15, %v359_v25  ;;  %v6802_v26 = vcombine.low %v355_v15, %v359_v25 }
 0x1cd   :  { %3698 = vmatpush1.bf16.msra.mxu1 %v6890_v6  ;;  %v8566_v28 = vadd.f32 %v3076_v58, %v3004_v2  ;;  %3593 = vmatprep.mubr.bf16.mxu1 %v8031_v40  ;;  %v423_v50 = vld [vmem:[#allocation2 + $0x938] sm:$0xff]  ;;  %v3014_v40 = vadd.f32 %v8531_v11, %v8553_v41 }
 0x1ce   :  { %3699 = vmatprep.subr.bf16.mxu1 %v6883_v62  ;;  %v3078_v61 = vpop.f32.mrf.mxu0  ;;  %v3025_v62 = vpop.f32.mrf.mxu1  ;;  %v6867_v56 = vcombine.high %v419_v54, %v423_v50  ;;  %v347_v2 = vld [vmem:[#allocation2 + $0x6d8] sm:$0xff]  ;;  %v6866_v3 = vcombine.low %v419_v54, %v423_v50  ;;  %v3018_v54 = vadd.f32 %v8543_v21, %v8553_v41  ;;  %v3022_v50 = vadd.f32 %v8555_v42, %v8549_v1 }
 0x1cf   :  { %v8573_v9 = vadd.f32 %v3078_v61, %v3006_v7  ;;  %3643 = vmatpush2.bf16.msra.mxu0 %v6818_v30  ;;  %v351_v58 = vld [vmem:[#allocation2 + $0x6f8] sm:$0xff] }
 0x1d0   :  { %v3080_v6 = vpop.f32.mrf.mxu0  ;;  %3644 = vmatprep.subr.bf16.mxu0 %v6811_v31  ;;  %v411_v7 = vld [vmem:[#allocation2 + $0x8d8] sm:$0xff]  ;;  %v6795_v11 = vcombine.high %v347_v2, %v351_v58  ;;  %v3027_v27 = vpop.f32.mrf.mxu1 }
 0x1d1   :  { %3700 = vmatpush1.bf16.msra.mxu1 %v6882_v32  ;;  %v8577_v19 = vadd.f32 %v3080_v6, %v3008_v55  ;;  %v415_v61 = vld [vmem:[#allocation2 + $0x8f8] sm:$0xff]  ;;  %v3016_v32 = vadd.f32 %v8533_v16, %v8549_v1  ;;  %v6794_v16 = vcombine.low %v347_v2, %v351_v58 }
 0x1d2   :  { %3701 = vmatprep.subr.bf16.mxu1 %v6875_v63  ;;  %v3084_v13 = vpop.f32.mrf.mxu0  ;;  %v6859_v63 = vcombine.high %v411_v7, %v415_v61  ;;  %v339_v55 = vld [vmem:[#allocation2 + $0x698] sm:$0xff] }
 0x1d3   :  { %v8579_v30 = vadd.f32 %v3084_v13, %v3012_v33  ;;  %3645 = vmatpush2.bf16.msra.mxu0 %v6810_v10  ;;  %v343_v33 = vld [vmem:[#allocation2 + $0x6b8] sm:$0xff] }
 0x1d4   :  { %3594 = vmatmul.mubr.bf16.gmra.mxu1 %v8045_v45  ;;  %v3086_v0 = vpop.f32.mrf.mxu0  ;;  %3646 = vmatprep.subr.bf16.mxu0 %v6803_v20  ;;  %v403_v25 = vld [vmem:[#allocation2 + $0x898] sm:$0xff]  ;;  %v3031_v20 = vpop.f32.mrf.mxu1  ;;  %v6786_v2 = vcombine.low %v339_v55, %v343_v33 }
 0x1d5   :  { %3702 = vmatpush1.bf16.msra.mxu1 %v6874_v24  ;;  %v8584_v31 = vadd.f32 %v3086_v0, %v3014_v40  ;;  %3603 = vmatprep.mubr.bf16.mxu1 %v8053_v49  ;;  %v407_v45 = vld [vmem:[#allocation2 + $0x8b8] sm:$0xff]  ;;  %v6858_v24 = vcombine.low %v411_v7, %v415_v61  ;;  %v6787_v40 = vcombine.high %v339_v55, %v343_v33 }
 0x1d6   :  { %3703 = vmatprep.subr.bf16.mxu1 %v6867_v56  ;;  %v3088_v15 = vpop.f32.mrf.mxu0  ;;  %v3024_v49 = vadd.f32 %v3023_v35, %v8553_v41  ;;  %v6851_v13 = vcombine.high %v403_v25, %v407_v45  ;;  %v331_v21 = vld [vmem:[#allocation2 + $0x658] sm:$0xff]  ;;  %v6850_v7 = vcombine.low %v403_v25, %v407_v45  ;;  %v3033_v35 = vpop.f32.mrf.mxu1  ;;  %v3032_v25 = vadd.f32 %v3031_v20, %v8549_v1 }
 0x1d7   :  { %v8591_v10 = vadd.f32 %v3088_v15, %v3016_v32  ;;  %3647 = vmatpush2.bf16.msra.mxu0 %v6802_v26  ;;  %v335_v0 = vld [vmem:[#allocation2 + $0x678] sm:$0xff]  ;;  %v3026_v26 = vadd.f32 %v3025_v62, %v8549_v1 }
 0x1d8   :  { %v3090_v6 = vpop.f32.mrf.mxu0  ;;  %3648 = vmatprep.subr.bf16.mxu0 %v6795_v11  ;;  %v395_v42 = vld [vmem:[#allocation2 + $0x858] sm:$0xff]  ;;  %v6779_v61 = vcombine.high %v331_v21, %v335_v0  ;;  %v3035_v62 = vpop.f32.mrf.mxu1 }
 0x1d9   :  { %3704 = vmatpush1.bf16.msra.mxu1 %v6866_v3  ;;  %v8594_v56 = vadd.f32 %v3090_v6, %v3018_v54  ;;  %v399_v32 = vld [vmem:[#allocation2 + $0x878] sm:$0xff] }
 0x1da   :  { %3705 = vmatprep.subr.bf16.mxu1 %v6859_v63  ;;  %v3094_v48 = vpop.f32.mrf.mxu0  ;;  %v6843_v11 = vcombine.high %v395_v42, %v399_v32  ;;  %v323_v63 = vld [vmem:[#allocation2 + $0x618] sm:$0xff]  ;;  %v6842_v6 = vcombine.low %v395_v42, %v399_v32  ;;  %v3037_v42 = vpop.f32.mrf.mxu1 }
 0x1db   :  { %v8596_v15 = vadd.f32 %v3094_v48, %v3022_v50  ;;  %3649 = vmatpush2.bf16.msra.mxu0 %v6794_v16  ;;  %v327_v54 = vld [vmem:[#allocation2 + $0x638] sm:$0xff]  ;;  %v6778_v50 = vcombine.low %v331_v21, %v335_v0 }
 0x1dc   :  { %3604 = vmatmul.mubr.bf16.gmra.mxu1 %v8065_v53  ;;  %v3096_v58 = vpop.f32.mrf.mxu0  ;;  %3650 = vmatprep.subr.bf16.mxu0 %v6787_v40  ;;  %v387_v55 = vld [vmem:[#allocation2 + $0x818] sm:$0xff]  ;;  %v3028_v53 = vadd.f32 %v3027_v27, %v8553_v41  ;;  %v3034_v40 = vadd.f32 %v3033_v35, %v8553_v41  ;;  %v6770_v21 = vcombine.low %v323_v63, %v327_v54 }
 0x1dd   :  { %3706 = vmatpush1.bf16.msra.mxu1 %v6858_v24  ;;  %v8600_v3 = vadd.f32 %v3096_v58, %v3024_v49  ;;  %3613 = vmatprep.mubr.bf16.mxu1 %v8073_v57  ;;  %v391_v33 = vld [vmem:[#allocation2 + $0x838] sm:$0xff]  ;;  %v6771_v24 = vcombine.high %v323_v63, %v327_v54  ;;  %v3036_v35 = vadd.f32 %v3035_v62, %v8549_v1 }
 0x1de   :  { %3707 = vmatprep.subr.bf16.mxu1 %v6851_v13  ;;  %v3098_v48 = vpop.f32.mrf.mxu0  ;;  %v6835_v49 = vcombine.high %v387_v55, %v391_v33  ;;  %v515_v13 = vld [vmem:[#allocation2 + $0xc18] sm:$0xff]  ;;  %v3038_v63 = vadd.f32 %v3037_v42, %v8553_v41 }
 0x1df   :  { %v8605_v45 = vadd.f32 %v3098_v48, %v3026_v26  ;;  %3651 = vmatpush2.bf16.msra.mxu0 %v6786_v2  ;;  %v519_v27 = vld [vmem:[#allocation2 + $0xc38] sm:$0xff]  ;;  %v6834_v2 = vcombine.low %v387_v55, %v391_v33 }
 0x1e0   :  { %v3100_v16 = vpop.f32.mrf.mxu0  ;;  %3652 = vmatprep.subr.bf16.mxu0 %v6779_v61  ;;  %v507_v20 = vld [vmem:[#allocation2 + $0xbd8] sm:$0xff] }
 0x1e1   :  { %3708 = vmatpush1.bf16.msra.mxu1 %v6850_v7  ;;  %v8608_v57 = vadd.f32 %v3100_v16, %v3028_v53  ;;  %v511_v26 = vld [vmem:[#allocation2 + $0xbf8] sm:$0xff]  ;;  %v6963_v7 = vcombine.high %v515_v13, %v519_v27  ;;  %v9223_v53 = vld [vmem:[#allocation32_spill] sm:$0xff] }
 0x1e2   :  { %3709 = vmatprep.subr.bf16.mxu1 %v6843_v11  ;;  %v3104_v58 = vpop.f32.mrf.mxu0  ;;  %v9222_v0 = vld [vmem:[#allocation30_spill] sm:$0xff]  ;;  %v6955_v11 = vcombine.high %v507_v20, %v511_v26  ;;  %v6954_v33 = vcombine.low %v507_v20, %v511_v26  ;;  %v9225_v41 = vld [vmem:[#allocation25_spill] sm:$0xff] }
 0x1e3   :  { %v8610_v48 = vadd.f32 %v3104_v58, %v3032_v25  ;;  %3653 = vmatpush2.bf16.msra.mxu0 %v6778_v50  ;;  %v499_v16 = vld [vmem:[#allocation2 + $0xb98] sm:$0xff] }
 0x1e4   :  { %3614 = vmatmul.mubr.bf16.gmra.mxu1 %v9222_v0  ;;  %v3106_v32 = vpop.f32.mrf.mxu0  ;;  %3654 = vmatprep.subr.bf16.mxu0 %v6771_v24  ;;  %v503_v50 = vld [vmem:[#allocation2 + $0xbb8] sm:$0xff]  ;;  %v9224_v24 = vld [vmem:[#allocation24_spill] sm:$0xff] }
 0x1e5   :  { %3710 = vmatpush1.bf16.msra.mxu1 %v6842_v6  ;;  %v8614_v61 = vadd.f32 %v3106_v32, %v3034_v40  ;;  %3729 = vmatprep.mubr.bf16.mxu1 %v9223_v53  ;;  %v6962_v6 = vcombine.low %v515_v13, %v519_v27  ;;  %v6947_v62 = vcombine.high %v499_v16, %v503_v50  ;;  %v495_v58 = vld [vmem:[#allocation2 + $0xb78] sm:$0xff] }
 0x1e6   :  { %3711 = vmatprep.subr.bf16.mxu1 %v6835_v49  ;;  %v3108_v25 = vpop.f32.mrf.mxu0  ;;  %v491_v49 = vld [vmem:[#allocation2 + $0xb58] sm:$0xff]  ;;  %v6946_v27 = vcombine.low %v499_v16, %v503_v50 }
 0x1e7   :  { %v8618_v54 = vadd.f32 %v3108_v25, %v3036_v35  ;;  %3655 = vmatpush2.bf16.msra.mxu0 %v6770_v21  ;;  %v6939_v26 = vcombine.high %v491_v49, %v495_v58  ;;  %v487_v35 = vld [vmem:[#allocation2 + $0xb38] sm:$0xff] }
 0x1e8   :  { %v3110_v55 = vpop.f32.mrf.mxu0  ;;  %3784 = vmatprep.subr.bf16.mxu0 %v6963_v7  ;;  %v483_v7 = vld [vmem:[#allocation2 + $0xb18] sm:$0xff] }
 0x1e9   :  { %3712 = vmatpush1.bf16.msra.mxu1 %v6834_v2  ;;  %v8620_v1 = vadd.f32 %v3110_v55, %v3038_v63  ;;  %v6931_v16 = vcombine.high %v483_v7, %v487_v35 }
 0x1ea   :  { %3713 = vmatprep.subr.bf16.mxu1 %v6955_v11  ;;  %3657 = vmatmul.mubr.bf16.vlgmr.msra.gmra.mxu0 %v9224_v24  ;;  %v3220_v40 = vpop.f32.mrf.mxu0  ;;  %v479_v24 = vld [vmem:[#allocation2 + $0xaf8] sm:$0xff] }
 0x1eb   :  { %3785 = vmatpush1.bf16.msra.mxu0 %v6962_v6  ;;  %3666 = vmatprep.mubr.bf16.mxu0 %v9225_v41  ;;  %v6938_v6 = vcombine.low %v491_v49, %v495_v58  ;;  %v9227_v41 = vld [vmem:[#allocation27_spill] sm:$0xff]  ;;  %v6930_v58 = vcombine.low %v483_v7, %v487_v35 }
 0x1ec   :  { %v3147_v0 = vpop.f32.mrf.mxu1  ;;  %v3222_v13 = vpop.f32.mrf.mxu0 }
 0x1ed   :  { %v3148_v21 = vadd.f32 %v3147_v0, %v8562_v60  ;;  %3714 = vmatpush2.bf16.msra.mxu1 %v6954_v33  ;;  %v9226_v33 = vld [vmem:[#allocation26_spill] sm:$0xff] }
 0x1ee   :  { %v3149_v20 = vpop.f32.mrf.mxu1  ;;  %3715 = vmatprep.subr.bf16.mxu1 %v6947_v62  ;;  %v3224_v2 = vpop.f32.mrf.mxu0 }
 0x1ef   :  { %v3221_v42 = vadd.f32 %v3220_v40, %v3148_v21  ;;  %v3150_v32 = vadd.f32 %v3149_v20, %v8566_v28  ;;  %v475_v28 = vld [vmem:[#allocation2 + $0xad8] sm:$0xff] }
 0x1f0   :  { %v3151_v11 = vpop.f32.mrf.mxu1  ;;  %v3226_v63 = vpop.f32.mrf.mxu0 }
 0x1f1   :  { %v3223_v53 = vadd.f32 %v3222_v13, %v3150_v32  ;;  %v3152_v25 = vadd.f32 %v3151_v11, %v8573_v9  ;;  %3716 = vmatpush2.bf16.msra.mxu1 %v6946_v27  ;;  %v3909_v60 = vmul.f32 0.2, %v3221_v42  ;;  %vm3845_vm2 = vcmp.gt.f32.partialorder %v3221_v42, 0.0 }
 0x1f2   :  { %v3153_v55 = vpop.f32.mrf.mxu1  ;;  %3717 = vmatprep.subr.bf16.mxu1 %v6939_v26  ;;  %3667 = vmatmul.mubr.bf16.gmra.mxu0 %v9226_v33  ;;  %v3230_v62 = vpop.f32.mrf.mxu0  ;;  %v6923_v32 = vcombine.high %v475_v28, %v479_v24  ;;  %v471_v33 = vld [vmem:[#allocation2 + $0xab8] sm:$0xff] }
 0x1f3   :  { %v3225_v50 = vadd.f32 %v3224_v2, %v3152_v25  ;;  %v3154_v40 = vadd.f32 %v3153_v55, %v8577_v19  ;;  %3676 = vmatprep.mubr.bf16.mxu0 %v9227_v41  ;;  %v3973_v13 = vsel %vm3845_vm2, %v3221_v42, %v3909_v60  ;;  %v3910_v27 = vmul.f32 0.2, %v3223_v53  ;;  %v467_v55 = vld [vmem:[#allocation2 + $0xa98] sm:$0xff] }
 0x1f4   :  { %v3157_v0 = vpop.f32.mrf.mxu1  ;;  %v3232_v21 = vpop.f32.mrf.mxu0  ;;  %vm3846_vm4 = vcmp.gt.f32.partialorder %v3223_v53, 0.0 }
 0x1f5   :  { %vm3853_vm3 = vcmp.gt.f32.partialorder %v3225_v50, 0.0  ;;  %v3917_v9 = vmul.f32 0.2, %v3225_v50  ;;  %v3158_v49 = vadd.f32 %v3157_v0, %v8579_v30  ;;  %3718 = vmatpush2.bf16.msra.mxu1 %v6938_v6  ;;  %v3227_v20 = vadd.f32 %v3226_v63, %v3154_v40  ;;  %v463_v40 = vld [vmem:[#allocation2 + $0xa78] sm:$0xff] }
 0x1f6   :  { %v3159_v26 = vpop.f32.mrf.mxu1  ;;  %3719 = vmatprep.subr.bf16.mxu1 %v6931_v16  ;;  %v3234_v25 = vpop.f32.mrf.mxu0  ;;  %v6922_v63 = vcombine.low %v475_v28, %v479_v24  ;;  %v3974_v60 = vsel %vm3846_vm4, %v3223_v53, %v3910_v27  ;;  %v9229_v28 = vld [vmem:[#allocation29_spill] sm:$0xff]  ;;  %v6914_v24 = vcombine.low %v467_v55, %v471_v33 }
 0x1f7   :  { %v3981_v2 = vsel %vm3853_vm3, %v3225_v50, %v3917_v9  ;;  %v3160_v19 = vadd.f32 %v3159_v26, %v8584_v31  ;;  %v3231_v11 = vadd.f32 %v3230_v62, %v3158_v49  ;;  %vm3854_vm5 = vcmp.gt.f32.partialorder %v3227_v20, 0.0  ;;  %v459_v62 = vld [vmem:[#allocation2 + $0xa58] sm:$0xff]  ;;  %v9228_v9 = vld [vmem:[#allocation28_spill] sm:$0xff] }
 0x1f8   :  { %v8632_v41 = vpack.c.bf16 %v3981_v2, %v3973_v13  ;;  %v3918_v30 = vmul.f32 0.2, %v3227_v20  ;;  %v3161_v7 = vpop.f32.mrf.mxu1  ;;  %v3236_v6 = vpop.f32.mrf.mxu0  ;;  %v6915_v31 = vcombine.high %v467_v55, %v471_v33  ;;  %v451_v26 = vld [vmem:[#allocation2 + $0xa18] sm:$0xff] }
 0x1f9   :  { %v3162_v42 = vadd.f32 %v3161_v7, %v8591_v10  ;;  %v3233_v35 = vadd.f32 %v3232_v21, %v3160_v19  ;;  %3720 = vmatpush2.bf16.msra.mxu1 %v6930_v58  ;;  %v3925_v13 = vmul.f32 0.2, %v3231_v11  ;;  %vm3861_vm6 = vcmp.gt.f32.partialorder %v3231_v11, 0.0  ;;  %v455_v7 = vld [vmem:[#allocation2 + $0xa38] sm:$0xff] }
 0x1fa   :  { %v3982_v16 = vsel %vm3854_vm5, %v3227_v20, %v3918_v30  ;;  %v3163_v50 = vpop.f32.mrf.mxu1  ;;  %3721 = vmatprep.subr.bf16.mxu1 %v6923_v32  ;;  %3677 = vmatmul.mubr.bf16.gmra.mxu0 %v9228_v9  ;;  %v3240_v49 = vpop.f32.mrf.mxu0  ;;  %v6907_v20 = vcombine.high %v459_v62, %v463_v40 }
 0x1fb   :  { %v8636_v0 = vpack.c.bf16 %v3982_v16, %v3974_v60  ;;  %v3164_v10 = vadd.f32 %v3163_v50, %v8594_v56  ;;  %v3235_v21 = vadd.f32 %v3234_v25, %v3162_v42  ;;  %3686 = vmatprep.mubr.bf16.mxu0 %v9229_v28  ;;  %v3926_v32 = vmul.f32 0.2, %v3233_v35 }
 0x1fc   :  { %v3167_v58 = vpop.f32.mrf.mxu1  ;;  %v3242_v27 = vpop.f32.mrf.mxu0  ;;  %vm3862_vm8 = vcmp.gt.f32.partialorder %v3233_v35, 0.0  ;;  %v3989_v60 = vsel %vm3861_vm6, %v3231_v11, %v3925_v13 }
 0x1fd   :  { %v3168_v53 = vadd.f32 %v3167_v58, %v8596_v15  ;;  %3722 = vmatpush2.bf16.msra.mxu1 %v6922_v63  ;;  %vm3869_vm7 = vcmp.gt.f32.partialorder %v3235_v21, 0.0  ;;  %v3933_v2 = vmul.f32 0.2, %v3235_v21  ;;  %v3237_v19 = vadd.f32 %v3236_v6, %v3164_v10 }
 0x1fe   :  { %v3169_v30 = vpop.f32.mrf.mxu1  ;;  %3723 = vmatprep.subr.bf16.mxu1 %v6915_v31  ;;  %v3244_v42 = vpop.f32.mrf.mxu0  ;;  %v6906_v6 = vcombine.low %v459_v62, %v463_v40  ;;  %v6899_v31 = vcombine.high %v451_v26, %v455_v7  ;;  %v3990_v9 = vsel %vm3862_vm8, %v3233_v35, %v3926_v32  ;;  %v6898_v62 = vcombine.low %v451_v26, %v455_v7 }
 0x1ff   :  { %v3170_v56 = vadd.f32 %v3169_v30, %v8600_v3  ;;  %v3241_v25 = vadd.f32 %v3240_v49, %v3168_v53  ;;  %v3997_v15 = vsel %vm3869_vm7, %v3235_v21, %v3933_v2  ;;  %vm3870_vm9 = vcmp.gt.f32.partialorder %v3237_v19, 0.0  ;;  %v9230_v21 = vld [vmem:[#allocation31_spill] sm:$0xff] }
 0x200   :  { %v3934_v55 = vmul.f32 0.2, %v3237_v19  ;;  %v3171_v33 = vpop.f32.mrf.mxu1  ;;  %v8644_v63 = vpack.c.bf16 %v3997_v15, %v3989_v60  ;;  %v3246_v50 = vpop.f32.mrf.mxu0 }
 0x201   :  { %v3172_v16 = vadd.f32 %v3171_v33, %v8605_v45  ;;  %3724 = vmatpush2.bf16.msra.mxu1 %v6914_v24  ;;  %v3941_v58 = vmul.f32 0.2, %v3241_v25  ;;  %v3243_v3 = vadd.f32 %v3242_v27, %v3170_v56  ;;  %vm3877_vm10 = vcmp.gt.f32.partialorder %v3241_v25, 0.0 }
 0x202   :  { %v3998_v10 = vsel %vm3870_vm9, %v3237_v19, %v3934_v55  ;;  %v3173_v49 = vpop.f32.mrf.mxu1  ;;  %3725 = vmatprep.subr.bf16.mxu1 %v6907_v20  ;;  %3687 = vmatmul.mubr.bf16.gmra.mxu0 %v9230_v21  ;;  %v3250_v53 = vpop.f32.mrf.mxu0 }
 0x203   :  { %v8647_v28 = vpack.c.bf16 %v3998_v10, %v3990_v9  ;;  %v3174_v11 = vadd.f32 %v3173_v49, %v8608_v57  ;;  %v3245_v13 = vadd.f32 %v3244_v42, %v3172_v16  ;;  %v3942_v45 = vmul.f32 0.2, %v3243_v3  ;;  %3802 = vmatprep.mubr.bf16.mxu0 %v9208_v43 }
 0x204   :  { %v3177_v24 = vpop.f32.mrf.mxu1  ;;  %v3252_v20 = vpop.f32.mrf.mxu0  ;;  %v4005_v32 = vsel %vm3877_vm10, %v3241_v25, %v3941_v58  ;;  %vm3878_vm12 = vcmp.gt.f32.partialorder %v3243_v3, 0.0 }
 0x205   :  { %vm3885_vm11 = vcmp.gt.f32.partialorder %v3245_v13, 0.0  ;;  %v3949_v35 = vmul.f32 0.2, %v3245_v13  ;;  %v3178_v40 = vadd.f32 %v3177_v24, %v8610_v48  ;;  %v3247_v27 = vadd.f32 %v3246_v50, %v3174_v11  ;;  %3726 = vmatpush2.bf16.msra.mxu1 %v6906_v6 }
 0x206   :  { %v3179_v2 = vpop.f32.mrf.mxu1  ;;  %3727 = vmatprep.subr.bf16.mxu1 %v6899_v31  ;;  %v3254_v56 = vpop.f32.mrf.mxu0  ;;  %v4006_v60 = vsel %vm3878_vm12, %v3243_v3, %v3942_v45 }
 0x207   :  { %v4013_v57 = vsel %vm3885_vm11, %v3245_v13, %v3949_v35  ;;  %vm3886_vm13 = vcmp.gt.f32.partialorder %v3247_v27, 0.0  ;;  %v3950_v19 = vmul.f32 0.2, %v3247_v27  ;;  %v3180_v30 = vadd.f32 %v3179_v2, %v8614_v61  ;;  %v9231_v61 = vld [vmem:[#allocation33_spill] sm:$0xff] }
 0x208   :  { %v8654_v26 = vpack.c.bf16 %v4013_v57, %v4005_v32  ;;  %v3251_v7 = vadd.f32 %v3250_v53, %v3178_v40  ;;  %v3181_v42 = vpop.f32.mrf.mxu1  ;;  %v3256_v16 = vpop.f32.mrf.mxu0 }
 0x209   :  { %v4014_v15 = vsel %vm3886_vm13, %v3247_v27, %v3950_v19  ;;  %v3182_v48 = vadd.f32 %v3181_v42, %v8618_v54  ;;  %v3253_v55 = vadd.f32 %v3252_v20, %v3180_v30  ;;  %3728 = vmatpush2.bf16.msra.mxu1 %v6898_v62 }
 0x20a   :  { %v8657_v25 = vpack.c.bf16 %v4014_v15, %v4006_v60  ;;  %v3183_v33 = vpop.f32.mrf.mxu1  ;;  %v3957_v6 = vmul.f32 0.2, %v3251_v7  ;;  %6976 = vmatmul.mubr.msk.bf16.vlgmr.msra.gmra.mxu0 %vm2662_vm0, %v9231_v61  ;;  %vm3893_vm14 = vcmp.gt.f32.partialorder %v3251_v7, 0.0 }
 0x20b   :  { %v3184_v50 = vadd.f32 %v3183_v33, %v8620_v1  ;;  %v3255_v31 = vadd.f32 %v3254_v56, %v3182_v48  ;;  %3812 = vmatprep.mubr.bf16.mxu0 %v9208_v43  ;;  %v3958_v9 = vmul.f32 0.2, %v3253_v55  ;;  %vm3894_vm1 = vcmp.gt.f32.partialorder %v3253_v55, 0.0 }
 0x20c   :  { %3730 = vmatmul.mubr.bf16.vlgmr.msra.gmra.mxu1 %v9209_v18  ;;  %v4021_v58 = vsel %vm3893_vm14, %v3251_v7, %v3957_v6  ;;  %v544_v18 = vsub.s32 5, %v9217_v14 }
 0x20d   :  { %vm3901_vm15 = vcmp.gt.f32.partialorder %v3255_v31, 0.0  ;;  %v3965_v54 = vmul.f32 0.2, %v3255_v31  ;;  %v3257_v10 = vadd.f32 %v3256_v16, %v3184_v50  ;;  %3739 = vmatprep.mubr.bf16.mxu1 %v9210_v29  ;;  %v4022_v11 = vsel %vm3894_vm1, %v3253_v55, %v3958_v9 }
 0x20f   :  { %v4029_v3 = vsel %vm3901_vm15, %v3255_v31, %v3965_v54  ;;  %vm3902_vm2 = vcmp.gt.f32.partialorder %v3257_v10, 0.0  ;;  %v3966_v1 = vmul.f32 0.2, %v3257_v10 }
 0x210   :  { %v8665_v49 = vpack.c.bf16 %v4029_v3, %v4021_v58 }
 0x211   :  { %v4030_v13 = vsel %vm3902_vm2, %v3257_v10, %v3966_v1 }
 0x212   :  { %9232 = vst [vmem:[#allocation38_spill] sm:$0xff] %v8665_v49  ;;  %v8667_v21 = vpack.c.bf16 %v4030_v13, %v4022_v11  ;;  %6977 = vmatmul.mubr.msk.bf16.gmra.mxu0 %vm2662_vm0, %v8110_v23  ;;  %v540_v23 = vsub.s32 4, %v9217_v14 }
 0x213   :  { %3822 = vmatprep.mubr.bf16.mxu0 %v9208_v43 }
 0x214   :  { %9233 = vst [vmem:[#allocation39_spill] sm:$0xff] %v8667_v21  ;;  %3740 = vmatmul.mubr.bf16.gmra.mxu1 %v9213_v46  ;;  %v541_v29 = vrot.slane %v8545_v37, %v540_v23  ;;  %v545_v46 = vrot.slane %v8545_v37, %v544_v18 }
 0x215   :  { %3749 = vmatprep.mubr.bf16.mxu1 %v9214_v47 }
 0x21a   :  { %6978 = vmatmul.mubr.msk.bf16.gmra.mxu0 %vm2662_vm0, %v8117_v12 }
 0x21b   :  { %3832 = vmatprep.mubr.bf16.mxu0 %v9208_v43 }
 0x21c   :  { %3750 = vmatmul.mubr.bf16.gmra.mxu1 %v9215_v22 }
 0x21d   :  { %3759 = vmatprep.mubr.bf16.mxu1 %v9216_v52 }
 0x222   :  { %6979 = vmatmul.mubr.msk.bf16.gmra.mxu0 %vm2662_vm0, %v8124_v39 }
 0x224   :  { %3760 = vmatmul.mubr.bf16.gmra.mxu1 %v9219_v34 }
 0x22a   :  { %v3293_v12 = vpop.f32.mrf.mxu0 }
 0x22b   :  { %v3294_v47 = vadd.f32 %v3293_v12, %v541_v29 }
 0x22c   :  { %v3366_v22 = vpop.f32.mrf.mxu1  ;;  %v3295_v53 = vpop.f32.mrf.mxu0 }
 0x22d   :  { %v8686_v43 = vadd.f32 %v3366_v22, %v3294_v47  ;;  %v3296_v52 = vadd.f32 %v3295_v53, %v545_v46 }
 0x22e   :  { %v3368_v45 = vpop.f32.mrf.mxu1  ;;  %v3297_v24 = vpop.f32.mrf.mxu0 }
 0x22f   :  { %v8688_v39 = vadd.f32 %v3368_v45, %v3296_v52  ;;  %v3298_v34 = vadd.f32 %v3297_v24, %v541_v29 }
 0x230   :  { %v3370_v62 = vpop.f32.mrf.mxu1  ;;  %v3299_v35 = vpop.f32.mrf.mxu0 }
 0x231   :  { %v8690_v40 = vadd.f32 %v3370_v62, %v3298_v34  ;;  %v3300_v27 = vadd.f32 %v3299_v35, %v545_v46 }
 0x232   :  { %v3372_v20 = vpop.f32.mrf.mxu1  ;;  %v3303_v32 = vpop.f32.mrf.mxu0 }
 0x233   :  { %v8692_v37 = vadd.f32 %v3372_v20, %v3300_v27  ;;  %v3304_v2 = vadd.f32 %v3303_v32, %v541_v29 }
 0x234   :  { %v3376_v57 = vpop.f32.mrf.mxu1  ;;  %v3305_v19 = vpop.f32.mrf.mxu0 }
 0x235   :  { %v8694_v30 = vadd.f32 %v3376_v57, %v3304_v2  ;;  %v3306_v56 = vadd.f32 %v3305_v19, %v545_v46 }
 0x236   :  { %v3378_v7 = vpop.f32.mrf.mxu1  ;;  %v3307_v42 = vpop.f32.mrf.mxu0 }
 0x237   :  { %v8696_v60 = vadd.f32 %v3378_v7, %v3306_v56  ;;  %v3308_v15 = vadd.f32 %v3307_v42, %v541_v29 }
 0x238   :  { %v3380_v48 = vpop.f32.mrf.mxu1  ;;  %v3309_v55 = vpop.f32.mrf.mxu0 }
 0x239   :  { %v8698_v33 = vadd.f32 %v3380_v48, %v3308_v15  ;;  %v3310_v16 = vadd.f32 %v3309_v55, %v545_v46 }
 0x23a   :  { %v3382_v6 = vpop.f32.mrf.mxu1  ;;  %v3313_v50 = vpop.f32.mrf.mxu0 }
 0x23b   :  { %v8700_v31 = vadd.f32 %v3382_v6, %v3310_v16  ;;  %v3314_v61 = vadd.f32 %v3313_v50, %v541_v29 }
 0x23c   :  { %v3386_v9 = vpop.f32.mrf.mxu1  ;;  %v3315_v54 = vpop.f32.mrf.mxu0 }
 0x23d   :  { %v8702_v10 = vadd.f32 %v3386_v9, %v3314_v61  ;;  %v3316_v58 = vadd.f32 %v3315_v54, %v545_v46 }
 0x23e   :  { %v3388_v3 = vpop.f32.mrf.mxu1  ;;  %v3317_v1 = vpop.f32.mrf.mxu0 }
 0x23f   :  { %v8704_v11 = vadd.f32 %v3388_v3, %v3316_v58  ;;  %v3318_v13 = vadd.f32 %v3317_v1, %v541_v29 }
 0x240   :  { %v3390_v23 = vpop.f32.mrf.mxu1  ;;  %v3319_v18 = vpop.f32.mrf.mxu0 }
 0x241   :  { %v8706_v12 = vadd.f32 %v3390_v23, %v3318_v13  ;;  %v3320_v47 = vadd.f32 %v3319_v18, %v545_v46 }
 0x242   :  { %v3392_v22 = vpop.f32.mrf.mxu1  ;;  %v3323_v53 = vpop.f32.mrf.mxu0 }
 0x243   :  { %v8708_v52 = vadd.f32 %v3392_v22, %v3320_v47  ;;  %v3324_v45 = vadd.f32 %v3323_v53, %v541_v29 }
 0x244   :  { %v3396_v24 = vpop.f32.mrf.mxu1  ;;  %v3325_v34 = vpop.f32.mrf.mxu0 }
 0x245   :  { %v8710_v62 = vadd.f32 %v3396_v24, %v3324_v45  ;;  %v3326_v35 = vadd.f32 %v3325_v34, %v545_v46 }
 0x246   :  { %v3398_v27 = vpop.f32.mrf.mxu1  ;;  %v3327_v20 = vpop.f32.mrf.mxu0 }
 0x247   :  { %v8712_v32 = vadd.f32 %v3398_v27, %v3326_v35  ;;  %v3328_v2 = vadd.f32 %v3327_v20, %v541_v29 }
 0x248   :  { %v3400_v57 = vpop.f32.mrf.mxu1  ;;  %v3329_v19 = vpop.f32.mrf.mxu0 }
 0x249   :  { %v8714_v56 = vadd.f32 %v3400_v57, %v3328_v2  ;;  %v3330_v7 = vadd.f32 %v3329_v19, %v545_v46 }
 0x24a   :  { %v3402_v42 = vpop.f32.mrf.mxu1 }
 0x24b   :  { %v8716_v15 = vadd.f32 %v3402_v42, %v3330_v7 }
 0x24c   :  { %v3512_v48 = vpop.f32.mrf.mxu1 }
 0x24e   :  { %v3514_v55 = vpop.f32.mrf.mxu1 }
 0x250   :  { %v3516_v16 = vpop.f32.mrf.mxu1 }
 0x252   :  { %v3518_v6 = vpop.f32.mrf.mxu1 }
 0x254   :  { %v3522_v50 = vpop.f32.mrf.mxu1 }
 0x256   :  { %v3524_v61 = vpop.f32.mrf.mxu1 }
 0x258   :  { %v3526_v9 = vpop.f32.mrf.mxu1 }
 0x25a   :  { %v3528_v3 = vpop.f32.mrf.mxu1 }
 0x25c   :  { %v3532_v47 = vpop.f32.mrf.mxu1 }
 0x25e   :  { %v3534_v27 = vpop.f32.mrf.mxu1 }
 0x26a   :  { %v3439_v54 = vpop.f32.mrf.mxu0 }
 0x26b   :  { %v3440_v58 = vadd.f32 %v3439_v54, %v8686_v43  ;;  %v3536_v54 = vpop.f32.mrf.mxu1 }
 0x26c   :  { %v3441_v29 = vpop.f32.mrf.mxu0 }
 0x26d   :  { %v3513_v1 = vadd.f32 %v3512_v48, %v3440_v58  ;;  %v3442_v13 = vadd.f32 %v3441_v29, %v8688_v39 }
 0x26e   :  { %v3443_v23 = vpop.f32.mrf.mxu0 }
 0x26f   :  { %v3515_v46 = vadd.f32 %v3514_v55, %v3442_v13  ;;  %v3444_v18 = vadd.f32 %v3443_v23, %v8690_v40  ;;  %v3911_v22 = vmul.f32 0.2, %v3513_v1  ;;  %vm3847_vm0 = vcmp.gt.f32.partialorder %v3513_v1, 0.0 }
 0x270   :  { %v3445_v53 = vpop.f32.mrf.mxu0 }
 0x271   :  { %v3517_v45 = vadd.f32 %v3516_v16, %v3444_v18  ;;  %v3446_v24 = vadd.f32 %v3445_v53, %v8692_v37  ;;  %v3975_v20 = vsel %vm3847_vm0, %v3513_v1, %v3911_v22  ;;  %v3912_v2 = vmul.f32 0.2, %v3515_v46  ;;  %v3538_v18 = vpop.f32.mrf.mxu1 }
 0x272   :  { %v3449_v34 = vpop.f32.mrf.mxu0  ;;  %vm3848_vm4 = vcmp.gt.f32.partialorder %v3515_v46, 0.0 }
 0x273   :  { %vm3855_vm3 = vcmp.gt.f32.partialorder %v3517_v45, 0.0  ;;  %v3919_v35 = vmul.f32 0.2, %v3517_v45  ;;  %v3450_v43 = vadd.f32 %v3449_v34, %v8694_v30  ;;  %v3519_v39 = vadd.f32 %v3518_v6, %v3446_v24 }
 0x274   :  { %v3451_v57 = vpop.f32.mrf.mxu0  ;;  %v3976_v30 = vsel %vm3848_vm4, %v3515_v46, %v3912_v2 }
 0x275   :  { %v3983_v19 = vsel %vm3855_vm3, %v3517_v45, %v3919_v35  ;;  %v3523_v40 = vadd.f32 %v3522_v50, %v3450_v43  ;;  %v3452_v7 = vadd.f32 %v3451_v57, %v8696_v60  ;;  %vm3856_vm5 = vcmp.gt.f32.partialorder %v3519_v39, 0.0 }
 0x276   :  { %v8724_v42 = vpack.c.bf16 %v3983_v19, %v3975_v20  ;;  %v3920_v48 = vmul.f32 0.2, %v3519_v39  ;;  %v3453_v37 = vpop.f32.mrf.mxu0  ;;  %v3542_v20 = vpop.f32.mrf.mxu1 }
 0x277   :  { %v3525_v55 = vadd.f32 %v3524_v61, %v3452_v7  ;;  %v3454_v16 = vadd.f32 %v3453_v37, %v8698_v33  ;;  %v3927_v6 = vmul.f32 0.2, %v3523_v40  ;;  %vm3863_vm6 = vcmp.gt.f32.partialorder %v3523_v40, 0.0 }
 0x278   :  { %9234 = vst [vmem:[#allocation41_spill] sm:$0xff] %v8724_v42  ;;  %v3984_v58 = vsel %vm3856_vm5, %v3519_v39, %v3920_v48  ;;  %v3455_v29 = vpop.f32.mrf.mxu0  ;;  %v3544_v7 = vpop.f32.mrf.mxu1 }
 0x279   :  { %v8727_v1 = vpack.c.bf16 %v3984_v58, %v3976_v30  ;;  %v3527_v13 = vadd.f32 %v3526_v9, %v3454_v16  ;;  %v3456_v50 = vadd.f32 %v3455_v29, %v8700_v31  ;;  %v3928_v22 = vmul.f32 0.2, %v3525_v55 }
 0x27a   :  { %v3459_v23 = vpop.f32.mrf.mxu0  ;;  %vm3864_vm8 = vcmp.gt.f32.partialorder %v3525_v55, 0.0  ;;  %v3991_v24 = vsel %vm3863_vm6, %v3523_v40, %v3927_v6 }
 0x27b   :  { %9235 = vst [vmem:[#allocation40_spill] sm:$0xff] %v8727_v1  ;;  %v3460_v60 = vadd.f32 %v3459_v23, %v8702_v10  ;;  %vm3871_vm7 = vcmp.gt.f32.partialorder %v3527_v13, 0.0  ;;  %v3935_v61 = vmul.f32 0.2, %v3527_v13  ;;  %v3529_v53 = vadd.f32 %v3528_v3, %v3456_v50 }
 0x27c   :  { %v3461_v33 = vpop.f32.mrf.mxu0  ;;  %v3992_v10 = vsel %vm3864_vm8, %v3525_v55, %v3928_v22 }
 0x27d   :  { %v3533_v46 = vadd.f32 %v3532_v47, %v3460_v60  ;;  %v3462_v45 = vadd.f32 %v3461_v33, %v8704_v11  ;;  %v3999_v34 = vsel %vm3871_vm7, %v3527_v13, %v3935_v61  ;;  %vm3872_vm9 = vcmp.gt.f32.partialorder %v3529_v53, 0.0  ;;  %v3546_v13 = vpop.f32.mrf.mxu1 }
 0x27e   :  { %v3936_v9 = vmul.f32 0.2, %v3529_v53  ;;  %v3463_v35 = vpop.f32.mrf.mxu0  ;;  %v8732_v31 = vpack.c.bf16 %v3999_v34, %v3991_v24 }
 0x27f   :  { %v3535_v43 = vadd.f32 %v3534_v27, %v3462_v45  ;;  %v3464_v39 = vadd.f32 %v3463_v35, %v8706_v12  ;;  %v3943_v19 = vmul.f32 0.2, %v3533_v46  ;;  %vm3879_vm10 = vcmp.gt.f32.partialorder %v3533_v46, 0.0  ;;  %v3548_v33 = vpop.f32.mrf.mxu1 }
 0x280   :  { %9236 = vst [vmem:[#allocation23_spill] sm:$0xff] %v8732_v31  ;;  %v4000_v2 = vsel %vm3872_vm9, %v3529_v53, %v3936_v9  ;;  %v3465_v57 = vpop.f32.mrf.mxu0 }
 0x281   :  { %v8735_v3 = vpack.c.bf16 %v4000_v2, %v3992_v10  ;;  %v3537_v47 = vadd.f32 %v3536_v54, %v3464_v39  ;;  %v3466_v11 = vadd.f32 %v3465_v57, %v8708_v52  ;;  %v3944_v37 = vmul.f32 0.2, %v3535_v43 }
 0x282   :  { %v3469_v40 = vpop.f32.mrf.mxu0  ;;  %vm3880_vm12 = vcmp.gt.f32.partialorder %v3535_v43, 0.0  ;;  %v4007_v58 = vsel %vm3879_vm10, %v3533_v46, %v3943_v19 }
 0x283   :  { %9237 = vst [vmem:[#allocation30_spill] sm:$0xff] %v8735_v3  ;;  %v3470_v48 = vadd.f32 %v3469_v40, %v8710_v62  ;;  %vm3887_vm11 = vcmp.gt.f32.partialorder %v3537_v47, 0.0  ;;  %v3951_v27 = vmul.f32 0.2, %v3537_v47  ;;  %v3539_v16 = vadd.f32 %v3538_v18, %v3466_v11 }
 0x284   :  { %v3471_v55 = vpop.f32.mrf.mxu0  ;;  %v4008_v23 = vsel %vm3880_vm12, %v3535_v43, %v3944_v37 }
 0x285   :  { %v3543_v30 = vadd.f32 %v3542_v20, %v3470_v48  ;;  %v3472_v12 = vadd.f32 %v3471_v55, %v8712_v32  ;;  %v4015_v29 = vsel %vm3887_vm11, %v3537_v47, %v3951_v27  ;;  %vm3888_vm13 = vcmp.gt.f32.partialorder %v3539_v16, 0.0 }
 0x286   :  { %v3952_v54 = vmul.f32 0.2, %v3539_v16  ;;  %v3473_v6 = vpop.f32.mrf.mxu0  ;;  %v8740_v52 = vpack.c.bf16 %v4015_v29, %v4007_v58 }
 0x287   :  { %v3545_v50 = vadd.f32 %v3544_v7, %v3472_v12  ;;  %v3474_v60 = vadd.f32 %v3473_v6, %v8714_v56  ;;  %v3959_v61 = vmul.f32 0.2, %v3543_v30  ;;  %vm3895_vm14 = vcmp.gt.f32.partialorder %v3543_v30, 0.0 }
 0x288   :  { %9238 = vst [vmem:[#allocation32_spill] sm:$0xff] %v8740_v52  ;;  %v4016_v62 = vsel %vm3888_vm13, %v3539_v16, %v3952_v54  ;;  %v3475_v22 = vpop.f32.mrf.mxu0 }
 0x289   :  { %v8743_v18 = vpack.c.bf16 %v4016_v62, %v4008_v23  ;;  %v3547_v53 = vadd.f32 %v3546_v13, %v3474_v60  ;;  %v3476_v32 = vadd.f32 %v3475_v22, %v8716_v15  ;;  %v3960_v46 = vmul.f32 0.2, %v3545_v50 }
 0x28a   :  { %vm3896_vm1 = vcmp.gt.f32.partialorder %v3545_v50, 0.0  ;;  %v4023_v34 = vsel %vm3895_vm14, %v3543_v30, %v3959_v61  ;;  %v548_v60 = vsub.s32 6, %v9217_v14 }
 0x28b   :  { %9239 = vst [vmem:[#allocation24_spill] sm:$0xff] %v8743_v18  ;;  %vm3903_vm15 = vcmp.gt.f32.partialorder %v3547_v53, 0.0  ;;  %v3967_v45 = vmul.f32 0.2, %v3547_v53  ;;  %v3549_v24 = vadd.f32 %v3548_v33, %v3476_v32  ;;  %v4024_v20 = vsel %vm3896_vm1, %v3545_v50, %v3960_v46  ;;  %v7254_v33 = vld [vmem:[#allocation6] sm:$0xff] }
 0x28c   :  { %v3585_v56 = vpop.f32.mrf.mxu1  ;;  %v8776_v46 = vrot.slane %v7254_v33, %v548_v60 }
 0x28d   :  { %v4031_v9 = vsel %vm3903_vm15, %v3547_v53, %v3967_v45  ;;  %vm3904_vm2 = vcmp.gt.f32.partialorder %v3549_v24, 0.0  ;;  %v3968_v35 = vmul.f32 0.2, %v3549_v24  ;;  %v552_v53 = vsub.s32 7, %v9217_v14 }
 0x28e   :  { %v8746_v43 = vpack.c.bf16 %v4031_v9, %v4023_v34  ;;  %v3587_v39 = vpop.f32.mrf.mxu1 }
 0x28f   :  { %v4032_v10 = vsel %vm3904_vm2, %v3549_v24, %v3968_v35  ;;  %v8782_v34 = vrot.slane %v7254_v33, %v552_v53  ;;  %v3586_v35 = vadd.f32 %v3585_v56, %v8776_v46 }
 0x290   :  { %9240 = vst [vmem:[#allocation25_spill] sm:$0xff] %v8746_v43  ;;  %v8748_v2 = vpack.c.bf16 %v4032_v10, %v4024_v20  ;;  %v3589_v15 = vpop.f32.mrf.mxu1 }
 0x291   :  { %v3588_v14 = vadd.f32 %v3587_v39, %v8782_v34 }
 0x292   :  { %9241 = vst [vmem:[#allocation26_spill] sm:$0xff] %v8748_v2  ;;  %v3591_v57 = vpop.f32.mrf.mxu1  ;;  %v3590_v2 = vadd.f32 %v3589_v15, %v8776_v46 }
 0x293   :  { %v3592_v49 = vadd.f32 %v3591_v57, %v8782_v34 }
 0x294   :  { %v3595_v19 = vpop.f32.mrf.mxu1 }
 0x295   :  { %v3596_v33 = vadd.f32 %v3595_v19, %v8776_v46 }
 0x296   :  { %v3597_v47 = vpop.f32.mrf.mxu1 }
 0x297   :  { %v3598_v39 = vadd.f32 %v3597_v47, %v8782_v34 }
 0x298   :  { %v3599_v11 = vpop.f32.mrf.mxu1 }
 0x299   :  { %v3600_v19 = vadd.f32 %v3599_v11, %v8776_v46 }
 0x29a   :  { %v3601_v40 = vpop.f32.mrf.mxu1 }
 0x29c   :  { %v8750_v37 = vpop.f32.mrf.mxu1 }
 0x29e   :  { %v8752_v55 = vpop.f32.mrf.mxu1 }
 0x2a0   :  { %v8754_v58 = vpop.f32.mrf.mxu1 }
 0x2a2   :  { %v8758_v6 = vpop.f32.mrf.mxu1 }
 0x2a4   :  { %v8764_v23 = vpop.f32.mrf.mxu1 }
 0x2a6   :  { %v8771_v61 = vpop.f32.mrf.mxu1 }
 0x2a8   :  { %v8780_v24 = vpop.f32.mrf.mxu1 }
 0x2aa   :  { %v3658_v7 = vpop.f32.mrf.mxu0  ;;  %v8789_v10 = vpop.f32.mrf.mxu1 }
 0x2ab   :  { %v3659_v4 = vadd.f32 %v3658_v7, %v3586_v35 }
 0x2ac   :  { %v3660_v48 = vpop.f32.mrf.mxu0 }
 0x2ad   :  { %v3661_v52 = vadd.f32 %v3660_v48, %v3588_v14 }
 0x2ae   :  { %v3662_v27 = vpop.f32.mrf.mxu0 }
 0x2af   :  { %v3663_v3 = vadd.f32 %v3662_v27, %v3590_v2 }
 0x2b0   :  { %v3664_v16 = vpop.f32.mrf.mxu0 }
 0x2b1   :  { %v3665_v21 = vadd.f32 %v3664_v16, %v3592_v49  ;;  %v3606_v49 = vadd.f32 %v8750_v37, %v8776_v46 }
 0x2b2   :  { %v3668_v30 = vpop.f32.mrf.mxu0 }
 0x2b3   :  { %v3669_v48 = vadd.f32 %v3668_v30, %v3596_v33 }
 0x2b4   :  { %v3670_v12 = vpop.f32.mrf.mxu0 }
 0x2b5   :  { %v3671_v2 = vadd.f32 %v3670_v12, %v3598_v39 }
 0x2b6   :  { %v3672_v29 = vpop.f32.mrf.mxu0 }
 0x2b8   :  { %v8756_v54 = vpop.f32.mrf.mxu0 }
 0x2ba   :  { %v8760_v13 = vpop.f32.mrf.mxu0 }
 0x2bc   :  { %v8762_v50 = vpop.f32.mrf.mxu0 }
 0x2be   :  { %v8766_v62 = vpop.f32.mrf.mxu0 }
 0x2c0   :  { %v8769_v22 = vpop.f32.mrf.mxu0 }
 0x2c2   :  { %v8774_v32 = vpop.f32.mrf.mxu0 }
 0x2c4   :  { %v8778_v45 = vpop.f32.mrf.mxu0 }
 0x2c6   :  { %v8784_v9 = vpop.f32.mrf.mxu0 }
 0x2c8   :  { %v8787_v20 = vpop.f32.mrf.mxu0 }
 0x2ca   :  { %v3804_v43 = vpop.f32.mrf.mxu0 }
 0x2cc   :  { %v3731_v60 = vpop.f32.mrf.mxu1  ;;  %v3806_v31 = vpop.f32.mrf.mxu0 }
 0x2cd   :  { %v3732_v18 = vadd.f32 %v3731_v60, %v3659_v4 }
 0x2ce   :  { %v3733_v53 = vpop.f32.mrf.mxu1  ;;  %v3808_v1 = vpop.f32.mrf.mxu0 }
 0x2cf   :  { %v3805_v42 = vadd.f32 %v3804_v43, %v3732_v18  ;;  %v3734_v56 = vadd.f32 %v3733_v53, %v3661_v52  ;;  %v3602_v18 = vadd.f32 %v3601_v40, %v8782_v34 }
 0x2d0   :  { %v3735_v44 = vpop.f32.mrf.mxu1  ;;  %v3810_v35 = vpop.f32.mrf.mxu0 }
 0x2d1   :  { %v3736_v7 = vadd.f32 %v3735_v44, %v3663_v3  ;;  %v3807_v17 = vadd.f32 %v3806_v31, %v3734_v56  ;;  %v3913_v4 = vmul.f32 0.2, %v3805_v42  ;;  %vm3849_vm0 = vcmp.gt.f32.partialorder %v3805_v42, 0.0 }
 0x2d2   :  { %v3737_v15 = vpop.f32.mrf.mxu1  ;;  %v3814_v60 = vpop.f32.mrf.mxu0  ;;  %v3673_v31 = vadd.f32 %v3672_v29, %v3600_v19  ;;  %v3608_v56 = vadd.f32 %v8752_v55, %v8782_v34  ;;  %v3675_v29 = vadd.f32 %v8756_v54, %v3602_v18  ;;  %v3612_v19 = vadd.f32 %v8758_v6, %v8782_v34 }
 0x2d3   :  { %v3809_v14 = vadd.f32 %v3808_v1, %v3736_v7  ;;  %v3738_v52 = vadd.f32 %v3737_v15, %v3665_v21  ;;  %v3914_v3 = vmul.f32 0.2, %v3807_v17  ;;  %v3977_v16 = vsel %vm3849_vm0, %v3805_v42, %v3913_v4 }
 0x2d4   :  { %v3741_v43 = vpop.f32.mrf.mxu1  ;;  %v3816_v44 = vpop.f32.mrf.mxu0  ;;  %vm3850_vm4 = vcmp.gt.f32.partialorder %v3807_v17, 0.0  ;;  %v3679_v4 = vadd.f32 %v8760_v13, %v3606_v49  ;;  %v3681_v54 = vadd.f32 %v8762_v50, %v3608_v56  ;;  %v3618_v50 = vadd.f32 %v8771_v61, %v8782_v34 }
 0x2d5   :  { %vm3857_vm3 = vcmp.gt.f32.partialorder %v3809_v14, 0.0  ;;  %v3921_v57 = vmul.f32 0.2, %v3809_v14  ;;  %v3742_v47 = vadd.f32 %v3741_v43, %v3669_v48  ;;  %v3811_v27 = vadd.f32 %v3810_v35, %v3738_v52 }
 0x2d6   :  { %v3743_v1 = vpop.f32.mrf.mxu1  ;;  %v3818_v40 = vpop.f32.mrf.mxu0  ;;  %v3978_v7 = vsel %vm3850_vm4, %v3807_v17, %v3914_v3  ;;  %v3610_v48 = vadd.f32 %v8754_v58, %v8776_v46  ;;  %v3616_v17 = vadd.f32 %v8764_v23, %v8776_v46 }
 0x2d7   :  { %v3985_v11 = vsel %vm3857_vm3, %v3809_v14, %v3921_v57  ;;  %v3744_v30 = vadd.f32 %v3743_v1, %v3671_v2  ;;  %vm3858_vm5 = vcmp.gt.f32.partialorder %v3811_v27, 0.0  ;;  %v3922_v21 = vmul.f32 0.2, %v3811_v27 }
 0x2d8   :  { %v8800_v53 = vpack.c.bf16 %v3985_v11, %v3977_v16  ;;  %v3815_v12 = vadd.f32 %v3814_v60, %v3742_v47  ;;  %v3745_v33 = vpop.f32.mrf.mxu1  ;;  %v3820_v37 = vpop.f32.mrf.mxu0  ;;  %v3683_v49 = vadd.f32 %v8766_v62, %v3610_v48  ;;  %v3685_v11 = vadd.f32 %v8769_v22, %v3612_v19 }
 0x2d9   :  { %v3746_v39 = vadd.f32 %v3745_v33, %v3673_v31  ;;  %v3986_v35 = vsel %vm3858_vm5, %v3811_v27, %v3922_v21  ;;  %v3817_v42 = vadd.f32 %v3816_v44, %v3744_v30  ;;  %v3620_v22 = vadd.f32 %v8780_v24, %v8776_v46 }
 0x2da   :  { %v3747_v15 = vpop.f32.mrf.mxu1  ;;  %v8808_v14 = vpack.c.bf16 %v3986_v35, %v3978_v7  ;;  %v3824_v60 = vpop.f32.mrf.mxu0  ;;  %v3929_v55 = vmul.f32 0.2, %v3815_v12  ;;  %vm3865_vm6 = vcmp.gt.f32.partialorder %v3815_v12, 0.0  ;;  %v3691_v48 = vadd.f32 %v8778_v45, %v3618_v50 }
 0x2db   :  { %v3819_v52 = vadd.f32 %v3818_v40, %v3746_v39  ;;  %v3748_v43 = vadd.f32 %v3747_v15, %v3675_v29  ;;  %v3930_v57 = vmul.f32 0.2, %v3817_v42  ;;  %vm3866_vm8 = vcmp.gt.f32.partialorder %v3817_v42, 0.0 }
 0x2dc   :  { %v3751_v2 = vpop.f32.mrf.mxu1  ;;  %v3826_v58 = vpop.f32.mrf.mxu0  ;;  %v3993_v27 = vsel %vm3865_vm6, %v3815_v12, %v3929_v55 }
 0x2dd   :  { %v3752_v18 = vadd.f32 %v3751_v2, %v3679_v4  ;;  %vm3873_vm7 = vcmp.gt.f32.partialorder %v3819_v52, 0.0  ;;  %v3937_v13 = vmul.f32 0.2, %v3819_v52  ;;  %v3821_v47 = vadd.f32 %v3820_v37, %v3748_v43 }
 0x2de   :  { %v3753_v44 = vpop.f32.mrf.mxu1  ;;  %v3828_v3 = vpop.f32.mrf.mxu0  ;;  %v3994_v21 = vsel %vm3866_vm8, %v3817_v42, %v3930_v57  ;;  %v3689_v37 = vadd.f32 %v8774_v32, %v3616_v17  ;;  %v3622_v42 = vadd.f32 %v8789_v10, %v8782_v34  ;;  %v3693_v43 = vadd.f32 %v8784_v9, %v3620_v22 }
 0x2df   :  { %v3825_v6 = vadd.f32 %v3824_v60, %v3752_v18  ;;  %v3754_v31 = vadd.f32 %v3753_v44, %v3681_v54  ;;  %v4001_v1 = vsel %vm3873_vm7, %v3819_v52, %v3937_v13  ;;  %vm3874_vm9 = vcmp.gt.f32.partialorder %v3821_v47, 0.0 }
 0x2e0   :  { %v3938_v23 = vmul.f32 0.2, %v3821_v47  ;;  %v3755_v16 = vpop.f32.mrf.mxu1  ;;  %v8819_v30 = vpack.c.bf16 %v4001_v1, %v3993_v27  ;;  %v3830_v40 = vpop.f32.mrf.mxu0  ;;  %v3695_v45 = vadd.f32 %v8787_v20, %v3622_v42 }
 0x2e1   :  { %v3827_v62 = vadd.f32 %v3826_v58, %v3754_v31  ;;  %v3756_v56 = vadd.f32 %v3755_v16, %v3683_v49  ;;  %v3945_v29 = vmul.f32 0.2, %v3825_v6  ;;  %vm3881_vm10 = vcmp.gt.f32.partialorder %v3825_v6, 0.0 }
 0x2e2   :  { %v4002_v33 = vsel %vm3874_vm9, %v3821_v47, %v3938_v23  ;;  %v3757_v39 = vpop.f32.mrf.mxu1  ;;  %v3834_v7 = vpop.f32.mrf.mxu0 }
 0x2e3   :  { %v8822_v12 = vpack.c.bf16 %v4002_v33, %v3994_v21  ;;  %v3829_v35 = vadd.f32 %v3828_v3, %v3756_v56  ;;  %v3758_v15 = vadd.f32 %v3757_v39, %v3685_v11  ;;  %v3946_v19 = vmul.f32 0.2, %v3827_v62 }
 0x2e4   :  { %v3761_v61 = vpop.f32.mrf.mxu1  ;;  %v3836_v60 = vpop.f32.mrf.mxu0  ;;  %v4009_v2 = vsel %vm3881_vm10, %v3825_v6, %v3945_v29  ;;  %vm3882_vm12 = vcmp.gt.f32.partialorder %v3827_v62, 0.0 }
 0x2e5   :  { %v3762_v4 = vadd.f32 %v3761_v61, %v3689_v37  ;;  %vm3889_vm11 = vcmp.gt.f32.partialorder %v3829_v35, 0.0  ;;  %v3953_v32 = vmul.f32 0.2, %v3829_v35  ;;  %v3831_v55 = vadd.f32 %v3830_v40, %v3758_v15 }
 0x2e6   :  { %v3763_v52 = vpop.f32.mrf.mxu1  ;;  %v3838_v54 = vpop.f32.mrf.mxu0  ;;  %v4010_v58 = vsel %vm3882_vm12, %v3827_v62, %v3946_v19 }
 0x2e7   :  { %v3764_v17 = vadd.f32 %v3763_v52, %v3691_v48  ;;  %v4017_v18 = vsel %vm3889_vm11, %v3829_v35, %v3953_v32  ;;  %vm3890_vm13 = vcmp.gt.f32.partialorder %v3831_v55, 0.0  ;;  %v3954_v46 = vmul.f32 0.2, %v3831_v55 }
 0x2e8   :  { %v3835_v24 = vadd.f32 %v3834_v7, %v3762_v4  ;;  %v3765_v34 = vpop.f32.mrf.mxu1  ;;  %v8831_v10 = vpack.c.bf16 %v4017_v18, %v4009_v2  ;;  %v3840_v9 = vpop.f32.mrf.mxu0 }
 0x2e9   :  { %v4018_v57 = vsel %vm3890_vm13, %v3831_v55, %v3954_v46  ;;  %v3837_v13 = vadd.f32 %v3836_v60, %v3764_v17  ;;  %v3766_v47 = vadd.f32 %v3765_v34, %v3693_v43 }
 0x2ea   :  { %v3767_v44 = vpop.f32.mrf.mxu1  ;;  %v8833_v49 = vpack.c.bf16 %v4018_v57, %v4010_v58  ;;  %v3961_v6 = vmul.f32 0.2, %v3835_v24  ;;  %vm3897_vm14 = vcmp.gt.f32.partialorder %v3835_v24, 0.0 }
 0x2eb   :  { %v3839_v31 = vadd.f32 %v3838_v54, %v3766_v47  ;;  %v3768_v3 = vadd.f32 %v3767_v44, %v3695_v45  ;;  %v3962_v27 = vmul.f32 0.2, %v3837_v13  ;;  %vm3898_vm1 = vcmp.gt.f32.partialorder %v3837_v13, 0.0 }
 0x2ec   :  { %v4025_v20 = vsel %vm3897_vm14, %v3835_v24, %v3961_v6 }
 0x2ed   :  { %vm3905_vm15 = vcmp.gt.f32.partialorder %v3839_v31, 0.0  ;;  %v3969_v1 = vmul.f32 0.2, %v3839_v31  ;;  %v3841_v23 = vadd.f32 %v3840_v9, %v3768_v3  ;;  %v4026_v40 = vsel %vm3898_vm1, %v3837_v13, %v3962_v27 }
 0x2ef   :  { %v4033_v16 = vsel %vm3905_vm15, %v3839_v31, %v3969_v1  ;;  %vm3906_vm2 = vcmp.gt.f32.partialorder %v3841_v23, 0.0  ;;  %v3970_v50 = vmul.f32 0.2, %v3841_v23 }
 0x2f0   :  { %v8835_v11 = vpack.c.bf16 %v4033_v16, %v4025_v20 }
 0x2f1   :  { %v4034_v21 = vsel %vm3906_vm2, %v3841_v23, %v3970_v50 }
 0x2f2   :  { %v8837_v33 = vpack.c.bf16 %v4034_v21, %v4026_v40 }
 0x2f3   :  { %7777 = dma.done.wait [#allocation4 + $0x1], 32768 }
 0x2f4   :  { %7778 = vsyncadd [#allocation4 + $0x1], 4294934528  ;;  %5665 = vmatprep.mubr.bf16.mxu0 %v8410_v38  ;;  %5738 = vmatprep.mubr.bf16.mxu1 %v8636_v0  ;;  %v7255_v62 = vld [vmem:[#allocation3 + $0xe4] ss:$16 sps:$4 sm:$0xff]   ;;  %v7259_v39 = vld [vmem:[#allocation3 + $0xe0] ss:$16 sps:$4 sm:$0xff]  }
 0x2f5   :  { %v7257_v56 = vld [vmem:[#allocation3 + $0x2e4] ss:$16 sps:$4 sm:$0xff]   ;;  %5633 = vmatprep.subr.bf16.mxu0 %v7255_v62  ;;  %v7260_v37 = vld [vmem:[#allocation3 + $0x2e0] ss:$16 sps:$4 sm:$0xff]  }
 0x2f6   :  { %5706 = vmatprep.subr.bf16.mxu1 %v7257_v56  ;;  %v7261_v29 = vld [vmem:[#allocation3 + $0xc4] ss:$16 sps:$4 sm:$0xff]   ;;  %5634 = vmatpush1.bf16.msra.mxu0 %v7259_v39  ;;  %v7265_v35 = vld [vmem:[#allocation3 + $0xc0] ss:$16 sps:$4 sm:$0xff]  }
 0x2f7   :  { %5707 = vmatpush1.bf16.msra.mxu1 %v7260_v37  ;;  %v7263_v7 = vld [vmem:[#allocation3 + $0x2c4] ss:$16 sps:$4 sm:$0xff]   ;;  %5635 = vmatprep.subr.bf16.mxu0 %v7261_v29  ;;  %v7266_v15 = vld [vmem:[#allocation3 + $0x2c0] ss:$16 sps:$4 sm:$0xff]  }
 0x2f8   :  { %5708 = vmatprep.subr.bf16.mxu1 %v7263_v7  ;;  %v7267_v61 = vld [vmem:[#allocation3 + $0xa4] ss:$16 sps:$4 sm:$0xff]   ;;  %v7271_v42 = vld [vmem:[#allocation3 + $0xa0] ss:$16 sps:$4 sm:$0xff]  }
 0x2f9   :  { %v7269_v22 = vld [vmem:[#allocation3 + $0x2a4] ss:$16 sps:$4 sm:$0xff]   ;;  %v7272_v48 = vld [vmem:[#allocation3 + $0x2a0] ss:$16 sps:$4 sm:$0xff]  }
 0x2fa   :  { %5636 = vmatpush1.bf16.msra.mxu0 %v7265_v35  ;;  %v7273_v4 = vld [vmem:[#allocation3 + $0x84] ss:$16 sps:$4 sm:$0xff]   ;;  %v7277_v19 = vld [vmem:[#allocation3 + $0x80] ss:$16 sps:$4 sm:$0xff]  }
 0x2fb   :  { %5709 = vmatpush1.bf16.msra.mxu1 %v7266_v15  ;;  %5637 = vmatprep.subr.bf16.mxu0 %v7267_v61  ;;  %v7275_v60 = vld [vmem:[#allocation3 + $0x284] ss:$16 sps:$4 sm:$0xff]   ;;  %v7278_v32 = vld [vmem:[#allocation3 + $0x280] ss:$16 sps:$4 sm:$0xff]  }
 0x2fc   :  { %5710 = vmatprep.subr.bf16.mxu1 %v7269_v22  ;;  %v7279_v55 = vld [vmem:[#allocation3 + $0x64] ss:$16 sps:$4 sm:$0xff]   ;;  %v7283_v43 = vld [vmem:[#allocation3 + $0x60] ss:$16 sps:$4 sm:$0xff]  }
 0x2fd   :  { %v7281_v52 = vld [vmem:[#allocation3 + $0x264] ss:$16 sps:$4 sm:$0xff]   ;;  %v7284_v2 = vld [vmem:[#allocation3 + $0x260] ss:$16 sps:$4 sm:$0xff]  }
 0x2fe   :  { %5638 = vmatpush1.bf16.msra.mxu0 %v7271_v42  ;;  %v7285_v17 = vld [vmem:[#allocation3 + $0x44] ss:$16 sps:$4 sm:$0xff]   ;;  %v7289_v18 = vld [vmem:[#allocation3 + $0x40] ss:$16 sps:$4 sm:$0xff]  }
 0x2ff   :  { %5711 = vmatpush1.bf16.msra.mxu1 %v7272_v48  ;;  %5639 = vmatprep.subr.bf16.mxu0 %v7273_v4  ;;  %v7287_v54 = vld [vmem:[#allocation3 + $0x244] ss:$16 sps:$4 sm:$0xff]   ;;  %v7290_v46 = vld [vmem:[#allocation3 + $0x240] ss:$16 sps:$4 sm:$0xff]  }
 0x300   :  { %5712 = vmatprep.subr.bf16.mxu1 %v7275_v60  ;;  %v7291_v24 = vld [vmem:[#allocation3 + $0x24] ss:$16 sps:$4 sm:$0xff]   ;;  %v7295_v45 = vld [vmem:[#allocation3 + $0x20] ss:$16 sps:$4 sm:$0xff]  }
 0x301   :  { %v7293_v34 = vld [vmem:[#allocation3 + $0x224] ss:$16 sps:$4 sm:$0xff]   ;;  %v7296_v58 = vld [vmem:[#allocation3 + $0x220] ss:$16 sps:$4 sm:$0xff]  }
 0x302   :  { %5640 = vmatpush1.bf16.msra.mxu0 %v7277_v19  ;;  %v7297_v57 = vld [vmem:[#allocation3 + $0x4] ss:$16 sps:$4 sm:$0xff]   ;;  %v7301_v47 = vld [vmem:[#allocation3] ss:$16 sps:$4 sm:$0xff]  }
 0x303   :  { %5713 = vmatpush1.bf16.msra.mxu1 %v7278_v32  ;;  %5641 = vmatprep.subr.bf16.mxu0 %v7279_v55  ;;  %v7299_v13 = vld [vmem:[#allocation3 + $0x204] ss:$16 sps:$4 sm:$0xff]   ;;  %v7302_v44 = vld [vmem:[#allocation3 + $0x200] ss:$16 sps:$4 sm:$0xff]  }
 0x304   :  { %5714 = vmatprep.subr.bf16.mxu1 %v7281_v52  ;;  %v7303_v9 = vld [vmem:[#allocation3 + $0x1e4] ss:$16 sps:$4 sm:$0xff]   ;;  %v7307_v31 = vld [vmem:[#allocation3 + $0x1e0] ss:$16 sps:$4 sm:$0xff]  }
 0x305   :  { %v7305_v6 = vld [vmem:[#allocation3 + $0x3e4] ss:$16 sps:$4 sm:$0xff]   ;;  %v7308_v3 = vld [vmem:[#allocation3 + $0x3e0] ss:$16 sps:$4 sm:$0xff]  }
 0x306   :  { %5642 = vmatpush1.bf16.msra.mxu0 %v7283_v43  ;;  %v7309_v27 = vld [vmem:[#allocation3 + $0x1c4] ss:$16 sps:$4 sm:$0xff]   ;;  %v7313_v23 = vld [vmem:[#allocation3 + $0x1c0] ss:$16 sps:$4 sm:$0xff]  }
 0x307   :  { %5715 = vmatpush1.bf16.msra.mxu1 %v7284_v2  ;;  %5643 = vmatprep.subr.bf16.mxu0 %v7285_v17  ;;  %v7311_v1 = vld [vmem:[#allocation3 + $0x3c4] ss:$16 sps:$4 sm:$0xff]   ;;  %v7314_v20 = vld [vmem:[#allocation3 + $0x3c0] ss:$16 sps:$4 sm:$0xff]  }
 0x308   :  { %5716 = vmatprep.subr.bf16.mxu1 %v7287_v54  ;;  %v7315_v16 = vld [vmem:[#allocation3 + $0x1a4] ss:$16 sps:$4 sm:$0xff]   ;;  %v7319_v40 = vld [vmem:[#allocation3 + $0x1a0] ss:$16 sps:$4 sm:$0xff]  }
 0x309   :  { %v7317_v50 = vld [vmem:[#allocation3 + $0x3a4] ss:$16 sps:$4 sm:$0xff]   ;;  %v7320_v21 = vld [vmem:[#allocation3 + $0x3a0] ss:$16 sps:$4 sm:$0xff]  }
 0x30a   :  { %5644 = vmatpush1.bf16.msra.mxu0 %v7289_v18  ;;  %v7321_v62 = vld [vmem:[#allocation3 + $0x184] ss:$16 sps:$4 sm:$0xff]   ;;  %v7325_v39 = vld [vmem:[#allocation3 + $0x180] ss:$16 sps:$4 sm:$0xff]  }
 0x30b   :  { %5717 = vmatpush1.bf16.msra.mxu1 %v7290_v46  ;;  %5645 = vmatprep.subr.bf16.mxu0 %v7291_v24  ;;  %v7323_v56 = vld [vmem:[#allocation3 + $0x384] ss:$16 sps:$4 sm:$0xff]   ;;  %v7326_v37 = vld [vmem:[#allocation3 + $0x380] ss:$16 sps:$4 sm:$0xff]  }
 0x30c   :  { %5718 = vmatprep.subr.bf16.mxu1 %v7293_v34  ;;  %v7327_v29 = vld [vmem:[#allocation3 + $0x164] ss:$16 sps:$4 sm:$0xff]   ;;  %v7331_v35 = vld [vmem:[#allocation3 + $0x160] ss:$16 sps:$4 sm:$0xff]  }
 0x30d   :  { %v7329_v7 = vld [vmem:[#allocation3 + $0x364] ss:$16 sps:$4 sm:$0xff]   ;;  %v7332_v15 = vld [vmem:[#allocation3 + $0x360] ss:$16 sps:$4 sm:$0xff]  }
 0x30e   :  { %5646 = vmatpush1.bf16.msra.mxu0 %v7295_v45  ;;  %v7333_v61 = vld [vmem:[#allocation3 + $0x144] ss:$16 sps:$4 sm:$0xff]   ;;  %v7337_v42 = vld [vmem:[#allocation3 + $0x140] ss:$16 sps:$4 sm:$0xff]  }
 0x30f   :  { %5719 = vmatpush1.bf16.msra.mxu1 %v7296_v58  ;;  %5647 = vmatprep.subr.bf16.mxu0 %v7297_v57  ;;  %v7335_v22 = vld [vmem:[#allocation3 + $0x344] ss:$16 sps:$4 sm:$0xff]   ;;  %v7338_v48 = vld [vmem:[#allocation3 + $0x340] ss:$16 sps:$4 sm:$0xff]  }
 0x310   :  { %5720 = vmatprep.subr.bf16.mxu1 %v7299_v13  ;;  %v7339_v4 = vld [vmem:[#allocation3 + $0x124] ss:$16 sps:$4 sm:$0xff]   ;;  %v7343_v19 = vld [vmem:[#allocation3 + $0x120] ss:$16 sps:$4 sm:$0xff]  }
 0x311   :  { %v7341_v60 = vld [vmem:[#allocation3 + $0x324] ss:$16 sps:$4 sm:$0xff]   ;;  %v7344_v32 = vld [vmem:[#allocation3 + $0x320] ss:$16 sps:$4 sm:$0xff]  }
 0x312   :  { %5648 = vmatpush1.bf16.msra.mxu0 %v7301_v47  ;;  %v7345_v55 = vld [vmem:[#allocation3 + $0x104] ss:$16 sps:$4 sm:$0xff]   ;;  %v7349_v43 = vld [vmem:[#allocation3 + $0x100] ss:$16 sps:$4 sm:$0xff]  }
 0x313   :  { %5721 = vmatpush1.bf16.msra.mxu1 %v7302_v44  ;;  %5649 = vmatprep.subr.bf16.mxu0 %v7303_v9  ;;  %v7347_v52 = vld [vmem:[#allocation3 + $0x304] ss:$16 sps:$4 sm:$0xff]   ;;  %v7350_v2 = vld [vmem:[#allocation3 + $0x300] ss:$16 sps:$4 sm:$0xff]  }
 0x314   :  { %5722 = vmatprep.subr.bf16.mxu1 %v7305_v6  ;;  %v7353_v17 = vld [vmem:[#allocation3 + $0x4e4] ss:$16 sps:$4 sm:$0xff]   ;;  %v7351_v18 = vld [vmem:[#allocation3 + $0x4e0] ss:$16 sps:$4 sm:$0xff]  }
 0x315   :  { %v7356_v54 = vld [vmem:[#allocation3 + $0x6e4] ss:$16 sps:$4 sm:$0xff]   ;;  %v7354_v46 = vld [vmem:[#allocation3 + $0x6e0] ss:$16 sps:$4 sm:$0xff]  }
 0x316   :  { %5650 = vmatpush2.bf16.msra.mxu0 %v7307_v31  ;;  %v7359_v24 = vld [vmem:[#allocation3 + $0x4c4] ss:$16 sps:$4 sm:$0xff]   ;;  %v7357_v45 = vld [vmem:[#allocation3 + $0x4c0] ss:$16 sps:$4 sm:$0xff]  }
 0x317   :  { %5723 = vmatpush2.bf16.msra.mxu1 %v7308_v3  ;;  %5651 = vmatprep.subr.bf16.mxu0 %v7309_v27  ;;  %v7362_v34 = vld [vmem:[#allocation3 + $0x6c4] ss:$16 sps:$4 sm:$0xff]   ;;  %v7360_v58 = vld [vmem:[#allocation3 + $0x6c0] ss:$16 sps:$4 sm:$0xff]  }
 0x318   :  { %5724 = vmatprep.subr.bf16.mxu1 %v7311_v1  ;;  %v7365_v57 = vld [vmem:[#allocation3 + $0x4a4] ss:$16 sps:$4 sm:$0xff]   ;;  %v7363_v47 = vld [vmem:[#allocation3 + $0x4a0] ss:$16 sps:$4 sm:$0xff]  }
 0x319   :  { %v7368_v13 = vld [vmem:[#allocation3 + $0x6a4] ss:$16 sps:$4 sm:$0xff]   ;;  %v7366_v44 = vld [vmem:[#allocation3 + $0x6a0] ss:$16 sps:$4 sm:$0xff]  }
 0x31a   :  { %5652 = vmatpush2.bf16.msra.mxu0 %v7313_v23  ;;  %v7371_v9 = vld [vmem:[#allocation3 + $0x484] ss:$16 sps:$4 sm:$0xff]   ;;  %v7369_v31 = vld [vmem:[#allocation3 + $0x480] ss:$16 sps:$4 sm:$0xff]  }
 0x31b   :  { %5725 = vmatpush2.bf16.msra.mxu1 %v7314_v20  ;;  %5653 = vmatprep.subr.bf16.mxu0 %v7315_v16  ;;  %v7374_v6 = vld [vmem:[#allocation3 + $0x684] ss:$16 sps:$4 sm:$0xff]   ;;  %v7372_v3 = vld [vmem:[#allocation3 + $0x680] ss:$16 sps:$4 sm:$0xff]  }
 0x31c   :  { %5726 = vmatprep.subr.bf16.mxu1 %v7317_v50  ;;  %v7377_v27 = vld [vmem:[#allocation3 + $0x464] ss:$16 sps:$4 sm:$0xff]   ;;  %v7375_v23 = vld [vmem:[#allocation3 + $0x460] ss:$16 sps:$4 sm:$0xff]  }
 0x31d   :  { %v7380_v1 = vld [vmem:[#allocation3 + $0x664] ss:$16 sps:$4 sm:$0xff]   ;;  %v7378_v20 = vld [vmem:[#allocation3 + $0x660] ss:$16 sps:$4 sm:$0xff]  }
 0x31e   :  { %5654 = vmatpush2.bf16.msra.mxu0 %v7319_v40  ;;  %v7383_v16 = vld [vmem:[#allocation3 + $0x444] ss:$16 sps:$4 sm:$0xff]   ;;  %v7381_v40 = vld [vmem:[#allocation3 + $0x440] ss:$16 sps:$4 sm:$0xff]  }
 0x31f   :  { %5727 = vmatpush2.bf16.msra.mxu1 %v7320_v21  ;;  %5655 = vmatprep.subr.bf16.mxu0 %v7321_v62  ;;  %v7386_v50 = vld [vmem:[#allocation3 + $0x644] ss:$16 sps:$4 sm:$0xff]   ;;  %v7384_v21 = vld [vmem:[#allocation3 + $0x640] ss:$16 sps:$4 sm:$0xff]  }
 0x320   :  { %5728 = vmatprep.subr.bf16.mxu1 %v7323_v56  ;;  %v7389_v62 = vld [vmem:[#allocation3 + $0x424] ss:$16 sps:$4 sm:$0xff]  }
 0x321   :  { %v7392_v56 = vld [vmem:[#allocation3 + $0x624] ss:$16 sps:$4 sm:$0xff]  }
 0x322   :  { %5656 = vmatpush2.bf16.msra.mxu0 %v7325_v39  ;;  %v9242_v39 = vld [vmem:[#allocation35_spill] sm:$0xff] }
 0x323   :  { %5729 = vmatpush2.bf16.msra.mxu1 %v7326_v37  ;;  %5657 = vmatprep.subr.bf16.mxu0 %v7327_v29  ;;  %v9243_v37 = vld [vmem:[#allocation39_spill] sm:$0xff] }
 0x324   :  { %5730 = vmatprep.subr.bf16.mxu1 %v7329_v7  ;;  %v7387_v29 = vld [vmem:[#allocation3 + $0x420] ss:$16 sps:$4 sm:$0xff]  }
 0x325   :  { %v7390_v7 = vld [vmem:[#allocation3 + $0x620] ss:$16 sps:$4 sm:$0xff]  }
 0x326   :  { %5658 = vmatpush2.bf16.msra.mxu0 %v7331_v35  ;;  %v7395_v35 = vld [vmem:[#allocation3 + $0x404] ss:$16 sps:$4 sm:$0xff]  }
 0x327   :  { %5731 = vmatpush2.bf16.msra.mxu1 %v7332_v15  ;;  %5659 = vmatprep.subr.bf16.mxu0 %v7333_v61  ;;  %v7398_v15 = vld [vmem:[#allocation3 + $0x604] ss:$16 sps:$4 sm:$0xff]   ;;  %v7393_v61 = vld [vmem:[#allocation3 + $0x400] ss:$16 sps:$4 sm:$0xff]  }
 0x328   :  { %5732 = vmatprep.subr.bf16.mxu1 %v7335_v22  ;;  %v7396_v22 = vld [vmem:[#allocation3 + $0x600] ss:$16 sps:$4 sm:$0xff]  }
 0x32a   :  { %5660 = vmatpush2.bf16.msra.mxu0 %v7337_v42  ;;  %v9244_v42 = vld [vmem:[#allocation34_spill] sm:$0xff] }
 0x32b   :  { %5733 = vmatpush2.bf16.msra.mxu1 %v7338_v48  ;;  %5661 = vmatprep.subr.bf16.mxu0 %v7339_v4  ;;  %v9245_v48 = vld [vmem:[#allocation38_spill] sm:$0xff]  ;;  %v7401_v4 = vld [vmem:[#allocation3 + $0x5e4] ss:$16 sps:$4 sm:$0xff]  }
 0x32c   :  { %5734 = vmatprep.subr.bf16.mxu1 %v7341_v60  ;;  %v7404_v60 = vld [vmem:[#allocation3 + $0x7e4] ss:$16 sps:$4 sm:$0xff]  }
 0x32e   :  { %5662 = vmatpush2.bf16.msra.mxu0 %v7343_v19  ;;  %v9246_v19 = vld [vmem:[#allocation40_spill] sm:$0xff] }
 0x32f   :  { %5735 = vmatpush2.bf16.msra.mxu1 %v7344_v32  ;;  %5663 = vmatprep.subr.bf16.mxu0 %v7345_v55  ;;  %v7399_v32 = vld [vmem:[#allocation3 + $0x5e0] ss:$16 sps:$4 sm:$0xff]  }
 0x330   :  { %5736 = vmatprep.subr.bf16.mxu1 %v7347_v52  ;;  %v7402_v55 = vld [vmem:[#allocation3 + $0x7e0] ss:$16 sps:$4 sm:$0xff]   ;;  %v7407_v52 = vld [vmem:[#allocation3 + $0x5c4] ss:$16 sps:$4 sm:$0xff]  }
 0x332   :  { %5664 = vmatpush2.bf16.msra.mxu0 %v7349_v43  ;;  %v7410_v43 = vld [vmem:[#allocation3 + $0x7c4] ss:$16 sps:$4 sm:$0xff]  }
 0x333   :  { %5737 = vmatpush2.bf16.msra.mxu1 %v7350_v2  ;;  %5779 = vmatprep.subr.bf16.mxu0 %v7353_v17  ;;  %v7405_v2 = vld [vmem:[#allocation3 + $0x5c0] ss:$16 sps:$4 sm:$0xff]  }
 0x334   :  { %5852 = vmatprep.subr.bf16.mxu1 %v7356_v54  ;;  %v7408_v17 = vld [vmem:[#allocation3 + $0x7c0] ss:$16 sps:$4 sm:$0xff]   ;;  %v7413_v54 = vld [vmem:[#allocation3 + $0x5a4] ss:$16 sps:$4 sm:$0xff]  }
 0x335   :  { %5666 = vmatmul.mubr.bf16.vlgmr.msra.gmra.mxu0 %v8388_v59 }
 0x336   :  { %5739 = vmatmul.mubr.bf16.vlgmr.msra.gmra.mxu1 %v8632_v41  ;;  %5780 = vmatpush1.bf16.msra.mxu0 %v7351_v18  ;;  %v7416_v18 = vld [vmem:[#allocation3 + $0x7a4] ss:$16 sps:$4 sm:$0xff]  }
 0x337   :  { %5853 = vmatpush1.bf16.msra.mxu1 %v7354_v46  ;;  %5781 = vmatprep.subr.bf16.mxu0 %v7359_v24  ;;  %v7411_v46 = vld [vmem:[#allocation3 + $0x5a0] ss:$16 sps:$4 sm:$0xff]  }
 0x338   :  { %5854 = vmatprep.subr.bf16.mxu1 %v7362_v34  ;;  %5675 = vmatprep.mubr.bf16.mxu0 %v8464_v8  ;;  %v7414_v24 = vld [vmem:[#allocation3 + $0x7a0] ss:$16 sps:$4 sm:$0xff]   ;;  %v7419_v34 = vld [vmem:[#allocation3 + $0x584] ss:$16 sps:$4 sm:$0xff]  }
 0x339   :  { %5748 = vmatprep.mubr.bf16.mxu1 %v8647_v28 }
 0x33a   :  { %5782 = vmatpush1.bf16.msra.mxu0 %v7357_v45  ;;  %v7422_v45 = vld [vmem:[#allocation3 + $0x784] ss:$16 sps:$4 sm:$0xff]  }
 0x33b   :  { %5855 = vmatpush1.bf16.msra.mxu1 %v7360_v58  ;;  %5783 = vmatprep.subr.bf16.mxu0 %v7365_v57  ;;  %v7417_v58 = vld [vmem:[#allocation3 + $0x580] ss:$16 sps:$4 sm:$0xff]  }
 0x33c   :  { %5856 = vmatprep.subr.bf16.mxu1 %v7368_v13  ;;  %v7420_v57 = vld [vmem:[#allocation3 + $0x780] ss:$16 sps:$4 sm:$0xff]   ;;  %v7425_v13 = vld [vmem:[#allocation3 + $0x564] ss:$16 sps:$4 sm:$0xff]  }
 0x33d   :  { %5676 = vmatmul.mubr.bf16.gmra.mxu0 %v8453_v51 }
 0x33e   :  { %5749 = vmatmul.mubr.bf16.gmra.mxu1 %v8644_v63  ;;  %5784 = vmatpush1.bf16.msra.mxu0 %v7363_v47  ;;  %v7428_v47 = vld [vmem:[#allocation3 + $0x764] ss:$16 sps:$4 sm:$0xff]  }
 0x33f   :  { %5857 = vmatpush1.bf16.msra.mxu1 %v7366_v44  ;;  %5785 = vmatprep.subr.bf16.mxu0 %v7371_v9  ;;  %v7423_v44 = vld [vmem:[#allocation3 + $0x560] ss:$16 sps:$4 sm:$0xff]  }
 0x340   :  { %5858 = vmatprep.subr.bf16.mxu1 %v7374_v6  ;;  %5685 = vmatprep.mubr.bf16.mxu0 %v8502_v5  ;;  %v7426_v9 = vld [vmem:[#allocation3 + $0x760] ss:$16 sps:$4 sm:$0xff]   ;;  %v7431_v6 = vld [vmem:[#allocation3 + $0x544] ss:$16 sps:$4 sm:$0xff]  }
 0x341   :  { %5758 = vmatprep.mubr.bf16.mxu1 %v8657_v25 }
 0x342   :  { %5786 = vmatpush1.bf16.msra.mxu0 %v7369_v31  ;;  %v7434_v31 = vld [vmem:[#allocation3 + $0x744] ss:$16 sps:$4 sm:$0xff]  }
 0x343   :  { %5859 = vmatpush1.bf16.msra.mxu1 %v7372_v3  ;;  %5787 = vmatprep.subr.bf16.mxu0 %v7377_v27  ;;  %v7429_v3 = vld [vmem:[#allocation3 + $0x540] ss:$16 sps:$4 sm:$0xff]  }
 0x344   :  { %5860 = vmatprep.subr.bf16.mxu1 %v7380_v1  ;;  %v7432_v27 = vld [vmem:[#allocation3 + $0x740] ss:$16 sps:$4 sm:$0xff]   ;;  %v7437_v1 = vld [vmem:[#allocation3 + $0x524] ss:$16 sps:$4 sm:$0xff]  }
 0x345   :  { %5686 = vmatmul.mubr.bf16.gmra.mxu0 %v8496_v36 }
 0x346   :  { %5759 = vmatmul.mubr.bf16.gmra.mxu1 %v8654_v26  ;;  %5788 = vmatpush1.bf16.msra.mxu0 %v7375_v23  ;;  %v7440_v23 = vld [vmem:[#allocation3 + $0x724] ss:$16 sps:$4 sm:$0xff]  }
 0x347   :  { %5861 = vmatpush1.bf16.msra.mxu1 %v7378_v20  ;;  %5789 = vmatprep.subr.bf16.mxu0 %v7383_v16  ;;  %v7435_v20 = vld [vmem:[#allocation3 + $0x520] ss:$16 sps:$4 sm:$0xff]  }
 0x348   :  { %5862 = vmatprep.subr.bf16.mxu1 %v7386_v50  ;;  %5695 = vmatprep.mubr.bf16.mxu0 %v9242_v39  ;;  %v7438_v16 = vld [vmem:[#allocation3 + $0x720] ss:$16 sps:$4 sm:$0xff]   ;;  %v7443_v50 = vld [vmem:[#allocation3 + $0x504] ss:$16 sps:$4 sm:$0xff]  }
 0x349   :  { %5768 = vmatprep.mubr.bf16.mxu1 %v9243_v37 }
 0x34a   :  { %5790 = vmatpush1.bf16.msra.mxu0 %v7381_v40  ;;  %v7446_v40 = vld [vmem:[#allocation3 + $0x704] ss:$16 sps:$4 sm:$0xff]  }
 0x34b   :  { %5863 = vmatpush1.bf16.msra.mxu1 %v7384_v21  ;;  %5791 = vmatprep.subr.bf16.mxu0 %v7389_v62  ;;  %v7441_v21 = vld [vmem:[#allocation3 + $0x500] ss:$16 sps:$4 sm:$0xff]  }
 0x34c   :  { %5864 = vmatprep.subr.bf16.mxu1 %v7392_v56  ;;  %v7444_v62 = vld [vmem:[#allocation3 + $0x700] ss:$16 sps:$4 sm:$0xff]   ;;  %v7449_v56 = vld [vmem:[#allocation3 + $0xec] ss:$16 sps:$4 sm:$0xff]  }
 0x34d   :  { %5696 = vmatmul.mubr.bf16.gmra.mxu0 %v9244_v42 }
 0x34e   :  { %5769 = vmatmul.mubr.bf16.gmra.mxu1 %v9245_v48  ;;  %5792 = vmatpush1.bf16.msra.mxu0 %v7387_v29  ;;  %v7452_v29 = vld [vmem:[#allocation3 + $0x2ec] ss:$16 sps:$4 sm:$0xff]  }
 0x34f   :  { %5865 = vmatpush1.bf16.msra.mxu1 %v7390_v7  ;;  %5793 = vmatprep.subr.bf16.mxu0 %v7395_v35  ;;  %v7447_v7 = vld [vmem:[#allocation3 + $0xe8] ss:$16 sps:$4 sm:$0xff]  }
 0x350   :  { %5866 = vmatprep.subr.bf16.mxu1 %v7398_v15  ;;  %5811 = vmatprep.mubr.bf16.mxu0 %v9246_v19  ;;  %v7450_v35 = vld [vmem:[#allocation3 + $0x2e8] ss:$16 sps:$4 sm:$0xff]   ;;  %v7455_v15 = vld [vmem:[#allocation3 + $0xcc] ss:$16 sps:$4 sm:$0xff]  }
 0x351   :  { %5884 = vmatprep.mubr.bf16.mxu1 %v8808_v14 }
 0x352   :  { %5794 = vmatpush1.bf16.msra.mxu0 %v7393_v61  ;;  %v7458_v61 = vld [vmem:[#allocation3 + $0x2cc] ss:$16 sps:$4 sm:$0xff]  }
 0x353   :  { %5867 = vmatpush1.bf16.msra.mxu1 %v7396_v22  ;;  %5795 = vmatprep.subr.bf16.mxu0 %v7401_v4  ;;  %v9247_v22 = vld [vmem:[#allocation41_spill] sm:$0xff] }
 0x354   :  { %5868 = vmatprep.subr.bf16.mxu1 %v7404_v60  ;;  %v7453_v4 = vld [vmem:[#allocation3 + $0xc8] ss:$16 sps:$4 sm:$0xff]  }
 0x355   :  { %v7456_v60 = vld [vmem:[#allocation3 + $0x2c8] ss:$16 sps:$4 sm:$0xff]  }
 0x356   :  { %5796 = vmatpush2.bf16.msra.mxu0 %v7399_v32  ;;  %v7461_v32 = vld [vmem:[#allocation3 + $0xac] ss:$16 sps:$4 sm:$0xff]  }
 0x357   :  { %5869 = vmatpush2.bf16.msra.mxu1 %v7402_v55  ;;  %5797 = vmatprep.subr.bf16.mxu0 %v7407_v52  ;;  %v7464_v55 = vld [vmem:[#allocation3 + $0x2ac] ss:$16 sps:$4 sm:$0xff]  }
 0x358   :  { %5870 = vmatprep.subr.bf16.mxu1 %v7410_v43  ;;  %v9248_v52 = vld [vmem:[#allocation30_spill] sm:$0xff] }
 0x359   :  { %v7459_v43 = vld [vmem:[#allocation3 + $0xa8] ss:$16 sps:$4 sm:$0xff]  }
 0x35a   :  { %5798 = vmatpush2.bf16.msra.mxu0 %v7405_v2  ;;  %v7462_v2 = vld [vmem:[#allocation3 + $0x2a8] ss:$16 sps:$4 sm:$0xff]  }
 0x35b   :  { %5871 = vmatpush2.bf16.msra.mxu1 %v7408_v17  ;;  %5799 = vmatprep.subr.bf16.mxu0 %v7413_v54  ;;  %v7467_v17 = vld [vmem:[#allocation3 + $0x8c] ss:$16 sps:$4 sm:$0xff]  }
 0x35c   :  { %5872 = vmatprep.subr.bf16.mxu1 %v7416_v18  ;;  %v7470_v54 = vld [vmem:[#allocation3 + $0x28c] ss:$16 sps:$4 sm:$0xff]   ;;  %v9249_v18 = vld [vmem:[#allocation23_spill] sm:$0xff] }
 0x35e   :  { %5800 = vmatpush2.bf16.msra.mxu0 %v7411_v46  ;;  %v7465_v46 = vld [vmem:[#allocation3 + $0x88] ss:$16 sps:$4 sm:$0xff]  }
 0x35f   :  { %5873 = vmatpush2.bf16.msra.mxu1 %v7414_v24  ;;  %5801 = vmatprep.subr.bf16.mxu0 %v7419_v34  ;;  %v7468_v24 = vld [vmem:[#allocation3 + $0x288] ss:$16 sps:$4 sm:$0xff]   ;;  %v7473_v34 = vld [vmem:[#allocation3 + $0x6c] ss:$16 sps:$4 sm:$0xff]  }
 0x360   :  { %5874 = vmatprep.subr.bf16.mxu1 %v7422_v45  ;;  %v7476_v45 = vld [vmem:[#allocation3 + $0x26c] ss:$16 sps:$4 sm:$0xff]  }
 0x362   :  { %5802 = vmatpush2.bf16.msra.mxu0 %v7417_v58  ;;  %v9250_v58 = vld [vmem:[#allocation24_spill] sm:$0xff] }
 0x363   :  { %5875 = vmatpush2.bf16.msra.mxu1 %v7420_v57  ;;  %5803 = vmatprep.subr.bf16.mxu0 %v7425_v13  ;;  %v7471_v57 = vld [vmem:[#allocation3 + $0x68] ss:$16 sps:$4 sm:$0xff]  }
 0x364   :  { %5876 = vmatprep.subr.bf16.mxu1 %v7428_v47  ;;  %v7474_v13 = vld [vmem:[#allocation3 + $0x268] ss:$16 sps:$4 sm:$0xff]   ;;  %v7479_v47 = vld [vmem:[#allocation3 + $0x4c] ss:$16 sps:$4 sm:$0xff]  }
 0x366   :  { %5804 = vmatpush2.bf16.msra.mxu0 %v7423_v44  ;;  %v7482_v44 = vld [vmem:[#allocation3 + $0x24c] ss:$16 sps:$4 sm:$0xff]  }
 0x367   :  { %5877 = vmatpush2.bf16.msra.mxu1 %v7426_v9  ;;  %5805 = vmatprep.subr.bf16.mxu0 %v7431_v6  ;;  %v9251_v9 = vld [vmem:[#allocation32_spill] sm:$0xff] }
 0x368   :  { %5878 = vmatprep.subr.bf16.mxu1 %v7434_v31  ;;  %v7477_v6 = vld [vmem:[#allocation3 + $0x48] ss:$16 sps:$4 sm:$0xff]  }
 0x369   :  { %v7480_v31 = vld [vmem:[#allocation3 + $0x248] ss:$16 sps:$4 sm:$0xff]  }
 0x36a   :  { %5806 = vmatpush2.bf16.msra.mxu0 %v7429_v3  ;;  %v7485_v3 = vld [vmem:[#allocation3 + $0x2c] ss:$16 sps:$4 sm:$0xff]  }
 0x36b   :  { %5879 = vmatpush2.bf16.msra.mxu1 %v7432_v27  ;;  %5807 = vmatprep.subr.bf16.mxu0 %v7437_v1  ;;  %v7488_v27 = vld [vmem:[#allocation3 + $0x22c] ss:$16 sps:$4 sm:$0xff]  }
 0x36c   :  { %5880 = vmatprep.subr.bf16.mxu1 %v7440_v23  ;;  %v9252_v1 = vld [vmem:[#allocation26_spill] sm:$0xff] }
 0x36d   :  { %v7483_v23 = vld [vmem:[#allocation3 + $0x28] ss:$16 sps:$4 sm:$0xff]  }
 0x36e   :  { %5808 = vmatpush2.bf16.msra.mxu0 %v7435_v20  ;;  %v7486_v20 = vld [vmem:[#allocation3 + $0x228] ss:$16 sps:$4 sm:$0xff]  }
 0x36f   :  { %5881 = vmatpush2.bf16.msra.mxu1 %v7438_v16  ;;  %5809 = vmatprep.subr.bf16.mxu0 %v7443_v50  ;;  %v7491_v16 = vld [vmem:[#allocation3 + $0xc] ss:$16 sps:$4 sm:$0xff]  }
 0x370   :  { %5882 = vmatprep.subr.bf16.mxu1 %v7446_v40  ;;  %v7494_v50 = vld [vmem:[#allocation3 + $0x20c] ss:$16 sps:$4 sm:$0xff]   ;;  %v9253_v40 = vld [vmem:[#allocation25_spill] sm:$0xff] }
 0x372   :  { %5810 = vmatpush2.bf16.msra.mxu0 %v7441_v21  ;;  %v7489_v21 = vld [vmem:[#allocation3 + $0x8] ss:$16 sps:$4 sm:$0xff]  }
 0x373   :  { %5883 = vmatpush2.bf16.msra.mxu1 %v7444_v62  ;;  %5925 = vmatprep.subr.bf16.mxu0 %v7449_v56  ;;  %v7492_v62 = vld [vmem:[#allocation3 + $0x208] ss:$16 sps:$4 sm:$0xff]   ;;  %v7497_v56 = vld [vmem:[#allocation3 + $0x1ec] ss:$16 sps:$4 sm:$0xff]  }
 0x374   :  { %5998 = vmatprep.subr.bf16.mxu1 %v7452_v29  ;;  %v7500_v29 = vld [vmem:[#allocation3 + $0x3ec] ss:$16 sps:$4 sm:$0xff]  }
 0x375   :  { %5812 = vmatmul.mubr.bf16.vlgmr.msra.gmra.mxu0 %v9247_v22 }
 0x376   :  { %5885 = vmatmul.mubr.bf16.vlgmr.msra.gmra.mxu1 %v8800_v53  ;;  %5926 = vmatpush1.bf16.msra.mxu0 %v7447_v7  ;;  %v7495_v7 = vld [vmem:[#allocation3 + $0x1e8] ss:$16 sps:$4 sm:$0xff]  }
 0x377   :  { %5999 = vmatpush1.bf16.msra.mxu1 %v7450_v35  ;;  %5927 = vmatprep.subr.bf16.mxu0 %v7455_v15  ;;  %v7498_v35 = vld [vmem:[#allocation3 + $0x3e8] ss:$16 sps:$4 sm:$0xff]   ;;  %v7503_v15 = vld [vmem:[#allocation3 + $0x1cc] ss:$16 sps:$4 sm:$0xff]  }
 0x378   :  { %6000 = vmatprep.subr.bf16.mxu1 %v7458_v61  ;;  %5821 = vmatprep.mubr.bf16.mxu0 %v9248_v52  ;;  %v7506_v61 = vld [vmem:[#allocation3 + $0x3cc] ss:$16 sps:$4 sm:$0xff]  }
 0x379   :  { %5894 = vmatprep.mubr.bf16.mxu1 %v8822_v12 }
 0x37a   :  { %5928 = vmatpush1.bf16.msra.mxu0 %v7453_v4  ;;  %v7501_v4 = vld [vmem:[#allocation3 + $0x1c8] ss:$16 sps:$4 sm:$0xff]  }
 0x37b   :  { %6001 = vmatpush1.bf16.msra.mxu1 %v7456_v60  ;;  %5929 = vmatprep.subr.bf16.mxu0 %v7461_v32  ;;  %v7504_v60 = vld [vmem:[#allocation3 + $0x3c8] ss:$16 sps:$4 sm:$0xff]   ;;  %v7509_v32 = vld [vmem:[#allocation3 + $0x1ac] ss:$16 sps:$4 sm:$0xff]  }
 0x37c   :  { %6002 = vmatprep.subr.bf16.mxu1 %v7464_v55  ;;  %v7512_v55 = vld [vmem:[#allocation3 + $0x3ac] ss:$16 sps:$4 sm:$0xff]  }
 0x37d   :  { %5822 = vmatmul.mubr.bf16.gmra.mxu0 %v9249_v18 }
 0x37e   :  { %5895 = vmatmul.mubr.bf16.gmra.mxu1 %v8819_v30  ;;  %5930 = vmatpush1.bf16.msra.mxu0 %v7459_v43  ;;  %v7507_v43 = vld [vmem:[#allocation3 + $0x1a8] ss:$16 sps:$4 sm:$0xff]  }
 0x37f   :  { %6003 = vmatpush1.bf16.msra.mxu1 %v7462_v2  ;;  %5931 = vmatprep.subr.bf16.mxu0 %v7467_v17  ;;  %v7518_v2 = vld [vmem:[#allocation3 + $0x38c] ss:$16 sps:$4 sm:$0xff]   ;;  %v7513_v17 = vld [vmem:[#allocation3 + $0x188] ss:$16 sps:$4 sm:$0xff]  }
 0x380   :  { %6004 = vmatprep.subr.bf16.mxu1 %v7470_v54  ;;  %5831 = vmatprep.mubr.bf16.mxu0 %v9250_v58  ;;  %v7516_v54 = vld [vmem:[#allocation3 + $0x388] ss:$16 sps:$4 sm:$0xff]  }
 0x381   :  { %5904 = vmatprep.mubr.bf16.mxu1 %v8833_v49 }
 0x382   :  { %5932 = vmatpush1.bf16.msra.mxu0 %v7465_v46  ;;  %v7521_v46 = vld [vmem:[#allocation3 + $0x16c] ss:$16 sps:$4 sm:$0xff]  }
 0x383   :  { %6005 = vmatpush1.bf16.msra.mxu1 %v7468_v24  ;;  %5933 = vmatprep.subr.bf16.mxu0 %v7473_v34  ;;  %v7524_v24 = vld [vmem:[#allocation3 + $0x36c] ss:$16 sps:$4 sm:$0xff]   ;;  %v7519_v34 = vld [vmem:[#allocation3 + $0x168] ss:$16 sps:$4 sm:$0xff]  }
 0x384   :  { %6006 = vmatprep.subr.bf16.mxu1 %v7476_v45  ;;  %v7522_v45 = vld [vmem:[#allocation3 + $0x368] ss:$16 sps:$4 sm:$0xff]  }
 0x385   :  { %5832 = vmatmul.mubr.bf16.gmra.mxu0 %v9251_v9 }
 0x386   :  { %5905 = vmatmul.mubr.bf16.gmra.mxu1 %v8831_v10  ;;  %5934 = vmatpush1.bf16.msra.mxu0 %v7471_v57  ;;  %v7527_v57 = vld [vmem:[#allocation3 + $0x14c] ss:$16 sps:$4 sm:$0xff]  }
 0x387   :  { %6007 = vmatpush1.bf16.msra.mxu1 %v7474_v13  ;;  %5935 = vmatprep.subr.bf16.mxu0 %v7479_v47  ;;  %v7530_v13 = vld [vmem:[#allocation3 + $0x34c] ss:$16 sps:$4 sm:$0xff]   ;;  %v7525_v47 = vld [vmem:[#allocation3 + $0x148] ss:$16 sps:$4 sm:$0xff]  }
 0x388   :  { %6008 = vmatprep.subr.bf16.mxu1 %v7482_v44  ;;  %5841 = vmatprep.mubr.bf16.mxu0 %v9252_v1  ;;  %v7528_v44 = vld [vmem:[#allocation3 + $0x348] ss:$16 sps:$4 sm:$0xff]  }
 0x389   :  { %5914 = vmatprep.mubr.bf16.mxu1 %v8837_v33 }
 0x38a   :  { %5936 = vmatpush1.bf16.msra.mxu0 %v7477_v6  ;;  %v7533_v6 = vld [vmem:[#allocation3 + $0x12c] ss:$16 sps:$4 sm:$0xff]  }
 0x38b   :  { %6009 = vmatpush1.bf16.msra.mxu1 %v7480_v31  ;;  %5937 = vmatprep.subr.bf16.mxu0 %v7485_v3  ;;  %v7536_v31 = vld [vmem:[#allocation3 + $0x32c] ss:$16 sps:$4 sm:$0xff]   ;;  %v7531_v3 = vld [vmem:[#allocation3 + $0x128] ss:$16 sps:$4 sm:$0xff]  }
 0x38c   :  { %6010 = vmatprep.subr.bf16.mxu1 %v7488_v27  ;;  %v7534_v27 = vld [vmem:[#allocation3 + $0x328] ss:$16 sps:$4 sm:$0xff]  }
 0x38d   :  { %5842 = vmatmul.mubr.bf16.gmra.mxu0 %v9253_v40 }
 0x38e   :  { %5915 = vmatmul.mubr.bf16.gmra.mxu1 %v8835_v11  ;;  %5938 = vmatpush1.bf16.msra.mxu0 %v7483_v23  ;;  %v7539_v23 = vld [vmem:[#allocation3 + $0x10c] ss:$16 sps:$4 sm:$0xff]  }
 0x38f   :  { %6011 = vmatpush1.bf16.msra.mxu1 %v7486_v20  ;;  %5939 = vmatprep.subr.bf16.mxu0 %v7491_v16  ;;  %v7542_v20 = vld [vmem:[#allocation3 + $0x30c] ss:$16 sps:$4 sm:$0xff]   ;;  %v7537_v16 = vld [vmem:[#allocation3 + $0x108] ss:$16 sps:$4 sm:$0xff]  }
 0x390   :  { %6012 = vmatprep.subr.bf16.mxu1 %v7494_v50  ;;  %5957 = vmatprep.mubr.bf16.mxu0 %v8410_v38  ;;  %v7510_v38 = vld [vmem:[#allocation3 + $0x3a8] ss:$16 sps:$4 sm:$0xff]  }
 0x391   :  { %6030 = vmatprep.mubr.bf16.mxu1 %v8636_v0  ;;  %v7515_v0 = vld [vmem:[#allocation3 + $0x18c] ss:$16 sps:$4 sm:$0xff]   ;;  %v7540_v50 = vld [vmem:[#allocation3 + $0x308] ss:$16 sps:$4 sm:$0xff]  }
 0x392   :  { %5940 = vmatpush1.bf16.msra.mxu0 %v7489_v21  ;;  %v7545_v21 = vld [vmem:[#allocation3 + $0x4ec] ss:$16 sps:$4 sm:$0xff]  }
 0x393   :  { %6013 = vmatpush1.bf16.msra.mxu1 %v7492_v62  ;;  %5941 = vmatprep.subr.bf16.mxu0 %v7497_v56  ;;  %v7548_v62 = vld [vmem:[#allocation3 + $0x6ec] ss:$16 sps:$4 sm:$0xff]   ;;  %v7543_v56 = vld [vmem:[#allocation3 + $0x4e8] ss:$16 sps:$4 sm:$0xff]  }
 0x394   :  { %6014 = vmatprep.subr.bf16.mxu1 %v7500_v29  ;;  %v7546_v29 = vld [vmem:[#allocation3 + $0x6e8] ss:$16 sps:$4 sm:$0xff]  }
 0x396   :  { %5942 = vmatpush2.bf16.msra.mxu0 %v7495_v7  ;;  %v7551_v7 = vld [vmem:[#allocation3 + $0x4cc] ss:$16 sps:$4 sm:$0xff]  }
 0x397   :  { %6015 = vmatpush2.bf16.msra.mxu1 %v7498_v35  ;;  %5943 = vmatprep.subr.bf16.mxu0 %v7503_v15  ;;  %v7554_v35 = vld [vmem:[#allocation3 + $0x6cc] ss:$16 sps:$4 sm:$0xff]   ;;  %v7549_v15 = vld [vmem:[#allocation3 + $0x4c8] ss:$16 sps:$4 sm:$0xff]  }
 0x398   :  { %6016 = vmatprep.subr.bf16.mxu1 %v7506_v61  ;;  %v7552_v61 = vld [vmem:[#allocation3 + $0x6c8] ss:$16 sps:$4 sm:$0xff]  }
 0x39a   :  { %5944 = vmatpush2.bf16.msra.mxu0 %v7501_v4  ;;  %v7557_v4 = vld [vmem:[#allocation3 + $0x4ac] ss:$16 sps:$4 sm:$0xff]  }
 0x39b   :  { %6017 = vmatpush2.bf16.msra.mxu1 %v7504_v60  ;;  %5945 = vmatprep.subr.bf16.mxu0 %v7509_v32  ;;  %v7560_v60 = vld [vmem:[#allocation3 + $0x6ac] ss:$16 sps:$4 sm:$0xff]   ;;  %v7555_v32 = vld [vmem:[#allocation3 + $0x4a8] ss:$16 sps:$4 sm:$0xff]  }
 0x39c   :  { %6018 = vmatprep.subr.bf16.mxu1 %v7512_v55  ;;  %v7558_v55 = vld [vmem:[#allocation3 + $0x6a8] ss:$16 sps:$4 sm:$0xff]  }
 0x39e   :  { %5946 = vmatpush2.bf16.msra.mxu0 %v7507_v43  ;;  %v7561_v43 = vld [vmem:[#allocation3 + $0x488] ss:$16 sps:$4 sm:$0xff]  }
 0x39f   :  { %6019 = vmatpush2.bf16.msra.mxu1 %v7510_v38  ;;  %5947 = vmatprep.subr.bf16.mxu0 %v7515_v0  ;;  %v7564_v38 = vld [vmem:[#allocation3 + $0x688] ss:$16 sps:$4 sm:$0xff]  }
 0x3a0   :  { %6020 = vmatprep.subr.bf16.mxu1 %v7518_v2  ;;  %v7567_v0 = vld [vmem:[#allocation3 + $0x468] ss:$16 sps:$4 sm:$0xff]  }
 0x3a1   :  { %v7570_v2 = vld [vmem:[#allocation3 + $0x668] ss:$16 sps:$4 sm:$0xff]  }
 0x3a2   :  { %5948 = vmatpush2.bf16.msra.mxu0 %v7513_v17  ;;  %v7573_v17 = vld [vmem:[#allocation3 + $0x448] ss:$16 sps:$4 sm:$0xff]  }
 0x3a3   :  { %6021 = vmatpush2.bf16.msra.mxu1 %v7516_v54  ;;  %5949 = vmatprep.subr.bf16.mxu0 %v7521_v46  ;;  %v7576_v54 = vld [vmem:[#allocation3 + $0x648] ss:$16 sps:$4 sm:$0xff]  }
 0x3a4   :  { %6022 = vmatprep.subr.bf16.mxu1 %v7524_v24  ;;  %v7579_v46 = vld [vmem:[#allocation3 + $0x428] ss:$16 sps:$4 sm:$0xff]  }
 0x3a5   :  { %v7582_v24 = vld [vmem:[#allocation3 + $0x628] ss:$16 sps:$4 sm:$0xff]  }
 0x3a6   :  { %5950 = vmatpush2.bf16.msra.mxu0 %v7519_v34  ;;  %v7585_v34 = vld [vmem:[#allocation3 + $0x408] ss:$16 sps:$4 sm:$0xff]  }
 0x3a7   :  { %6023 = vmatpush2.bf16.msra.mxu1 %v7522_v45  ;;  %5951 = vmatprep.subr.bf16.mxu0 %v7527_v57  ;;  %v7588_v45 = vld [vmem:[#allocation3 + $0x608] ss:$16 sps:$4 sm:$0xff]  }
 0x3a8   :  { %6024 = vmatprep.subr.bf16.mxu1 %v7530_v13  ;;  %v7591_v57 = vld [vmem:[#allocation3 + $0x5e8] ss:$16 sps:$4 sm:$0xff]  }
 0x3a9   :  { %v7594_v13 = vld [vmem:[#allocation3 + $0x7e8] ss:$16 sps:$4 sm:$0xff]  }
 0x3aa   :  { %5952 = vmatpush2.bf16.msra.mxu0 %v7525_v47  ;;  %v7597_v47 = vld [vmem:[#allocation3 + $0x5c8] ss:$16 sps:$4 sm:$0xff]  }
 0x3ab   :  { %6025 = vmatpush2.bf16.msra.mxu1 %v7528_v44  ;;  %5953 = vmatprep.subr.bf16.mxu0 %v7533_v6  ;;  %v7600_v44 = vld [vmem:[#allocation3 + $0x7c8] ss:$16 sps:$4 sm:$0xff]   ;;  %v7605_v6 = vld [vmem:[#allocation3 + $0x5ac] ss:$16 sps:$4 sm:$0xff]  }
 0x3ac   :  { %6026 = vmatprep.subr.bf16.mxu1 %v7536_v31  ;;  %v7608_v31 = vld [vmem:[#allocation3 + $0x7ac] ss:$16 sps:$4 sm:$0xff]  }
 0x3ae   :  { %5954 = vmatpush2.bf16.msra.mxu0 %v7531_v3  ;;  %v7611_v3 = vld [vmem:[#allocation3 + $0x58c] ss:$16 sps:$4 sm:$0xff]  }
 0x3af   :  { %6027 = vmatpush2.bf16.msra.mxu1 %v7534_v27  ;;  %5955 = vmatprep.subr.bf16.mxu0 %v7539_v23  ;;  %v7614_v27 = vld [vmem:[#allocation3 + $0x78c] ss:$16 sps:$4 sm:$0xff]   ;;  %v7609_v23 = vld [vmem:[#allocation3 + $0x588] ss:$16 sps:$4 sm:$0xff]  }
 0x3b0   :  { %6028 = vmatprep.subr.bf16.mxu1 %v7542_v20  ;;  %v7612_v20 = vld [vmem:[#allocation3 + $0x788] ss:$16 sps:$4 sm:$0xff]  }
 0x3b2   :  { %5956 = vmatpush2.bf16.msra.mxu0 %v7537_v16  ;;  %v7617_v16 = vld [vmem:[#allocation3 + $0x56c] ss:$16 sps:$4 sm:$0xff]  }
 0x3b3   :  { %6029 = vmatpush2.bf16.msra.mxu1 %v7540_v50  ;;  %6071 = vmatprep.subr.bf16.mxu0 %v7545_v21  ;;  %v7620_v50 = vld [vmem:[#allocation3 + $0x76c] ss:$16 sps:$4 sm:$0xff]   ;;  %v7615_v21 = vld [vmem:[#allocation3 + $0x568] ss:$16 sps:$4 sm:$0xff]  }
 0x3b4   :  { %6144 = vmatprep.subr.bf16.mxu1 %v7548_v62  ;;  %v7618_v62 = vld [vmem:[#allocation3 + $0x768] ss:$16 sps:$4 sm:$0xff]  }
 0x3b5   :  { %5958 = vmatmul.mubr.bf16.vlgmr.msra.gmra.mxu0 %v8388_v59  ;;  %v7563_v59 = vld [vmem:[#allocation3 + $0x48c] ss:$16 sps:$4 sm:$0xff]  }
 0x3b6   :  { %6031 = vmatmul.mubr.bf16.vlgmr.msra.gmra.mxu1 %v8632_v41  ;;  %6072 = vmatpush1.bf16.msra.mxu0 %v7543_v56  ;;  %v7566_v41 = vld [vmem:[#allocation3 + $0x68c] ss:$16 sps:$4 sm:$0xff]  }
 0x3b7   :  { %6145 = vmatpush1.bf16.msra.mxu1 %v7546_v29  ;;  %6073 = vmatprep.subr.bf16.mxu0 %v7551_v7  ;;  %v7623_v56 = vld [vmem:[#allocation3 + $0x54c] ss:$16 sps:$4 sm:$0xff]   ;;  %v7621_v7 = vld [vmem:[#allocation3 + $0x548] ss:$16 sps:$4 sm:$0xff]  }
 0x3b8   :  { %6146 = vmatprep.subr.bf16.mxu1 %v7554_v35  ;;  %5967 = vmatprep.mubr.bf16.mxu0 %v8464_v8  ;;  %v7569_v8 = vld [vmem:[#allocation3 + $0x46c] ss:$16 sps:$4 sm:$0xff]   ;;  %v7624_v35 = vld [vmem:[#allocation3 + $0x748] ss:$16 sps:$4 sm:$0xff]  }
 0x3b9   :  { %6040 = vmatprep.mubr.bf16.mxu1 %v8647_v28  ;;  %v7572_v28 = vld [vmem:[#allocation3 + $0x66c] ss:$16 sps:$4 sm:$0xff]  }
 0x3ba   :  { %6074 = vmatpush1.bf16.msra.mxu0 %v7549_v15  ;;  %v7626_v29 = vld [vmem:[#allocation3 + $0x74c] ss:$16 sps:$4 sm:$0xff]  }
 0x3bb   :  { %6147 = vmatpush1.bf16.msra.mxu1 %v7552_v61  ;;  %6075 = vmatprep.subr.bf16.mxu0 %v7557_v4  ;;  %v7629_v15 = vld [vmem:[#allocation3 + $0x52c] ss:$16 sps:$4 sm:$0xff]   ;;  %v7627_v4 = vld [vmem:[#allocation3 + $0x528] ss:$16 sps:$4 sm:$0xff]  }
 0x3bc   :  { %6148 = vmatprep.subr.bf16.mxu1 %v7560_v60  ;;  %v7632_v61 = vld [vmem:[#allocation3 + $0x72c] ss:$16 sps:$4 sm:$0xff]   ;;  %v7630_v60 = vld [vmem:[#allocation3 + $0x728] ss:$16 sps:$4 sm:$0xff]  }
 0x3bd   :  { %5968 = vmatmul.mubr.bf16.gmra.mxu0 %v8453_v51  ;;  %v7575_v51 = vld [vmem:[#allocation3 + $0x44c] ss:$16 sps:$4 sm:$0xff]  }
 0x3be   :  { %6041 = vmatmul.mubr.bf16.gmra.mxu1 %v8644_v63  ;;  %6076 = vmatpush1.bf16.msra.mxu0 %v7555_v32  ;;  %v7578_v63 = vld [vmem:[#allocation3 + $0x64c] ss:$16 sps:$4 sm:$0xff]  }
 0x3bf   :  { %6149 = vmatpush1.bf16.msra.mxu1 %v7558_v55  ;;  %6077 = vmatprep.subr.bf16.mxu0 %v7563_v59  ;;  %v7635_v32 = vld [vmem:[#allocation3 + $0x50c] ss:$16 sps:$4 sm:$0xff]   ;;  %v7633_v59 = vld [vmem:[#allocation3 + $0x508] ss:$16 sps:$4 sm:$0xff]  }
 0x3c0   :  { %6150 = vmatprep.subr.bf16.mxu1 %v7566_v41  ;;  %5977 = vmatprep.mubr.bf16.mxu0 %v8502_v5  ;;  %v7581_v5 = vld [vmem:[#allocation3 + $0x42c] ss:$16 sps:$4 sm:$0xff]   ;;  %v7636_v41 = vld [vmem:[#allocation3 + $0x708] ss:$16 sps:$4 sm:$0xff]  }
 0x3c1   :  { %6050 = vmatprep.mubr.bf16.mxu1 %v8657_v25  ;;  %v7584_v25 = vld [vmem:[#allocation3 + $0x62c] ss:$16 sps:$4 sm:$0xff]  }
 0x3c2   :  { %6078 = vmatpush1.bf16.msra.mxu0 %v7561_v43  ;;  %v7638_v55 = vld [vmem:[#allocation3 + $0x70c] ss:$16 sps:$4 sm:$0xff]  }
 0x3c3   :  { %6151 = vmatpush1.bf16.msra.mxu1 %v7564_v38  ;;  %6079 = vmatprep.subr.bf16.mxu0 %v7569_v8  ;;  %v8889_v43 = vld [vmem:[#allocation8] sm:$0xf]  ;;  %v9254_v38 = vld [vmem:[#allocation42_spill] sm:$0xff] }
 0x3c4   :  { %6152 = vmatprep.subr.bf16.mxu1 %v7572_v28  ;;  %v8893_v8 = vrot.slane %v8889_v43, %v9254_v38  ;;  %v9255_v28 = vld [vmem:[#allocation43_spill] sm:$0xff] }
 0x3c5   :  { %5978 = vmatmul.mubr.bf16.gmra.mxu0 %v8496_v36  ;;  %v7587_v36 = vld [vmem:[#allocation3 + $0x40c] ss:$16 sps:$4 sm:$0xff]  }
 0x3c6   :  { %6051 = vmatmul.mubr.bf16.gmra.mxu1 %v8654_v26  ;;  %6080 = vmatpush1.bf16.msra.mxu0 %v7567_v0  ;;  %v7590_v26 = vld [vmem:[#allocation3 + $0x60c] ss:$16 sps:$4 sm:$0xff]   ;;  %v8897_v0 = vrot.slane %v8889_v43, %v9255_v28 }
 0x3c7   :  { %6153 = vmatpush1.bf16.msra.mxu1 %v7570_v2  ;;  %6081 = vmatprep.subr.bf16.mxu0 %v7575_v51 }
 0x3c8   :  { %6154 = vmatprep.subr.bf16.mxu1 %v7578_v63  ;;  %5987 = vmatprep.mubr.bf16.mxu0 %v9242_v39  ;;  %v7593_v39 = vld [vmem:[#allocation3 + $0x5ec] ss:$16 sps:$4 sm:$0xff]  }
 0x3c9   :  { %6060 = vmatprep.mubr.bf16.mxu1 %v9243_v37  ;;  %v7596_v37 = vld [vmem:[#allocation3 + $0x7ec] ss:$16 sps:$4 sm:$0xff]  }
 0x3ca   :  { %6082 = vmatpush1.bf16.msra.mxu0 %v7573_v17 }
 0x3cb   :  { %6155 = vmatpush1.bf16.msra.mxu1 %v7576_v54  ;;  %6083 = vmatprep.subr.bf16.mxu0 %v7581_v5 }
 0x3cc   :  { %6156 = vmatprep.subr.bf16.mxu1 %v7584_v25 }
 0x3cd   :  { %5988 = vmatmul.mubr.bf16.gmra.mxu0 %v9244_v42  ;;  %v7599_v42 = vld [vmem:[#allocation3 + $0x5cc] ss:$16 sps:$4 sm:$0xff]  }
 0x3ce   :  { %6061 = vmatmul.mubr.bf16.gmra.mxu1 %v9245_v48  ;;  %6084 = vmatpush1.bf16.msra.mxu0 %v7579_v46  ;;  %v7602_v48 = vld [vmem:[#allocation3 + $0x7cc] ss:$16 sps:$4 sm:$0xff]  }
 0x3cf   :  { %6157 = vmatpush1.bf16.msra.mxu1 %v7582_v24  ;;  %6085 = vmatprep.subr.bf16.mxu0 %v7587_v36 }
 0x3d0   :  { %6158 = vmatprep.subr.bf16.mxu1 %v7590_v26  ;;  %6103 = vmatprep.mubr.bf16.mxu0 %v9246_v19  ;;  %v7603_v19 = vld [vmem:[#allocation3 + $0x5a8] ss:$16 sps:$4 sm:$0xff]  }
 0x3d1   :  { %6176 = vmatprep.mubr.bf16.mxu1 %v8808_v14  ;;  %v7606_v14 = vld [vmem:[#allocation3 + $0x7a8] ss:$16 sps:$4 sm:$0xff]  }
 0x3d2   :  { %6086 = vmatpush1.bf16.msra.mxu0 %v7585_v34 }
 0x3d3   :  { %6159 = vmatpush1.bf16.msra.mxu1 %v7588_v45  ;;  %6087 = vmatprep.subr.bf16.mxu0 %v7593_v39 }
 0x3d4   :  { %6160 = vmatprep.subr.bf16.mxu1 %v7596_v37 }
 0x3d6   :  { %6088 = vmatpush2.bf16.msra.mxu0 %v7591_v57 }
 0x3d7   :  { %6161 = vmatpush2.bf16.msra.mxu1 %v7594_v13  ;;  %6089 = vmatprep.subr.bf16.mxu0 %v7599_v42 }
 0x3d8   :  { %6162 = vmatprep.subr.bf16.mxu1 %v7602_v48 }
 0x3da   :  { %6090 = vmatpush2.bf16.msra.mxu0 %v7597_v47 }
 0x3db   :  { %6163 = vmatpush2.bf16.msra.mxu1 %v7600_v44  ;;  %6091 = vmatprep.subr.bf16.mxu0 %v7605_v6 }
 0x3dc   :  { %6164 = vmatprep.subr.bf16.mxu1 %v7608_v31 }
 0x3de   :  { %6092 = vmatpush2.bf16.msra.mxu0 %v7603_v19 }
 0x3df   :  { %6165 = vmatpush2.bf16.msra.mxu1 %v7606_v14  ;;  %6093 = vmatprep.subr.bf16.mxu0 %v7611_v3 }
 0x3e0   :  { %6166 = vmatprep.subr.bf16.mxu1 %v7614_v27 }
 0x3e2   :  { %6094 = vmatpush2.bf16.msra.mxu0 %v7609_v23 }
 0x3e3   :  { %6167 = vmatpush2.bf16.msra.mxu1 %v7612_v20  ;;  %6095 = vmatprep.subr.bf16.mxu0 %v7617_v16 }
 0x3e4   :  { %6168 = vmatprep.subr.bf16.mxu1 %v7620_v50 }
 0x3e6   :  { %6096 = vmatpush2.bf16.msra.mxu0 %v7615_v21 }
 0x3e7   :  { %6169 = vmatpush2.bf16.msra.mxu1 %v7618_v62  ;;  %6097 = vmatprep.subr.bf16.mxu0 %v7623_v56 }
 0x3e8   :  { %6170 = vmatprep.subr.bf16.mxu1 %v7626_v29 }
 0x3ea   :  { %6098 = vmatpush2.bf16.msra.mxu0 %v7621_v7 }
 0x3eb   :  { %6171 = vmatpush2.bf16.msra.mxu1 %v7624_v35  ;;  %6099 = vmatprep.subr.bf16.mxu0 %v7629_v15 }
 0x3ec   :  { %6172 = vmatprep.subr.bf16.mxu1 %v7632_v61 }
 0x3ee   :  { %6100 = vmatpush2.bf16.msra.mxu0 %v7627_v4 }
 0x3ef   :  { %6173 = vmatpush2.bf16.msra.mxu1 %v7630_v60  ;;  %6101 = vmatprep.subr.bf16.mxu0 %v7635_v32 }
 0x3f0   :  { %6174 = vmatprep.subr.bf16.mxu1 %v7638_v55 }
 0x3f2   :  { %6102 = vmatpush2.bf16.msra.mxu0 %v7633_v59 }
 0x3f3   :  { %6175 = vmatpush2.bf16.msra.mxu1 %v7636_v41 }
 0x3f5   :  { %v5667_v2 = vpop.f32.mrf.mxu0  ;;  %6104 = vmatmul.mubr.bf16.vlgmr.msra.gmra.mxu0 %v9247_v22 }
 0x3f6   :  { %v5740_v51 = vpop.f32.mrf.mxu1  ;;  %6177 = vmatmul.mubr.bf16.vlgmr.msra.gmra.mxu1 %v8800_v53  ;;  %v5668_v63 = vadd.f32 %v5667_v2, %v8893_v8  ;;  %6113 = vmatprep.mubr.bf16.mxu0 %v9248_v52 }
 0x3f7   :  { %6186 = vmatprep.mubr.bf16.mxu1 %v8822_v12  ;;  %v5669_v17 = vpop.f32.mrf.mxu0 }
 0x3f8   :  { %v5742_v54 = vpop.f32.mrf.mxu1  ;;  %v8904_v5 = vadd.f32 %v5740_v51, %v5668_v63  ;;  %v5670_v25 = vadd.f32 %v5669_v17, %v8897_v0 }
 0x3f9   :  { %v5671_v46 = vpop.f32.mrf.mxu0 }
 0x3fa   :  { %v5744_v24 = vpop.f32.mrf.mxu1  ;;  %v8907_v36 = vadd.f32 %v5742_v54, %v5670_v25  ;;  %v5672_v22 = vadd.f32 %v5671_v46, %v8893_v8 }
 0x3fb   :  { %v5673_v26 = vpop.f32.mrf.mxu0 }
 0x3fc   :  { %v5746_v53 = vpop.f32.mrf.mxu1  ;;  %v8910_v34 = vadd.f32 %v5744_v24, %v5672_v22  ;;  %v5674_v52 = vadd.f32 %v5673_v26, %v8897_v0 }
 0x3fd   :  { %6114 = vmatmul.mubr.bf16.gmra.mxu0 %v9249_v18  ;;  %v5677_v12 = vpop.f32.mrf.mxu0 }
 0x3fe   :  { %6187 = vmatmul.mubr.bf16.gmra.mxu1 %v8819_v30  ;;  %v5750_v45 = vpop.f32.mrf.mxu1  ;;  %v8915_v39 = vadd.f32 %v5746_v53, %v5674_v52  ;;  %6123 = vmatprep.mubr.bf16.mxu0 %v9250_v58  ;;  %v5678_v37 = vadd.f32 %v5677_v12, %v8893_v8 }
 0x3ff   :  { %6196 = vmatprep.mubr.bf16.mxu1 %v8833_v49  ;;  %v5679_v57 = vpop.f32.mrf.mxu0 }
 0x400   :  { %v5752_v13 = vpop.f32.mrf.mxu1  ;;  %v5680_v42 = vadd.f32 %v5679_v57, %v8897_v0  ;;  %v8921_v48 = vadd.f32 %v5750_v45, %v5678_v37 }
 0x401   :  { %v5681_v47 = vpop.f32.mrf.mxu0 }
 0x402   :  { %v5754_v18 = vpop.f32.mrf.mxu1  ;;  %v5682_v30 = vadd.f32 %v5681_v47, %v8893_v8  ;;  %v8924_v44 = vadd.f32 %v5752_v13, %v5680_v42 }
 0x403   :  { %v5683_v6 = vpop.f32.mrf.mxu0 }
 0x404   :  { %v5756_v31 = vpop.f32.mrf.mxu1  ;;  %v5684_v58 = vadd.f32 %v5683_v6, %v8897_v0  ;;  %v8927_v19 = vadd.f32 %v5754_v18, %v5682_v30 }
 0x405   :  { %6124 = vmatmul.mubr.bf16.gmra.mxu0 %v9251_v9  ;;  %v5687_v49 = vpop.f32.mrf.mxu0 }
 0x406   :  { %6197 = vmatmul.mubr.bf16.gmra.mxu1 %v8831_v10  ;;  %v5760_v14 = vpop.f32.mrf.mxu1  ;;  %6133 = vmatprep.mubr.bf16.mxu0 %v9252_v1  ;;  %v5688_v3 = vadd.f32 %v5687_v49, %v8893_v8  ;;  %v8934_v27 = vadd.f32 %v5756_v31, %v5684_v58 }
 0x407   :  { %6206 = vmatprep.mubr.bf16.mxu1 %v8837_v33  ;;  %v5689_v23 = vpop.f32.mrf.mxu0 }
 0x408   :  { %v5762_v20 = vpop.f32.mrf.mxu1  ;;  %v5690_v16 = vadd.f32 %v5689_v23, %v8897_v0  ;;  %v8937_v50 = vadd.f32 %v5760_v14, %v5688_v3 }
 0x409   :  { %v5691_v21 = vpop.f32.mrf.mxu0 }
 0x40a   :  { %v5764_v9 = vpop.f32.mrf.mxu1  ;;  %v5692_v10 = vadd.f32 %v5691_v21, %v8893_v8  ;;  %v8940_v62 = vadd.f32 %v5762_v20, %v5690_v16 }
 0x40b   :  { %v5693_v56 = vpop.f32.mrf.mxu0 }
 0x40c   :  { %v5766_v1 = vpop.f32.mrf.mxu1  ;;  %v5694_v33 = vadd.f32 %v5693_v56, %v8897_v0  ;;  %v8943_v29 = vadd.f32 %v5764_v9, %v5692_v10 }
 0x40d   :  { %6134 = vmatmul.mubr.bf16.gmra.mxu0 %v9253_v40  ;;  %v5697_v7 = vpop.f32.mrf.mxu0 }
 0x40e   :  { %6207 = vmatmul.mubr.bf16.gmra.mxu1 %v8835_v11  ;;  %v5770_v35 = vpop.f32.mrf.mxu1  ;;  %v5698_v15 = vadd.f32 %v5697_v7, %v8893_v8  ;;  %v8948_v61 = vadd.f32 %v5766_v1, %v5694_v33 }
 0x40f   :  { %v5699_v4 = vpop.f32.mrf.mxu0 }
 0x410   :  { %v5772_v60 = vpop.f32.mrf.mxu1  ;;  %v5700_v32 = vadd.f32 %v5699_v4, %v8897_v0  ;;  %v8951_v55 = vadd.f32 %v5770_v35, %v5698_v15  ;;  %v9256_v15 = vld [vmem:[#allocation21_spill] sm:$0xff] }
 0x411   :  { %v5701_v59 = vpop.f32.mrf.mxu0  ;;  %v8970_v4 = vrot.slane %v9256_v15, %v9254_v38 }
 0x412   :  { %v5774_v41 = vpop.f32.mrf.mxu1  ;;  %v5702_v2 = vadd.f32 %v5701_v59, %v8893_v8  ;;  %v8954_v51 = vadd.f32 %v5772_v60, %v5700_v32  ;;  %v8974_v32 = vrot.slane %v9256_v15, %v9255_v28 }
 0x413   :  { %v5703_v40 = vpop.f32.mrf.mxu0 }
 0x414   :  { %v5776_v11 = vpop.f32.mrf.mxu1  ;;  %v5704_v63 = vadd.f32 %v5703_v40, %v8897_v0  ;;  %v8957_v17 = vadd.f32 %v5774_v41, %v5702_v2 }
 0x416   :  { %v8959_v54 = vadd.f32 %v5776_v11, %v5704_v63 }
 0x435   :  { %v5813_v25 = vpop.f32.mrf.mxu0 }
 0x436   :  { %v5886_v46 = vpop.f32.mrf.mxu1  ;;  %v5814_v24 = vadd.f32 %v5813_v25, %v8904_v5 }
 0x437   :  { %v5815_v22 = vpop.f32.mrf.mxu0 }
 0x438   :  { %v5888_v26 = vpop.f32.mrf.mxu1  ;;  %v5887_v53 = vadd.f32 %v5886_v46, %v5814_v24  ;;  %v5816_v52 = vadd.f32 %v5815_v22, %v8907_v36 }
 0x439   :  { %v5817_v8 = vpop.f32.mrf.mxu0 }
 0x43a   :  { %v5890_v12 = vpop.f32.mrf.mxu1  ;;  %v5889_v45 = vadd.f32 %v5888_v26, %v5816_v52  ;;  %v5818_v37 = vadd.f32 %v5817_v8, %v8910_v34  ;;  %v6249_v57 = vmul.f32 0.2, %v5887_v53  ;;  %vm6217_vm0 = vcmp.gt.f32.partialorder %v5887_v53, 0.0 }
 0x43b   :  { %v5819_v0 = vpop.f32.mrf.mxu0 }
 0x43c   :  { %v5892_v13 = vpop.f32.mrf.mxu1  ;;  %v5891_v42 = vadd.f32 %v5890_v12, %v5818_v37  ;;  %v5820_v47 = vadd.f32 %v5819_v0, %v8915_v39  ;;  %v6281_v31 = vsel %vm6217_vm0, %v5887_v53, %v6249_v57  ;;  %v6250_v36 = vmul.f32 0.2, %v5889_v45 }
 0x43d   :  { %v5823_v18 = vpop.f32.mrf.mxu0  ;;  %vm6218_vm4 = vcmp.gt.f32.partialorder %v5889_v45, 0.0 }
 0x43e   :  { %v5896_v30 = vpop.f32.mrf.mxu1  ;;  %vm6221_vm3 = vcmp.gt.f32.partialorder %v5891_v42, 0.0  ;;  %v6253_v5 = vmul.f32 0.2, %v5891_v42  ;;  %v5824_v6 = vadd.f32 %v5823_v18, %v8921_v48  ;;  %v5893_v58 = vadd.f32 %v5892_v13, %v5820_v47 }
 0x43f   :  { %v5825_v49 = vpop.f32.mrf.mxu0  ;;  %v6282_v56 = vsel %vm6218_vm4, %v5889_v45, %v6250_v36 }
 0x440   :  { %v5898_v14 = vpop.f32.mrf.mxu1  ;;  %v6285_v34 = vsel %vm6221_vm3, %v5891_v42, %v6253_v5  ;;  %v5826_v3 = vadd.f32 %v5825_v49, %v8924_v44  ;;  %v5897_v23 = vadd.f32 %v5896_v30, %v5824_v6  ;;  %vm6222_vm5 = vcmp.gt.f32.partialorder %v5893_v58, 0.0 }
 0x441   :  { %v6313_v20 = vpack.c.bf16 %v6285_v34, %v6281_v31  ;;  %v6254_v16 = vmul.f32 0.2, %v5893_v58  ;;  %v5827_v39 = vpop.f32.mrf.mxu0 }
 0x442   :  { %v5900_v21 = vpop.f32.mrf.mxu1  ;;  %vm6225_vm6 = vcmp.gt.f32.partialorder %v5897_v23, 0.0  ;;  %v6257_v9 = vmul.f32 0.2, %v5897_v23  ;;  %v5828_v10 = vadd.f32 %v5827_v39, %v8927_v19  ;;  %v5899_v48 = vadd.f32 %v5898_v14, %v5826_v3 }
 0x443   :  { %v6286_v1 = vsel %vm6222_vm5, %v5893_v58, %v6254_v16  ;;  %v5829_v33 = vpop.f32.mrf.mxu0  ;;  %v6329_v35 = vunpack.c.l.bf16 %v6313_v20  ;;  %v6333_v44 = vunpack.c.h.bf16 %v6313_v20 }
 0x444   :  { %v5902_v7 = vpop.f32.mrf.mxu1  ;;  %v6314_v60 = vpack.c.bf16 %v6286_v1, %v6282_v56  ;;  %v6289_v59 = vsel %vm6225_vm6, %v5897_v23, %v6257_v9  ;;  %vm6226_vm7 = vcmp.gt.f32.partialorder %v5899_v48, 0.0  ;;  %v5830_v19 = vadd.f32 %v5829_v33, %v8934_v27 }
 0x445   :  { %v5901_v41 = vadd.f32 %v5900_v21, %v5828_v10  ;;  %v5833_v2 = vpop.f32.mrf.mxu0  ;;  %v6258_v63 = vmul.f32 0.2, %v5899_v48  ;;  %v6382_v28 = vmul.f32 %v8970_v4, %v6329_v35  ;;  %v6386_v8 = vmul.f32 %v8970_v4, %v6333_v44 }
 0x446   :  { %v5906_v40 = vpop.f32.mrf.mxu1  ;;  %v6334_v11 = vunpack.c.h.bf16 %v6314_v60  ;;  %v5834_v25 = vadd.f32 %v5833_v2, %v8937_v50  ;;  %v6330_v46 = vunpack.c.l.bf16 %v6314_v60  ;;  %v5903_v24 = vadd.f32 %v5902_v7, %v5830_v19 }
 0x447   :  { %vm6229_vm8 = vcmp.gt.f32.partialorder %v5901_v41, 0.0  ;;  %v6261_v38 = vmul.f32 0.2, %v5901_v41  ;;  %v5835_v22 = vpop.f32.mrf.mxu0  ;;  %v6290_v0 = vsel %vm6226_vm7, %v5899_v48, %v6258_v63 }
 0x448   :  { %v5908_v26 = vpop.f32.mrf.mxu1  ;;  %v5836_v53 = vadd.f32 %v5835_v22, %v8940_v62  ;;  %v5907_v52 = vadd.f32 %v5906_v40, %v5834_v25  ;;  %v6383_v27 = vmul.f32 %v8974_v32, %v6330_v46  ;;  %vm6230_vm9 = vcmp.gt.f32.partialorder %v5903_v24, 0.0 }
 0x449   :  { %v6293_v12 = vsel %vm6229_vm8, %v5901_v41, %v6261_v38  ;;  %v6262_v45 = vmul.f32 0.2, %v5903_v24  ;;  %v5837_v37 = vpop.f32.mrf.mxu0  ;;  %v6387_v57 = vmul.f32 %v8974_v32, %v6334_v11 }
 0x44a   :  { %v5910_v50 = vpop.f32.mrf.mxu1  ;;  %v6317_v13 = vpack.c.bf16 %v6293_v12, %v6289_v59  ;;  %v6265_v42 = vmul.f32 0.2, %v5907_v52  ;;  %v5838_v47 = vadd.f32 %v5837_v37, %v8943_v29  ;;  %v5909_v62 = vadd.f32 %v5908_v26, %v5836_v53 }
 0x44b   :  { %v6294_v18 = vsel %vm6230_vm9, %v5903_v24, %v6262_v45  ;;  %v5839_v30 = vpop.f32.mrf.mxu0  ;;  %v8985_v6 = vadd.f32 %v6383_v27, %v6382_v28  ;;  %v8987_v31 = vadd.f32 %v6387_v57, %v6386_v8  ;;  %vm6233_vm10 = vcmp.gt.f32.partialorder %v5907_v52, 0.0 }
 0x44c   :  { %v5912_v5 = vpop.f32.mrf.mxu1  ;;  %v6341_v36 = vunpack.c.h.bf16 %v6317_v13  ;;  %v6318_v58 = vpack.c.bf16 %v6294_v18, %v6290_v0  ;;  %v5840_v49 = vadd.f32 %v5839_v30, %v8948_v61  ;;  %vm6234_vm11 = vcmp.gt.f32.partialorder %v5909_v62, 0.0 }
 0x44d   :  { %v6266_v14 = vmul.f32 0.2, %v5909_v62  ;;  %v5911_v34 = vadd.f32 %v5910_v50, %v5838_v47  ;;  %v5843_v3 = vpop.f32.mrf.mxu0  ;;  %v6337_v20 = vunpack.c.l.bf16 %v6317_v13  ;;  %v6297_v9 = vsel %vm6233_vm10, %v5907_v52, %v6265_v42 }
 0x44e   :  { %v5916_v23 = vpop.f32.mrf.mxu1  ;;  %v6342_v29 = vunpack.c.h.bf16 %v6318_v58  ;;  %v5844_v16 = vadd.f32 %v5843_v3, %v8951_v55  ;;  %v5913_v39 = vadd.f32 %v5912_v5, %v5840_v49  ;;  %v6338_v21 = vunpack.c.l.bf16 %v6318_v58 }
 0x44f   :  { %vm6237_vm12 = vcmp.gt.f32.partialorder %v5911_v34, 0.0  ;;  %v6269_v10 = vmul.f32 0.2, %v5911_v34  ;;  %v5845_v48 = vpop.f32.mrf.mxu0  ;;  %v6298_v7 = vsel %vm6234_vm11, %v5909_v62, %v6266_v14  ;;  %v6390_v59 = vmul.f32 %v8970_v4, %v6337_v20 }
 0x450   :  { %v5918_v56 = vpop.f32.mrf.mxu1  ;;  %vm6238_vm13 = vcmp.gt.f32.partialorder %v5913_v39, 0.0  ;;  %v6270_v1 = vmul.f32 0.2, %v5913_v39  ;;  %v5846_v61 = vadd.f32 %v5845_v48, %v8954_v51  ;;  %v5917_v33 = vadd.f32 %v5916_v23, %v5844_v16 }
 0x451   :  { %v6301_v35 = vsel %vm6237_vm12, %v5911_v34, %v6269_v10  ;;  %v5847_v44 = vpop.f32.mrf.mxu0  ;;  %v6391_v55 = vmul.f32 %v8974_v32, %v6338_v21  ;;  %v6394_v2 = vmul.f32 %v8970_v4, %v6341_v36  ;;  %v6395_v40 = vmul.f32 %v8974_v32, %v6342_v29 }
 0x452   :  { %v5920_v60 = vpop.f32.mrf.mxu1  ;;  %v6321_v19 = vpack.c.bf16 %v6301_v35, %v6297_v9  ;;  %v6302_v41 = vsel %vm6238_vm13, %v5913_v39, %v6270_v1  ;;  %v5848_v63 = vadd.f32 %v5847_v44, %v8957_v17  ;;  %v5919_v51 = vadd.f32 %v5918_v56, %v5846_v61 }
 0x453   :  { %v6322_v11 = vpack.c.bf16 %v6302_v41, %v6298_v7  ;;  %v5849_v25 = vpop.f32.mrf.mxu0  ;;  %v8998_v38 = vadd.f32 %v6391_v55, %v6390_v59  ;;  %vm6241_vm14 = vcmp.gt.f32.partialorder %v5917_v33, 0.0  ;;  %v6273_v52 = vmul.f32 0.2, %v5917_v33 }
 0x454   :  { %v5922_v46 = vpop.f32.mrf.mxu1  ;;  %v6345_v24 = vunpack.c.l.bf16 %v6321_v19  ;;  %v6349_v22 = vunpack.c.h.bf16 %v6321_v19  ;;  %v5850_v26 = vadd.f32 %v5849_v25, %v8959_v54  ;;  %vm6242_vm15 = vcmp.gt.f32.partialorder %v5919_v51, 0.0 }
 0x455   :  { %v6346_v28 = vunpack.c.l.bf16 %v6322_v11  ;;  %v6350_v53 = vunpack.c.h.bf16 %v6322_v11  ;;  %v6274_v27 = vmul.f32 0.2, %v5919_v51  ;;  %v5921_v8 = vadd.f32 %v5920_v60, %v5848_v63 }
 0x456   :  { %v5923_v12 = vadd.f32 %v5922_v46, %v5850_v26  ;;  %v9001_v45 = vadd.f32 %v6395_v40, %v6394_v2  ;;  %v6402_v17 = vmul.f32 %v8970_v4, %v6349_v22  ;;  %v6398_v50 = vmul.f32 %v8970_v4, %v6345_v24 }
 0x457   :  { %v6403_v37 = vmul.f32 %v8974_v32, %v6350_v53  ;;  %v6399_v57 = vmul.f32 %v8974_v32, %v6346_v28  ;;  %vm6245_vm1 = vcmp.gt.f32.partialorder %v5921_v8, 0.0  ;;  %v6277_v0 = vmul.f32 0.2, %v5921_v8  ;;  %v9258_v28 = vld [vmem:[#allocation36_spill] sm:$0xff] }
 0x458   :  { %vm6246_vm2 = vcmp.gt.f32.partialorder %v5923_v12, 0.0  ;;  %v6278_v54 = vmul.f32 0.2, %v5923_v12  ;;  %v6305_v47 = vsel %vm6241_vm14, %v5917_v33, %v6273_v52  ;;  %v6306_v18 = vsel %vm6242_vm15, %v5919_v51, %v6274_v27  ;;  %v9259_v52 = vld [vmem:[#allocation37_spill] sm:$0xff] }
 0x459   :  { %v9007_v13 = vadd.f32 %v6403_v37, %v6402_v17  ;;  %v9009_v42 = vadd.f32 %v6399_v57, %v6398_v50  ;;  %v6309_v62 = vsel %vm6245_vm1, %v5921_v8, %v6277_v0  ;;  %v4344_v53 = vrot.slane %v8889_v43, %v9258_v28 }
 0x45a   :  { %v6310_v30 = vsel %vm6246_vm2, %v5923_v12, %v6278_v54  ;;  %v6325_v5 = vpack.c.bf16 %v6309_v62, %v6305_v47  ;;  %v4348_v27 = vrot.slane %v8889_v43, %v9259_v52 }
 0x45b   :  { %v6326_v36 = vpack.c.bf16 %v6310_v30, %v6306_v18 }
 0x45c   :  { %v6353_v58 = vunpack.c.l.bf16 %v6325_v5  ;;  %v6357_v49 = vunpack.c.h.bf16 %v6325_v5 }
 0x45d   :  { %v6354_v14 = vunpack.c.l.bf16 %v6326_v36  ;;  %v6358_v34 = vunpack.c.h.bf16 %v6326_v36 }
 0x45e   :  { %v6410_v3 = vmul.f32 %v8970_v4, %v6357_v49  ;;  %v6406_v20 = vmul.f32 %v8970_v4, %v6353_v58 }
 0x45f   :  { %v6411_v23 = vmul.f32 %v8974_v32, %v6358_v34  ;;  %v6407_v29 = vmul.f32 %v8974_v32, %v6354_v14 }
 0x461   :  { %v9017_v16 = vadd.f32 %v6411_v23, %v6410_v3  ;;  %v9019_v39 = vadd.f32 %v6407_v29, %v6406_v20  ;;  %v9031_v23 = vrot.slane %v9256_v15, %v9258_v28  ;;  %v9035_v20 = vrot.slane %v9256_v15, %v9259_v52 }
 0x463   :  { %9257 = vst [vmem:[#allocation27_spill] sm:$0xff] %v9019_v39 }
 0x475   :  { %v5959_v21 = vpop.f32.mrf.mxu0 }
 0x476   :  { %v6032_v9 = vpop.f32.mrf.mxu1  ;;  %v5960_v17 = vadd.f32 %v5959_v21, %v4344_v53 }
 0x477   :  { %v5961_v10 = vpop.f32.mrf.mxu0 }
 0x478   :  { %v6034_v48 = vpop.f32.mrf.mxu1  ;;  %v5962_v37 = vadd.f32 %v5961_v10, %v4348_v27  ;;  %v6033_v0 = vadd.f32 %v6032_v9, %v5960_v17 }
 0x479   :  { %v5963_v56 = vpop.f32.mrf.mxu0 }
 0x47a   :  { %v6036_v1 = vpop.f32.mrf.mxu1  ;;  %v5964_v54 = vadd.f32 %v5963_v56, %v4344_v53  ;;  %v6035_v47 = vadd.f32 %v6034_v48, %v5962_v37 }
 0x47b   :  { %v5965_v61 = vpop.f32.mrf.mxu0 }
 0x47c   :  { %v6038_v33 = vpop.f32.mrf.mxu1  ;;  %v5966_v18 = vadd.f32 %v5965_v61, %v4348_v27  ;;  %v6037_v29 = vadd.f32 %v6036_v1, %v5964_v54 }
 0x47d   :  { %v5969_v7 = vpop.f32.mrf.mxu0 }
 0x47e   :  { %v6042_v35 = vpop.f32.mrf.mxu1  ;;  %v5970_v5 = vadd.f32 %v5969_v7, %v4344_v53  ;;  %v6039_v48 = vadd.f32 %v6038_v33, %v5966_v18 }
 0x47f   :  { %v5971_v44 = vpop.f32.mrf.mxu0 }
 0x480   :  { %v6044_v60 = vpop.f32.mrf.mxu1  ;;  %v5972_v36 = vadd.f32 %v5971_v44, %v4348_v27 }
 0x481   :  { %v5973_v59 = vpop.f32.mrf.mxu0 }
 0x482   :  { %v6046_v4 = vpop.f32.mrf.mxu1  ;;  %v5974_v58 = vadd.f32 %v5973_v59, %v4344_v53 }
 0x483   :  { %v5975_v55 = vpop.f32.mrf.mxu0 }
 0x484   :  { %v6048_v32 = vpop.f32.mrf.mxu1  ;;  %v5976_v14 = vadd.f32 %v5975_v55, %v4348_v27  ;;  %v6043_v55 = vadd.f32 %v6042_v35, %v5970_v5  ;;  %v6047_v17 = vadd.f32 %v6046_v4, %v5974_v58 }
 0x485   :  { %v5979_v19 = vpop.f32.mrf.mxu0 }
 0x486   :  { %v6052_v41 = vpop.f32.mrf.mxu1  ;;  %v5980_v43 = vadd.f32 %v5979_v19, %v4344_v53  ;;  %v6045_v19 = vadd.f32 %v6044_v60, %v5972_v36  ;;  %v6049_v28 = vadd.f32 %v6048_v32, %v5976_v14 }
 0x487   :  { %v5981_v2 = vpop.f32.mrf.mxu0 }
 0x488   :  { %v6054_v40 = vpop.f32.mrf.mxu1  ;;  %v5982_v21 = vadd.f32 %v5981_v2, %v4348_v27 }
 0x489   :  { %v5983_v11 = vpop.f32.mrf.mxu0 }
 0x48a   :  { %v6056_v63 = vpop.f32.mrf.mxu1  ;;  %v5984_v56 = vadd.f32 %v5983_v11, %v4344_v53  ;;  %v6055_v1 = vadd.f32 %v6054_v40, %v5982_v21 }
 0x48b   :  { %v5985_v51 = vpop.f32.mrf.mxu0 }
 0x48c   :  { %v6058_v25 = vpop.f32.mrf.mxu1  ;;  %v5986_v61 = vadd.f32 %v5985_v51, %v4348_v27  ;;  %v9037_v33 = vadd.f32 %v6056_v63, %v5984_v56 }
 0x48d   :  { %v5989_v46 = vpop.f32.mrf.mxu0 }
 0x48e   :  { %v6062_v24 = vpop.f32.mrf.mxu1  ;;  %v5990_v7 = vadd.f32 %v5989_v46, %v4344_v53  ;;  %v9039_v11 = vadd.f32 %v6058_v25, %v5986_v61 }
 0x48f   :  { %v5991_v22 = vpop.f32.mrf.mxu0 }
 0x490   :  { %v6064_v26 = vpop.f32.mrf.mxu1  ;;  %v9041_v51 = vadd.f32 %v6062_v24, %v5990_v7 }
 0x491   :  { %v5993_v8 = vpop.f32.mrf.mxu0 }
 0x492   :  { %v9025_v12 = vpop.f32.mrf.mxu1  ;;  %v5994_v46 = vadd.f32 %v5993_v8, %v4344_v53 }
 0x493   :  { %v5995_v50 = vpop.f32.mrf.mxu0 }
 0x494   :  { %v9027_v57 = vpop.f32.mrf.mxu1 }
 0x4b5   :  { %v6105_v62 = vpop.f32.mrf.mxu0 }
 0x4b6   :  { %v6178_v30 = vpop.f32.mrf.mxu1  ;;  %v6106_v49 = vadd.f32 %v6105_v62, %v6033_v0  ;;  %v6053_v0 = vadd.f32 %v6052_v41, %v5980_v43  ;;  %v5992_v62 = vadd.f32 %v5991_v22, %v4348_v27 }
 0x4b7   :  { %v6107_v34 = vpop.f32.mrf.mxu0 }
 0x4b8   :  { %v6180_v3 = vpop.f32.mrf.mxu1  ;;  %v6179_v9 = vadd.f32 %v6178_v30, %v6106_v49  ;;  %v6108_v10 = vadd.f32 %v6107_v34, %v6035_v47  ;;  %v9043_v22 = vadd.f32 %v6064_v26, %v5992_v62  ;;  %v9045_v47 = vadd.f32 %v5995_v50, %v4348_v27 }
 0x4b9   :  { %v6109_v44 = vpop.f32.mrf.mxu0  ;;  %v9048_v27 = vadd.f32 %v9025_v12, %v5994_v46 }
 0x4ba   :  { %v6182_v59 = vpop.f32.mrf.mxu1  ;;  %v6110_v37 = vadd.f32 %v6109_v44, %v6037_v29  ;;  %v6251_v39 = vmul.f32 0.2, %v6179_v9  ;;  %vm6219_vm0 = vcmp.gt.f32.partialorder %v6179_v9, 0.0  ;;  %v6181_v2 = vadd.f32 %v6180_v3, %v6108_v10 }
 0x4bb   :  { %v6111_v15 = vpop.f32.mrf.mxu0 }
 0x4bc   :  { %v6184_v52 = vpop.f32.mrf.mxu1  ;;  %v6183_v54 = vadd.f32 %v6182_v59, %v6110_v37  ;;  %v6112_v35 = vadd.f32 %v6111_v15, %v6039_v48  ;;  %v6283_v40 = vsel %vm6219_vm0, %v6179_v9, %v6251_v39  ;;  %v6252_v5 = vmul.f32 0.2, %v6181_v2 }
 0x4bd   :  { %v6115_v60 = vpop.f32.mrf.mxu0  ;;  %vm6220_vm4 = vcmp.gt.f32.partialorder %v6181_v2, 0.0  ;;  %vm6516_vm0 = vcmask 7168  }
 0x4be   :  { %v6188_v4 = vpop.f32.mrf.mxu1  ;;  %vm6223_vm3 = vcmp.gt.f32.partialorder %v6183_v54, 0.0  ;;  %v6255_v32 = vmul.f32 0.2, %v6183_v54  ;;  %v6116_v41 = vadd.f32 %v6115_v60, %v6043_v55  ;;  %v6185_v18 = vadd.f32 %v6184_v52, %v6112_v35 }
 0x4bf   :  { %v6117_v30 = vpop.f32.mrf.mxu0  ;;  %v6284_v21 = vsel %vm6220_vm4, %v6181_v2, %v6252_v5 }
 0x4c0   :  { %v6190_v63 = vpop.f32.mrf.mxu1  ;;  %v6287_v25 = vsel %vm6223_vm3, %v6183_v54, %v6255_v32  ;;  %v6189_v36 = vadd.f32 %v6188_v4, %v6116_v41  ;;  %v6118_v24 = vadd.f32 %v6117_v30, %v6045_v19  ;;  %vm6224_vm5 = vcmp.gt.f32.partialorder %v6185_v18, 0.0 }
 0x4c1   :  { %v6315_v58 = vpack.c.bf16 %v6287_v25, %v6283_v40  ;;  %v6256_v49 = vmul.f32 0.2, %v6185_v18  ;;  %v6119_v53 = vpop.f32.mrf.mxu0 }
 0x4c2   :  { %v6192_v8 = vpop.f32.mrf.mxu1  ;;  %vm6227_vm6 = vcmp.gt.f32.partialorder %v6189_v36, 0.0  ;;  %v6259_v14 = vmul.f32 0.2, %v6189_v36  ;;  %v6191_v26 = vadd.f32 %v6190_v63, %v6118_v24  ;;  %v6120_v43 = vadd.f32 %v6119_v53, %v6047_v17 }
 0x4c3   :  { %v6288_v39 = vsel %vm6224_vm5, %v6185_v18, %v6256_v49  ;;  %v6121_v50 = vpop.f32.mrf.mxu0  ;;  %v6331_v3 = vunpack.c.l.bf16 %v6315_v58  ;;  %v6335_v29 = vunpack.c.h.bf16 %v6315_v58 }
 0x4c4   :  { %v6194_v34 = vpop.f32.mrf.mxu1  ;;  %v6291_v9 = vsel %vm6227_vm6, %v6189_v36, %v6259_v14  ;;  %vm6228_vm7 = vcmp.gt.f32.partialorder %v6191_v26, 0.0  ;;  %v6193_v10 = vadd.f32 %v6192_v8, %v6120_v43  ;;  %v6122_v48 = vadd.f32 %v6121_v50, %v6049_v28 }
 0x4c5   :  { %v6125_v56 = vpop.f32.mrf.mxu0  ;;  %v6316_v7 = vpack.c.bf16 %v6288_v39, %v6284_v21  ;;  %v6384_v44 = vmul.f32 %v9031_v23, %v6331_v3  ;;  %v6388_v59 = vmul.f32 %v9031_v23, %v6335_v29  ;;  %v6260_v12 = vmul.f32 0.2, %v6191_v26 }
 0x4c6   :  { %v6198_v61 = vpop.f32.mrf.mxu1  ;;  %vm6231_vm8 = vcmp.gt.f32.partialorder %v6193_v10, 0.0  ;;  %v6263_v55 = vmul.f32 0.2, %v6193_v10  ;;  %v6126_v19 = vadd.f32 %v6125_v56, %v6053_v0  ;;  %v6195_v17 = vadd.f32 %v6194_v34, %v6122_v48 }
 0x4c7   :  { %v6127_v37 = vpop.f32.mrf.mxu0  ;;  %v6332_v15 = vunpack.c.l.bf16 %v6316_v7  ;;  %v6415_v52 = vadd.f32 %v8985_v6, %v6384_v44  ;;  %v6336_v2 = vunpack.c.h.bf16 %v6316_v7  ;;  %v6420_v60 = vadd.f32 %v8987_v31, %v6388_v59 }
 0x4c8   :  { %v6200_v62 = vpop.f32.mrf.mxu1  ;;  %v6295_v54 = vsel %vm6231_vm8, %v6193_v10, %v6263_v55  ;;  %v6199_v28 = vadd.f32 %v6198_v61, %v6126_v19  ;;  %v6128_v35 = vadd.f32 %v6127_v37, %v6055_v1  ;;  %vm6232_vm9 = vcmp.gt.f32.partialorder %v6195_v17, 0.0 }
 0x4c9   :  { %v6319_v4 = vpack.c.bf16 %v6295_v54, %v6291_v9  ;;  %v6264_v46 = vmul.f32 0.2, %v6195_v17  ;;  %v6129_v32 = vpop.f32.mrf.mxu0  ;;  %v6385_v40 = vmul.f32 %v9035_v20, %v6332_v15  ;;  %v6389_v1 = vmul.f32 %v9035_v20, %v6336_v2 }
 0x4ca   :  { %v6202_v41 = vpop.f32.mrf.mxu1  ;;  %vm6235_vm10 = vcmp.gt.f32.partialorder %v6199_v28, 0.0  ;;  %v6267_v0 = vmul.f32 0.2, %v6199_v28  ;;  %v6201_v18 = vadd.f32 %v6200_v62, %v6128_v35  ;;  %v6130_v30 = vadd.f32 %v6129_v32, %v9037_v33 }
 0x4cb   :  { %v6296_v63 = vsel %vm6232_vm9, %v6195_v17, %v6264_v46  ;;  %v6131_v6 = vpop.f32.mrf.mxu0  ;;  %v6416_v25 = vadd.f32 %v6415_v52, %v6385_v40  ;;  %v6339_v36 = vunpack.c.l.bf16 %v6319_v4  ;;  %v6292_v31 = vsel %vm6228_vm7, %v6191_v26, %v6260_v12 }
 0x4cc   :  { %v6204_v5 = vpop.f32.mrf.mxu1  ;;  %v6299_v24 = vsel %vm6235_vm10, %v6199_v28, %v6267_v0  ;;  %vm6236_vm11 = vcmp.gt.f32.partialorder %v6201_v18, 0.0  ;;  %v6203_v58 = vadd.f32 %v6202_v41, %v6130_v30  ;;  %v6268_v49 = vmul.f32 0.2, %v6201_v18 }
 0x4cd   :  { %v6132_v53 = vadd.f32 %v6131_v6, %v9039_v11  ;;  %6417 = vadd.xlane.f32.xlu0 %v6416_v25  ;;  %v6135_v8 = vpop.f32.mrf.mxu0  ;;  %v6320_v43 = vpack.c.bf16 %v6296_v63, %v6292_v31  ;;  %v6392_v33 = vmul.f32 %v9031_v23, %v6339_v36  ;;  %v6421_v34 = vadd.f32 %v6420_v60, %v6389_v1 }
 0x4ce   :  { %v6208_v14 = vpop.f32.mrf.mxu1  ;;  %vm6239_vm12 = vcmp.gt.f32.partialorder %v6203_v58, 0.0  ;;  %v6271_v39 = vmul.f32 0.2, %v6203_v58  ;;  %v6136_v50 = vadd.f32 %v6135_v8, %v9041_v51  ;;  %v6343_v10 = vunpack.c.h.bf16 %v6319_v4 }
 0x4cf   :  { %v6205_v3 = vadd.f32 %v6204_v5, %v6132_v53  ;;  %v6137_v29 = vpop.f32.mrf.mxu0  ;;  %v6340_v21 = vunpack.c.l.bf16 %v6320_v43  ;;  %v6425_v9 = vadd.f32 %v8998_v38, %v6392_v33  ;;  %v6344_v61 = vunpack.c.h.bf16 %v6320_v43 }
 0x4d0   :  { %v6210_v26 = vpop.f32.mrf.mxu1  ;;  %v6303_v48 = vsel %vm6239_vm12, %v6203_v58, %v6271_v39  ;;  %v6209_v11 = vadd.f32 %v6208_v14, %v6136_v50  ;;  %v6138_v56 = vadd.f32 %v6137_v29, %v9043_v22  ;;  %v6069_v12 = vadd.f32 %v9027_v57, %v9045_v47  ;;  %v9260_v29 = vld [vmem:[#allocation27_spill] sm:$0xff] }
 0x4d1   :  { %v6323_v7 = vpack.c.bf16 %v6303_v48, %v6299_v24  ;;  %vm6240_vm13 = vcmp.gt.f32.partialorder %v6205_v3, 0.0  ;;  %v6272_v44 = vmul.f32 0.2, %v6205_v3  ;;  %6422 = vadd.xlane.f32.xlu0 %v6421_v34  ;;  %v6139_v59 = vpop.f32.mrf.mxu0  ;;  %v6393_v51 = vmul.f32 %v9035_v20, %v6340_v21  ;;  %v9261_v48 = vld [vmem:[#allocation22_spill] sm:$0xff] }
 0x4d2   :  { %v6300_v55 = vsel %vm6236_vm11, %v6201_v18, %v6268_v49  ;;  %v6211_v19 = vadd.f32 %v6210_v26, %v6138_v56  ;;  %v6140_v38 = vadd.f32 %v6139_v59, %v9048_v27  ;;  %v6212_v17 = vpop.f32.mrf.mxu1  ;;  %v6396_v15 = vmul.f32 %v9031_v23, %v6343_v10 }
 0x4d3   :  { %v6304_v37 = vsel %vm6240_vm13, %v6205_v3, %v6272_v44  ;;  %v6141_v62 = vpop.f32.mrf.mxu0  ;;  %v6426_v22 = vadd.f32 %v6425_v9, %v6393_v51  ;;  %v6397_v52 = vmul.f32 %v9035_v20, %v6344_v61  ;;  %vm6243_vm14 = vcmp.gt.f32.partialorder %v6209_v11, 0.0 }
 0x4d4   :  { %v6324_v2 = vpack.c.bf16 %v6304_v37, %v6300_v55  ;;  %v6275_v54 = vmul.f32 0.2, %v6209_v11  ;;  %vm6244_vm15 = vcmp.gt.f32.partialorder %v6211_v19, 0.0  ;;  %v6213_v28 = vadd.f32 %v6212_v17, %v6140_v38  ;;  %v6214_v27 = vpop.f32.mrf.mxu1 }
 0x4d5   :  { %v6142_v35 = vadd.f32 %v6141_v62, %v6069_v12  ;;  %6427 = vadd.xlane.f32.xlu1 %v6426_v22  ;;  %v6430_v57 = vadd.f32 %v9001_v45, %v6396_v15  ;;  %v6351_v47 = vunpack.c.h.bf16 %v6323_v7  ;;  %v6276_v60 = vmul.f32 0.2, %v6211_v19 }
 0x4d6   :  { %v6352_v4 = vunpack.c.h.bf16 %v6324_v2  ;;  %v6347_v46 = vunpack.c.l.bf16 %v6323_v7  ;;  %v6348_v32 = vunpack.c.l.bf16 %v6324_v2  ;;  %vm6247_vm1 = vcmp.gt.f32.partialorder %v6213_v28, 0.0 }
 0x4d7   :  { %v6279_v41 = vmul.f32 0.2, %v6213_v28  ;;  %v6215_v40 = vadd.f32 %v6214_v27, %v6142_v35  ;;  %v6431_v0 = vadd.f32 %v6430_v57, %v6397_v52  ;;  %v6404_v18 = vmul.f32 %v9031_v23, %v6351_v47 }
 0x4d8   :  { %v6405_v30 = vmul.f32 %v9035_v20, %v6352_v4  ;;  %v6400_v63 = vmul.f32 %v9031_v23, %v6347_v46  ;;  %v6401_v6 = vmul.f32 %v9035_v20, %v6348_v32  ;;  %v6307_v45 = vsel %vm6243_vm14, %v6209_v11, %v6275_v54 }
 0x4d9   :  { %v6311_v5 = vsel %vm6247_vm1, %v6213_v28, %v6279_v41  ;;  %vm6248_vm2 = vcmp.gt.f32.partialorder %v6215_v40, 0.0  ;;  %v6280_v25 = vmul.f32 0.2, %v6215_v40  ;;  %6432 = vadd.xlane.f32.xlu1 %v6431_v0  ;;  %v6440_v36 = vadd.f32 %v9007_v13, %v6404_v18 }
 0x4da   :  { %v6327_v1 = vpack.c.bf16 %v6311_v5, %v6307_v45  ;;  %v6435_v31 = vadd.f32 %v9009_v42, %v6400_v63  ;;  %v6308_v24 = vsel %vm6244_vm15, %v6211_v19, %v6276_v60 }
 0x4db   :  { %v6312_v58 = vsel %vm6248_vm2, %v6215_v40, %v6280_v25  ;;  %v6441_v53 = vadd.f32 %v6440_v36, %v6405_v30 }
 0x4dc   :  { %v6328_v49 = vpack.c.bf16 %v6312_v58, %v6308_v24  ;;  %v6436_v8 = vadd.f32 %v6435_v31, %v6401_v6  ;;  %v6359_v14 = vunpack.c.h.bf16 %v6327_v1  ;;  %v6355_v43 = vunpack.c.l.bf16 %v6327_v1 }
 0x4dd   :  { %6442 = vadd.xlane.f32.xlu1 %v6441_v53 }
 0x4de   :  { %6437 = vadd.xlane.f32.xlu0 %v6436_v8  ;;  %v6360_v33 = vunpack.c.h.bf16 %v6328_v49  ;;  %v6412_v39 = vmul.f32 %v9031_v23, %v6359_v14  ;;  %v6356_v50 = vunpack.c.l.bf16 %v6328_v49  ;;  %v6408_v34 = vmul.f32 %v9031_v23, %v6355_v43 }
 0x4e0   :  { %v6413_v13 = vmul.f32 %v9035_v20, %v6360_v33  ;;  %v6450_v42 = vadd.f32 %v9017_v16, %v6412_v39  ;;  %v6409_v3 = vmul.f32 %v9035_v20, %v6356_v50  ;;  %v6445_v26 = vadd.f32 %v9260_v29, %v6408_v34 }
 0x4e2   :  { %v6451_v21 = vadd.f32 %v6450_v42, %v6413_v13  ;;  %v6446_v9 = vadd.f32 %v6445_v26, %v6409_v3 }
 0x4e4   :  { %6452 = vadd.xlane.f32.xlu1 %v6451_v21  ;;  %6447 = vadd.xlane.f32.xlu0 %v6446_v9 }
 0x556   :  { %v6418_v10 = vpop.xlane.xlu0 %6417 }
 0x557   :  { %v6460_v11 = vadd.f32 %v9261_v48, %v6418_v10 }
 0x559   :  { %v7237_v56 = vmul.f32 -1.442695, %v6460_v11 }
 0x55a   :  { %v6423_v61 = vpop.xlane.xlu0 %6422 }
 0x55b   :  { %7639 = vpow2.f32 %v7237_v56  ;;  %v6461_v23 = vadd.f32 %v9261_v48, %v6423_v61 }
 0x55d   :  { %v7238_v7 = vmul.f32 -1.442695, %v6461_v23 }
 0x55e   :  { %v6428_v44 = vpop.xlane.xlu1 %6427 }
 0x55f   :  { %7641 = vpow2.f32 %v7238_v7  ;;  %v6462_v16 = vadd.f32 %v9261_v48, %v6428_v44 }
 0x561   :  { %v7239_v20 = vmul.f32 -1.442695, %v6462_v16 }
 0x562   :  { %v6433_v59 = vpop.xlane.xlu1 %6432 }
 0x563   :  { %7643 = vpow2.f32 %v7239_v20  ;;  %v6463_v51 = vadd.f32 %v9261_v48, %v6433_v59 }
 0x565   :  { %v7240_v12 = vmul.f32 -1.442695, %v6463_v51 }
 0x566   :  { %v6443_v55 = vpop.xlane.xlu1 %6442 }
 0x567   :  { %7645 = vpow2.f32 %v7240_v12  ;;  %v6438_v19 = vpop.xlane.xlu0 %6437  ;;  %v6465_v17 = vadd.f32 %v9261_v48, %v6443_v55 }
 0x568   :  { %v7640_v38 = vpop.eup %7639  ;;  %v6464_v37 = vadd.f32 %v9261_v48, %v6438_v19 }
 0x569   :  { %v6492_v62 = vadd.f32 1.0, %v7640_v38  ;;  %v7242_v22 = vmul.f32 -1.442695, %v6465_v17 }
 0x56a   :  { %v7241_v15 = vmul.f32 -1.442695, %v6464_v37 }
 0x56b   :  { %7647 = vrcp.f32 %v6492_v62 }
 0x56c   :  { %v7642_v52 = vpop.eup %7641  ;;  %7649 = vpow2.f32 %v7242_v22 }
 0x56d   :  { %v6493_v2 = vadd.f32 1.0, %v7642_v52  ;;  %7651 = vpow2.f32 %v7241_v15  ;;  %v6453_v54 = vpop.xlane.xlu1 %6452  ;;  %v6448_v35 = vpop.xlane.xlu0 %6447 }
 0x56e   :  { %v6467_v28 = vadd.f32 %v9261_v48, %v6453_v54  ;;  %v6466_v57 = vadd.f32 %v9261_v48, %v6448_v35 }
 0x56f   :  { %7653 = vrcp.f32 %v6493_v2 }
 0x570   :  { %v7644_v47 = vpop.eup %7643  ;;  %v7244_v60 = vmul.f32 -1.442695, %v6467_v28  ;;  %v7243_v4 = vmul.f32 -1.442695, %v6466_v57 }
 0x571   :  { %v6494_v27 = vadd.f32 1.0, %v7644_v47 }
 0x572   :  { %7655 = vpow2.f32 %v7244_v60 }
 0x573   :  { %7657 = vrcp.f32 %v6494_v27 }
 0x574   :  { %v7646_v46 = vpop.eup %7645  ;;  %7659 = vpow2.f32 %v7243_v4 }
 0x575   :  { %v6495_v32 = vadd.f32 1.0, %v7646_v46 }
 0x577   :  { %7661 = vrcp.f32 %v6495_v32 }
 0x578   :  { %v7648_v41 = vpop.eup %7647 }
 0x579   :  { %v7650_v40 = vpop.eup %7649  ;;  %6517 = vst.msk [vmem:[%s9133_s7] sm:$0xff] %vm6516_vm0, %v7648_v41 }
 0x57a   :  { %v7652_v0 = vpop.eup %7651  ;;  %v6497_v18 = vadd.f32 1.0, %v7650_v40 }
 0x57b   :  { %v6496_v30 = vadd.f32 1.0, %v7652_v0 }
 0x57c   :  { %v7654_v63 = vpop.eup %7653  ;;  %7663 = vrcp.f32 %v6497_v18 }
 0x57d   :  { %6518 = vst.msk [vmem:[%s9133_s7 + $0x8] sm:$0xff] %vm6516_vm0, %v7654_v63  ;;  %7665 = vrcp.f32 %v6496_v30 }
 0x57f   :  { %v7656_v6 = vpop.eup %7655 }
 0x580   :  { %v7658_v45 = vpop.eup %7657  ;;  %v6499_v5 = vadd.f32 1.0, %v7656_v6 }
 0x581   :  { %v7660_v25 = vpop.eup %7659  ;;  %6519 = vst.msk [vmem:[%s9133_s7 + $0x10] sm:$0xff] %vm6516_vm0, %v7658_v45 }
 0x582   :  { %7667 = vrcp.f32 %v6499_v5  ;;  %v6498_v1 = vadd.f32 1.0, %v7660_v25 }
 0x584   :  { %v7662_v36 = vpop.eup %7661  ;;  %7669 = vrcp.f32 %v6498_v1 }
 0x585   :  { %6520 = vst.msk [vmem:[%s9133_s7 + $0x18] sm:$0xff] %vm6516_vm0, %v7662_v36 }
 0x589   :  { %v7664_v31 = vpop.eup %7663 }
 0x58a   :  { %v7666_v24 = vpop.eup %7665  ;;  %6522 = vst.msk [vmem:[%s9133_s7 + $0x28] sm:$0xff] %vm6516_vm0, %v7664_v31 }
 0x58b   :  { %6521 = vst.msk [vmem:[%s9133_s7 + $0x20] sm:$0xff] %vm6516_vm0, %v7666_v24 }
 0x58f   :  { %v7668_v58 = vpop.eup %7667 }
 0x590   :  { %6524 = vst.msk [vmem:[%s9133_s7 + $0x38] sm:$0xff] %vm6516_vm0, %v7668_v58 }
 0x591   :  { %v7670_v49 = vpop.eup %7669 }
 0x592   :  { %6523 = vst.msk [vmem:[%s9133_s7 + $0x30] sm:$0xff] %vm6516_vm0, %v7670_v49 }
 0x593   :  { %6529 = vsyncpa [#allocation7], 1 }
 0x594   :  { %6530 = vsyncpa [#allocation9], 1 }
 0x595   :  { %6531 = vsyncmov [#allocation4] }
 0x598   :  { %s6532_s17 = vpop.sfrf %6531 }
 0x599   :  { %p7245_p11 = scmp.ne.s32.totalorder %s6532_s17, 0 }
 0x59b   :  { %6536 = shalt.err (%p7245_p11)  }
 0x59c   :  { %6538 = vsyncmov [#allocation4 + $0x1] }
 0x59f   :  { %s6539_s18 = vpop.sfrf %6538 }
 0x5a0   :  { %p7246_p12 = scmp.ne.s32.totalorder %s6539_s18, 0 }
 0x5a2   :  { %6543 = shalt.err (%p7246_p12)  }

</bundles_post_ra>
